<compile_context>
chip_gen: v7x
topology: tpu7x:2x2x1
jax: 0.10.0
libtpu: 0.0.40
codegen_flags: <defaults>
</compile_context>

<pallas_src>
import jax
import jax.numpy as jnp
from jax.experimental import pallas as pl
from jax.experimental.pallas import tpu as pltpu


def _round_up(d, m=128):
    return ((d + m - 1) // m) * m


def _pad_to(a, shape):
    pads = [(0, t - s) for s, t in zip(a.shape, shape)]
    return jnp.pad(a, pads)


def _make_kernel(num_hidden, alpha, eps=1e-12):
    def kernel(*refs):
        # refs = [x, w1, b1, ..., wH, bH, w_last, b_last, logits_out, feat_out]
        x_ref = refs[0]
        wb = refs[1:1 + 2 * (num_hidden + 1)]
        logits_ref = refs[-2]
        feat_ref = refs[-1]

        h = x_ref[...]  # f32 [B, d0_pad]
        for i in range(num_hidden):
            w = wb[2 * i][...]        # bf16 [in_pad, out_pad]
            b = wb[2 * i + 1][...]    # bf16 [1, out_pad]
            h = jnp.dot(h.astype(jnp.bfloat16), w,
                        preferred_element_type=jnp.float32)
            h = jnp.maximum(h + b.astype(jnp.float32), 0.0)
            # dropout: identity (eval mode)

        # Global L2 norm over ALL elements (padding columns are exact zeros).
        ssq = jnp.sum(h * h)
        s = jnp.float32(alpha) * jax.lax.rsqrt(ssq + jnp.float32(eps))
        feat = h * s                                   # alpha * h / ||h||
        feat_ref[...] = feat

        # fc_last consumes the normalized feature (per the PyTorch spec).
        w_last = wb[-2][...]
        b_last = wb[-1][...]
        logits_ref[...] = (
            jnp.dot(feat.astype(jnp.bfloat16), w_last,
                    preferred_element_type=jnp.float32)
            + b_last.astype(jnp.float32))

    return kernel


def l2softmax_forward(x, params, alpha=16.0):
    """x: [B, data_dim] f32.  params: list of (W [in, out], b [out]) f32.

    Returns (logits [B, num_classes], feature [B, feat_dim]).
    """
    B, data_dim = x.shape
    num_hidden = len(params) - 1
    num_classes = params[-1][0].shape[1]
    feat_dim = params[-2][0].shape[1]

    # Logical and lane-padded layer widths.
    dims = [data_dim] + [w.shape[1] for (w, _) in params]
    pdims = [_round_up(d) for d in dims]

    # Host-side prep: zero-pad to 128-multiples and cast weights/biases to bf16.
    # NOTE: in a serving loop, do this once and reuse the prepared arrays across calls.
    flat_args = [_pad_to(x.astype(jnp.float32), (B, pdims[0]))]
    for i, (w, b) in enumerate(params):
        wp = _pad_to(w.astype(jnp.bfloat16), (pdims[i], pdims[i + 1]))
        bp = _pad_to(b.reshape(1, -1).astype(jnp.bfloat16), (1, pdims[i + 1]))
        flat_args.append(wp)
        flat_args.append(bp)

    kernel = _make_kernel(num_hidden, float(alpha))

    logits_p, feat_p = pl.pallas_call(
        kernel,
        out_shape=(
            jax.ShapeDtypeStruct((B, pdims[-1]), jnp.float32),
            jax.ShapeDtypeStruct((B, pdims[-2]), jnp.float32),
        ),
        in_specs=[pl.BlockSpec(memory_space=pltpu.MemorySpace.VMEM)] * len(flat_args),
        out_specs=(
            pl.BlockSpec(memory_space=pltpu.MemorySpace.VMEM),
            pl.BlockSpec(memory_space=pltpu.MemorySpace.VMEM),
        ),
        compiler_params=pltpu.CompilerParams(vmem_limit_bytes=32 * 1024 * 1024),
    )(*flat_args)

    # Slice padded outputs back to logical shapes.
    return logits_p[:, :num_classes], feat_p[:, :feat_dim]


def init_params(key, data_dim, num_units, num_classes):
    """Deterministic synthetic parameters; weights as [in, out], biases as [out]."""
    dims = [data_dim] + list(num_units) + [num_classes]
    params = []
    for din, dout in zip(dims[:-1], dims[1:]):
        key, kw, kb = jax.random.split(key, 3)
        scale = 1.0 / (din ** 0.5)
        w = jax.random.uniform(kw, (din, dout), jnp.float32, -scale, scale)
        b = jax.random.uniform(kb, (dout,), jnp.float32, -scale, scale)
        params.append((w, b))
    return params


def _ref_forward(x, params, alpha):
    """Plain-JAX reference mirroring the kernel's bf16-weight / f32-accumulate path."""
    h = x.astype(jnp.float32)
    for (w, b) in params[:-1]:
        h = jnp.dot(h.astype(jnp.bfloat16), w.astype(jnp.bfloat16),
                    preferred_element_type=jnp.float32)
        h = jnp.maximum(h + b.astype(jnp.bfloat16).astype(jnp.float32), 0.0)
    l2 = jnp.sqrt(jnp.sum(h * h))
    feat = alpha * h / l2
    w, b = params[-1]
    logits = (jnp.dot(feat.astype(jnp.bfloat16), w.astype(jnp.bfloat16),
                      preferred_element_type=jnp.float32)
              + b.astype(jnp.bfloat16).astype(jnp.float32))
    return logits, feat


if __name__ == "__main__":
    key = jax.random.PRNGKey(0)
    kx, kp = jax.random.split(key)

    B = 8
    data_dim = 32
    num_classes = 10
    num_units = [100, 1000, 1000, 100, 20]
    alpha = 16.0

    x = jax.random.normal(kx, (B, data_dim), jnp.float32)
    params = init_params(kp, data_dim, num_units, num_classes)

    logits, feature = l2softmax_forward(x, params, alpha=alpha)
    jax.block_until_ready((logits, feature))

    logits_ref, feat_ref = _ref_forward(x, params, alpha)

    assert logits.shape == (B, num_classes), logits.shape
    assert feature.shape == (B, num_units[-1]), feature.shape
    # bf16-weight path -> bf16-level tolerance.
    assert jnp.allclose(logits, logits_ref, atol=2e-2, rtol=2e-2), \
        float(jnp.max(jnp.abs(logits - logits_ref)))
    assert jnp.allclose(feature, feat_ref, atol=2e-2, rtol=2e-2), \
        float(jnp.max(jnp.abs(feature - feat_ref)))

    print("KERNEL_OK")
</pallas_src>

<mosaic_0001>
module attributes {stable_mosaic.version = 11 : i64} {
  func.func @kernel(%arg0: memref<8x128xf32, #tpu.memory_space<vmem>>, %arg1: memref<128x128xbf16, #tpu.memory_space<vmem>>, %arg2: memref<1x128xbf16, #tpu.memory_space<vmem>>, %arg3: memref<128x1024xbf16, #tpu.memory_space<vmem>>, %arg4: memref<1x1024xbf16, #tpu.memory_space<vmem>>, %arg5: memref<1024x1024xbf16, #tpu.memory_space<vmem>>, %arg6: memref<1x1024xbf16, #tpu.memory_space<vmem>>, %arg7: memref<1024x128xbf16, #tpu.memory_space<vmem>>, %arg8: memref<1x128xbf16, #tpu.memory_space<vmem>>, %arg9: memref<128x128xbf16, #tpu.memory_space<vmem>>, %arg10: memref<1x128xbf16, #tpu.memory_space<vmem>>, %arg11: memref<128x128xbf16, #tpu.memory_space<vmem>>, %arg12: memref<1x128xbf16, #tpu.memory_space<vmem>>, %arg13: memref<8x128xf32, #tpu.memory_space<vmem>>, %arg14: memref<8x128xf32, #tpu.memory_space<vmem>>) attributes {dimension_semantics = [], scalar_prefetch = 0 : i64, scratch_operands = 0 : i64, tpu.core_type = #tpu.core_type<tc>} {
    %c0 = arith.constant 0 : index
    %c0_0 = arith.constant 0 : index
    %0 = vector.load %arg0[%c0, %c0_0] : memref<8x128xf32, #tpu.memory_space<vmem>>, vector<8x128xf32>
    %c0_1 = arith.constant 0 : index
    %c0_2 = arith.constant 0 : index
    %1 = vector.load %arg1[%c0_1, %c0_2] : memref<128x128xbf16, #tpu.memory_space<vmem>>, vector<128x128xbf16>
    %c0_3 = arith.constant 0 : index
    %c0_4 = arith.constant 0 : index
    %2 = vector.load %arg2[%c0_3, %c0_4] : memref<1x128xbf16, #tpu.memory_space<vmem>>, vector<1x128xbf16>
    %3 = arith.truncf %0 : vector<8x128xf32> to vector<8x128xbf16>
    %cst = arith.constant dense<0.000000e+00> : vector<8x128xf32>
    %4 = tpu.matmul %3, %1, %cst {dimension_numbers = #tpu.dot_dimension_numbers<[1], [0], [0], [1], [0, 0, 1, 1], [], []>} : vector<8x128xbf16>, vector<128x128xbf16>, vector<8x128xf32> -> vector<8x128xf32>
    %5 = arith.extf %2 : vector<1x128xbf16> to vector<1x128xf32>
    %6 = vector.broadcast %5 : vector<1x128xf32> to vector<8x128xf32>
    %7 = arith.addf %4, %6 : vector<8x128xf32>
    %cst_5 = arith.constant 0.000000e+00 : f32
    %8 = vector.broadcast %cst_5 : f32 to vector<8x128xf32>
    %9 = arith.maximumf %7, %8 : vector<8x128xf32>
    %c0_6 = arith.constant 0 : index
    %c0_7 = arith.constant 0 : index
    %10 = vector.load %arg3[%c0_6, %c0_7] : memref<128x1024xbf16, #tpu.memory_space<vmem>>, vector<128x1024xbf16>
    %c0_8 = arith.constant 0 : index
    %c0_9 = arith.constant 0 : index
    %11 = vector.load %arg4[%c0_8, %c0_9] : memref<1x1024xbf16, #tpu.memory_space<vmem>>, vector<1x1024xbf16>
    %12 = arith.truncf %9 : vector<8x128xf32> to vector<8x128xbf16>
    %cst_10 = arith.constant dense<0.000000e+00> : vector<8x1024xf32>
    %13 = tpu.matmul %12, %10, %cst_10 {dimension_numbers = #tpu.dot_dimension_numbers<[1], [0], [0], [1], [0, 0, 1, 1], [], []>} : vector<8x128xbf16>, vector<128x1024xbf16>, vector<8x1024xf32> -> vector<8x1024xf32>
    %14 = arith.extf %11 : vector<1x1024xbf16> to vector<1x1024xf32>
    %15 = vector.broadcast %14 : vector<1x1024xf32> to vector<8x1024xf32>
    %16 = arith.addf %13, %15 : vector<8x1024xf32>
    %cst_11 = arith.constant 0.000000e+00 : f32
    %17 = vector.broadcast %cst_11 : f32 to vector<8x1024xf32>
    %18 = arith.maximumf %16, %17 : vector<8x1024xf32>
    %c0_12 = arith.constant 0 : index
    %c0_13 = arith.constant 0 : index
    %19 = vector.load %arg5[%c0_12, %c0_13] : memref<1024x1024xbf16, #tpu.memory_space<vmem>>, vector<1024x1024xbf16>
    %c0_14 = arith.constant 0 : index
    %c0_15 = arith.constant 0 : index
    %20 = vector.load %arg6[%c0_14, %c0_15] : memref<1x1024xbf16, #tpu.memory_space<vmem>>, vector<1x1024xbf16>
    %21 = arith.truncf %18 : vector<8x1024xf32> to vector<8x1024xbf16>
    %cst_16 = arith.constant dense<0.000000e+00> : vector<8x1024xf32>
    %22 = tpu.matmul %21, %19, %cst_16 {dimension_numbers = #tpu.dot_dimension_numbers<[1], [0], [0], [1], [0, 0, 1, 1], [], []>} : vector<8x1024xbf16>, vector<1024x1024xbf16>, vector<8x1024xf32> -> vector<8x1024xf32>
    %23 = arith.extf %20 : vector<1x1024xbf16> to vector<1x1024xf32>
    %24 = vector.broadcast %23 : vector<1x1024xf32> to vector<8x1024xf32>
    %25 = arith.addf %22, %24 : vector<8x1024xf32>
    %cst_17 = arith.constant 0.000000e+00 : f32
    %26 = vector.broadcast %cst_17 : f32 to vector<8x1024xf32>
    %27 = arith.maximumf %25, %26 : vector<8x1024xf32>
    %c0_18 = arith.constant 0 : index
    %c0_19 = arith.constant 0 : index
    %28 = vector.load %arg7[%c0_18, %c0_19] : memref<1024x128xbf16, #tpu.memory_space<vmem>>, vector<1024x128xbf16>
    %c0_20 = arith.constant 0 : index
    %c0_21 = arith.constant 0 : index
    %29 = vector.load %arg8[%c0_20, %c0_21] : memref<1x128xbf16, #tpu.memory_space<vmem>>, vector<1x128xbf16>
    %30 = arith.truncf %27 : vector<8x1024xf32> to vector<8x1024xbf16>
    %cst_22 = arith.constant dense<0.000000e+00> : vector<8x128xf32>
    %31 = tpu.matmul %30, %28, %cst_22 {dimension_numbers = #tpu.dot_dimension_numbers<[1], [0], [0], [1], [0, 0, 1, 1], [], []>} : vector<8x1024xbf16>, vector<1024x128xbf16>, vector<8x128xf32> -> vector<8x128xf32>
    %32 = arith.extf %29 : vector<1x128xbf16> to vector<1x128xf32>
    %33 = vector.broadcast %32 : vector<1x128xf32> to vector<8x128xf32>
    %34 = arith.addf %31, %33 : vector<8x128xf32>
    %cst_23 = arith.constant 0.000000e+00 : f32
    %35 = vector.broadcast %cst_23 : f32 to vector<8x128xf32>
    %36 = arith.maximumf %34, %35 : vector<8x128xf32>
    %c0_24 = arith.constant 0 : index
    %c0_25 = arith.constant 0 : index
    %37 = vector.load %arg9[%c0_24, %c0_25] : memref<128x128xbf16, #tpu.memory_space<vmem>>, vector<128x128xbf16>
    %c0_26 = arith.constant 0 : index
    %c0_27 = arith.constant 0 : index
    %38 = vector.load %arg10[%c0_26, %c0_27] : memref<1x128xbf16, #tpu.memory_space<vmem>>, vector<1x128xbf16>
    %39 = arith.truncf %36 : vector<8x128xf32> to vector<8x128xbf16>
    %cst_28 = arith.constant dense<0.000000e+00> : vector<8x128xf32>
    %40 = tpu.matmul %39, %37, %cst_28 {dimension_numbers = #tpu.dot_dimension_numbers<[1], [0], [0], [1], [0, 0, 1, 1], [], []>} : vector<8x128xbf16>, vector<128x128xbf16>, vector<8x128xf32> -> vector<8x128xf32>
    %41 = arith.extf %38 : vector<1x128xbf16> to vector<1x128xf32>
    %42 = vector.broadcast %41 : vector<1x128xf32> to vector<8x128xf32>
    %43 = arith.addf %40, %42 : vector<8x128xf32>
    %cst_29 = arith.constant 0.000000e+00 : f32
    %44 = vector.broadcast %cst_29 : f32 to vector<8x128xf32>
    %45 = arith.maximumf %43, %44 : vector<8x128xf32>
    %46 = arith.mulf %45, %45 : vector<8x128xf32>
    %47 = vector.shape_cast %46 : vector<8x128xf32> to vector<1x8x128xf32>
    %cst_30 = arith.constant dense<0.000000e+00> : vector<1xf32>
    %48 = vector.multi_reduction <add>, %47, %cst_30 [1, 2] : vector<1x8x128xf32> to vector<1xf32>
    %49 = vector.shape_cast %48 : vector<1xf32> to vector<1x1x1xf32>
    %50 = vector.extract %49[0, 0, 0] : f32 from vector<1x1x1xf32>
    %cst_31 = arith.constant 9.99999996E-13 : f32
    %51 = arith.addf %50, %cst_31 : f32
    %52 = math.rsqrt %51 : f32
    %cst_32 = arith.constant 1.600000e+01 : f32
    %53 = arith.mulf %cst_32, %52 : f32
    %54 = vector.broadcast %53 : f32 to vector<8x128xf32>
    %55 = arith.mulf %45, %54 : vector<8x128xf32>
    %c0_33 = arith.constant 0 : index
    %c0_34 = arith.constant 0 : index
    %56 = vector.load %arg14[%c0_33, %c0_34] : memref<8x128xf32, #tpu.memory_space<vmem>>, vector<8x128xf32>
    tpu.vector_store %arg14[%c0_33, %c0_34], %55 {strides = array<i32>} : memref<8x128xf32, #tpu.memory_space<vmem>>, vector<8x128xf32>,
    %c0_35 = arith.constant 0 : index
    %c0_36 = arith.constant 0 : index
    %57 = vector.load %arg11[%c0_35, %c0_36] : memref<128x128xbf16, #tpu.memory_space<vmem>>, vector<128x128xbf16>
    %c0_37 = arith.constant 0 : index
    %c0_38 = arith.constant 0 : index
    %58 = vector.load %arg12[%c0_37, %c0_38] : memref<1x128xbf16, #tpu.memory_space<vmem>>, vector<1x128xbf16>
    %59 = arith.truncf %55 : vector<8x128xf32> to vector<8x128xbf16>
    %cst_39 = arith.constant dense<0.000000e+00> : vector<8x128xf32>
    %60 = tpu.matmul %59, %57, %cst_39 {dimension_numbers = #tpu.dot_dimension_numbers<[1], [0], [0], [1], [0, 0, 1, 1], [], []>} : vector<8x128xbf16>, vector<128x128xbf16>, vector<8x128xf32> -> vector<8x128xf32>
    %61 = arith.extf %58 : vector<1x128xbf16> to vector<1x128xf32>
    %62 = vector.broadcast %61 : vector<1x128xf32> to vector<8x128xf32>
    %63 = arith.addf %60, %62 : vector<8x128xf32>
    %c0_40 = arith.constant 0 : index
    %c0_41 = arith.constant 0 : index
    %64 = vector.load %arg13[%c0_40, %c0_41] : memref<8x128xf32, #tpu.memory_space<vmem>>, vector<8x128xf32>
    tpu.vector_store %arg13[%c0_40, %c0_41], %63 {strides = array<i32>} : memref<8x128xf32, #tpu.memory_space<vmem>>, vector<8x128xf32>,
    return
  }
}

</mosaic_0001>

<bundles_post_ra>
// kernel: tpu_custom_call.1
= control target key start
LH: loop header
LB: loop body
LE: loop exit
PB: predicated region body
PF: predicated region fallthrough
CT: control target
= control target key end

     0   :  { %20 = vsyncpa [#allocation3], 0  ;;  %s7592_s0 = inlined_call_operand.hbm [shape: f32[8,128], index: 0, kind: input, shape index: {}]   ;;  %s7593_s1 = inlined_call_operand.hbm [shape: bf16[128,128], index: 1, kind: input, shape index: {}]   ;;  %s7594_s2 = inlined_call_operand.hbm [shape: bf16[1,128], index: 2, kind: input, shape index: {}]   ;;  %s7595_s3 = inlined_call_operand.hbm [shape: bf16[128,1024], index: 3, kind: input, shape index: {}]   ;;  %s7596_s4 = inlined_call_operand.hbm [shape: bf16[1,1024], index: 4, kind: input, shape index: {}]   ;;  %s7597_s5 = inlined_call_operand.hbm [shape: bf16[1024,1024], index: 5, kind: input, shape index: {}]   ;;  %s7598_s6 = inlined_call_operand.hbm [shape: bf16[1,1024], index: 6, kind: input, shape index: {}]   ;;  %s7599_s7 = inlined_call_operand.hbm [shape: bf16[1024,128], index: 7, kind: input, shape index: {}]   ;;  %s7600_s8 = inlined_call_operand.hbm [shape: bf16[1,128], index: 8, kind: input, shape index: {}]   ;;  %s7601_s9 = inlined_call_operand.hbm [shape: bf16[128,128], index: 9, kind: input, shape index: {}]   ;;  %s7602_s10 = inlined_call_operand.hbm [shape: bf16[1,128], index: 10, kind: input, shape index: {}]   ;;  %s7603_s11 = inlined_call_operand.hbm [shape: bf16[128,128], index: 11, kind: input, shape index: {}]   ;;  %s7604_s12 = inlined_call_operand.hbm [shape: bf16[1,128], index: 12, kind: input, shape index: {}]   ;;  %s7605_s13 = inlined_call_operand.hbm [shape: f32[8,128], index: 13, kind: output, shape index: {0}]   ;;  %s7606_s14 = inlined_call_operand.hbm [shape: f32[8,128], index: 14, kind: output, shape index: {1}]  }
   0x1   :  { %21 = vsyncpa [#allocation6], 0 }
   0x2   :  { %22 = vsyncpa [#allocation9], 0 }
   0x3   :  { %23 = vsyncpa [#allocation12], 0 }
   0x4   :  { %24 = vsyncpa [#allocation15], 0 }
   0x5   :  { %25 = vsyncpa [#allocation18], 0 }
   0x6   :  { %26 = vsyncpa [#allocation21], 0 }
   0x7   :  { %27 = vsyncpa [#allocation4], 0 }
   0x8   :  { %28 = vsyncpa [#allocation25], 0  ;;  %s7102_s29 = smov [#allocation5]   ;;  %s6754_s17 = scalar_lea.hbm %s7593_s1, 1024 }
   0x9   :  { %s44_s30 = sshll.u32 %s7102_s29, 4  ;;  %p6755_p0 = scmp.ne.s32.totalorder %s7593_s1, %s6754_s17  ;;  %s45_s30 = int_to_ptr.vmem [resolvable:$true] %s44_s30 }
   0xa   :  { %p6758_p1 = scmp.lt.u32.totalorder %s6754_s17, %s7593_s1 }
   0xc   :  { %p6760_p2 = pnand %p6758_p1, %p6755_p0 }
   0xe   :  { %6763 = shalt.err (!%p6760_p2)
}
   0xf   :  { %s6764_s22 = scalar_lea.vmem %s45_s30, 1024  ;;  %p6769_p4 = scmp.lt.s32.totalorder %s45_s30, %s45_s30 }
  0x10   :  { %p6765_p3 = scmp.ne.s32.totalorder %s45_s30, %s6764_s22  ;;  %p6770_p5 = scmp.lt.s32.totalorder %s6764_s22, %s6764_s22 }
  0x12   :  { %p6771_p6 = por %p6770_p5, %p6769_p4 }
  0x14   :  { %p6772_p7 = pnand %p6771_p6, %p6765_p3 }
  0x16   :  { %6775 = shalt.err (!%p6772_p7)
}
  0x17   :  { %s7607_s23 = smov 64   ;;  %s7104_s24 = smov 4  }
  0x18   :  { %50 = dma.hbm_to_vmem [thread:$0]  %s7593_s1, 1024, %s45_s30, [#allocation6], %s7607_s23, %s7607_s23, %s7104_s24  }
  0x19   :  { %s7105_s27 = smov [#allocation8]   ;;  %s6776_s16 = scalar_lea.hbm %s7595_s3, 8192 }
  0x1a   :  { %s66_s28 = sshll.u32 %s7105_s27, 4  ;;  %p6777_p8 = scmp.ne.s32.totalorder %s7595_s3, %s6776_s16  ;;  %s67_s28 = int_to_ptr.vmem [resolvable:$true] %s66_s28 }
  0x1b   :  { %p6780_p9 = scmp.lt.u32.totalorder %s6776_s16, %s7595_s3 }
  0x1d   :  { %p6782_p10 = pnand %p6780_p9, %p6777_p8 }
  0x1f   :  { %6785 = shalt.err (!%p6782_p10)
}
  0x20   :  { %s6786_s21 = scalar_lea.vmem %s67_s28, 8192  ;;  %p6791_p12 = scmp.lt.s32.totalorder %s67_s28, %s67_s28 }
  0x21   :  { %p6787_p11 = scmp.ne.s32.totalorder %s67_s28, %s6786_s21  ;;  %p6792_p13 = scmp.lt.s32.totalorder %s6786_s21, %s6786_s21 }
  0x23   :  { %p6793_p0 = por %p6792_p13, %p6791_p12 }
  0x25   :  { %p6794_p1 = pnand %p6793_p0, %p6787_p11 }
  0x27   :  { %6797 = shalt.err (!%p6794_p1)
}
  0x28   :  { %s7106_s1 = smov 512   ;;  %s7107_s30 = smov 32  }
  0x29   :  { %72 = dma.hbm_to_vmem [thread:$0]  %s7595_s3, 8192, %s67_s28, [#allocation9], %s7106_s1, %s7106_s1, %s7107_s30  }
  0x2a   :  { %s7108_s26 = smov [#allocation11]   ;;  %s7109_s29 = smov [#allocation14]  }
  0x2b   :  { %s88_s27 = sshll.u32 %s7108_s26, 4  ;;  %s110_s15 = sshll.u32 %s7109_s29, 4  ;;  %s89_s27 = int_to_ptr.vmem [resolvable:$true] %s88_s27  ;;  %s7226_s15 = int_to_ptr.vmem [resolvable:$true] %s110_s15 }
  0x2c   :  { %s6798_s18 = scalar_lea.hbm %s7597_s5, 65536 }
  0x2d   :  { %p6799_p2 = scmp.ne.s32.totalorder %s7597_s5, %s6798_s18  ;;  %p6802_p3 = scmp.lt.u32.totalorder %s6798_s18, %s7597_s5 }
  0x2f   :  { %p6804_p4 = pnand %p6802_p3, %p6799_p2 }
  0x31   :  { %6807 = shalt.err (!%p6804_p4)
}
  0x32   :  { %s6808_s3 = scalar_lea.vmem %s89_s27, 65536  ;;  %p6813_p6 = scmp.lt.s32.totalorder %s89_s27, %s89_s27 }
  0x33   :  { %p6809_p5 = scmp.ne.s32.totalorder %s89_s27, %s6808_s3  ;;  %p6814_p7 = scmp.lt.s32.totalorder %s6808_s3, %s6808_s3 }
  0x35   :  { %p6815_p8 = por %p6814_p7, %p6813_p6 }
  0x37   :  { %p6816_p9 = pnand %p6815_p8, %p6809_p5 }
  0x39   :  { %6819 = shalt.err (!%p6816_p9)
}
  0x3a   :  { %94 = dma.hbm_to_vmem [thread:$0]  %s7597_s5, 65536, %s89_s27, [#allocation12], %s7106_s1, %s7106_s1, %s7107_s30  }
  0x3b   :  { %s6820_s29 = scalar_lea.hbm %s7599_s7, 8192 }
  0x3c   :  { %p6821_p10 = scmp.ne.s32.totalorder %s7599_s7, %s6820_s29  ;;  %p6824_p11 = scmp.lt.u32.totalorder %s6820_s29, %s7599_s7 }
  0x3e   :  { %p6826_p12 = pnand %p6824_p11, %p6821_p10 }
  0x40   :  { %6829 = shalt.err (!%p6826_p12)
}
  0x41   :  { %s6830_s19 = scalar_lea.vmem %s7226_s15, 8192  ;;  %p6835_p0 = scmp.lt.s32.totalorder %s7226_s15, %s7226_s15 }
  0x42   :  { %p6831_p13 = scmp.ne.s32.totalorder %s7226_s15, %s6830_s19  ;;  %p6836_p1 = scmp.lt.s32.totalorder %s6830_s19, %s6830_s19 }
  0x44   :  { %p6837_p2 = por %p6836_p1, %p6835_p0 }
  0x46   :  { %p6838_p3 = pnand %p6837_p2, %p6831_p13 }
  0x48   :  { %6841 = shalt.err (!%p6838_p3)
}
  0x49   :  { %s7609_s5 = smov 64   ;;  %s7110_s27 = smov [#allocation17]  }
  0x4a   :  { %116 = dma.hbm_to_vmem [thread:$0]  %s7599_s7, 8192, %s7226_s15, [#allocation15], %s7609_s5, %s7609_s5, %s7104_s24  }
  0x4b   :  { %s132_s20 = sshll.u32 %s7110_s27, 4  ;;  %s7111_s21 = smov [#allocation20]   ;;  %s133_s20 = int_to_ptr.vmem [resolvable:$true] %s132_s20 }
  0x4c   :  { %s154_s3 = sshll.u32 %s7111_s21, 4  ;;  %s6842_s25 = scalar_lea.hbm %s7601_s9, 1024  ;;  %s7260_s3 = int_to_ptr.vmem [resolvable:$true] %s154_s3 }
  0x4d   :  { %p6843_p4 = scmp.ne.s32.totalorder %s7601_s9, %s6842_s25  ;;  %p6846_p5 = scmp.lt.u32.totalorder %s6842_s25, %s7601_s9 }
  0x4f   :  { %p6848_p6 = pnand %p6846_p5, %p6843_p4 }
  0x51   :  { %6851 = shalt.err (!%p6848_p6)
}
  0x52   :  { %s6852_s7 = scalar_lea.vmem %s133_s20, 1024  ;;  %p6857_p8 = scmp.lt.s32.totalorder %s133_s20, %s133_s20 }
  0x53   :  { %p6853_p7 = scmp.ne.s32.totalorder %s133_s20, %s6852_s7  ;;  %p6858_p9 = scmp.lt.s32.totalorder %s6852_s7, %s6852_s7 }
  0x55   :  { %p6859_p10 = por %p6858_p9, %p6857_p8 }
  0x57   :  { %p6860_p11 = pnand %p6859_p10, %p6853_p7 }
  0x59   :  { %6863 = shalt.err (!%p6860_p11)
}
  0x5a   :  { %138 = dma.hbm_to_vmem [thread:$0]  %s7601_s9, 1024, %s133_s20, [#allocation18], %s7609_s5, %s7609_s5, %s7104_s24  }
  0x5b   :  { %s6864_s1 = scalar_lea.hbm %s7603_s11, 1024 }
  0x5c   :  { %p6865_p12 = scmp.ne.s32.totalorder %s7603_s11, %s6864_s1  ;;  %p6868_p13 = scmp.lt.u32.totalorder %s6864_s1, %s7603_s11 }
  0x5e   :  { %p6870_p0 = pnand %p6868_p13, %p6865_p12 }
  0x60   :  { %6873 = shalt.err (!%p6870_p0)
}
  0x61   :  { %s6874_s22 = scalar_lea.vmem %s7260_s3, 1024  ;;  %p6879_p2 = scmp.lt.s32.totalorder %s7260_s3, %s7260_s3 }
  0x62   :  { %p6875_p1 = scmp.ne.s32.totalorder %s7260_s3, %s6874_s22  ;;  %p6880_p3 = scmp.lt.s32.totalorder %s6874_s22, %s6874_s22 }
  0x64   :  { %p6881_p4 = por %p6880_p3, %p6879_p2 }
  0x66   :  { %p6882_p5 = pnand %p6881_p4, %p6875_p1 }
  0x68   :  { %6885 = shalt.err (!%p6882_p5)
}
  0x69   :  { %160 = dma.hbm_to_vmem [thread:$0]  %s7603_s11, 1024, %s7260_s3, [#allocation21], %s7609_s5, %s7609_s5, %s7104_s24  }
  0x6a   :  { %s7112_s25 = smov [#allocation2]   ;;  %s7113_s29 = smov [#allocation7]  }
  0x6b   :  { %s35_s26 = sshll.u32 %s7112_s25, 4  ;;  %s57_s16 = sshll.u32 %s7113_s29, 4  ;;  %s36_s26 = int_to_ptr.vmem [resolvable:$true] %s35_s26  ;;  %s58_s16 = int_to_ptr.vmem [resolvable:$true] %s57_s16 }
  0x6c   :  { %s6886_s15 = scalar_lea.hbm %s7592_s0, 128 }
  0x6d   :  { %p6887_p6 = scmp.ne.s32.totalorder %s7592_s0, %s6886_s15  ;;  %p6890_p7 = scmp.lt.u32.totalorder %s6886_s15, %s7592_s0 }
  0x6f   :  { %p6892_p8 = pnand %p6890_p7, %p6887_p6 }
  0x71   :  { %6895 = shalt.err (!%p6892_p8)
}
  0x72   :  { %s6896_s11 = scalar_lea.vmem %s36_s26, 128  ;;  %p6901_p10 = scmp.lt.s32.totalorder %s36_s26, %s36_s26 }
  0x73   :  { %p6897_p9 = scmp.ne.s32.totalorder %s36_s26, %s6896_s11  ;;  %p6902_p11 = scmp.lt.s32.totalorder %s6896_s11, %s6896_s11 }
  0x75   :  { %p6903_p12 = por %p6902_p11, %p6901_p10 }
  0x77   :  { %p6904_p13 = pnand %p6903_p12, %p6897_p9 }
  0x79   :  { %6907 = shalt.err (!%p6904_p13)
}
  0x7a   :  { %38 = dma.hbm_to_vmem [thread:$0]  %s7592_s0, 128, %s36_s26, [#allocation3]  }
  0x7b   :  { %s6908_s27 = scalar_lea.hbm %s7594_s2, 16 }
  0x7c   :  { %p6909_p0 = scmp.ne.s32.totalorder %s7594_s2, %s6908_s27  ;;  %p6912_p1 = scmp.lt.u32.totalorder %s6908_s27, %s7594_s2 }
  0x7e   :  { %p6914_p2 = pnand %p6912_p1, %p6909_p0 }
  0x80   :  { %6917 = shalt.err (!%p6914_p2)
}
  0x81   :  { %s6918_s20 = scalar_lea.vmem %s58_s16, 16  ;;  %s6922_s25 = scalar_lea.vmem %s58_s16, 32 }
  0x82   :  { %p6919_p3 = scmp.ne.s32.totalorder %s58_s16, %s6918_s20  ;;  %p6923_p4 = scmp.lt.s32.totalorder %s58_s16, %s58_s16 }
  0x83   :  { %p6924_p5 = scmp.lt.s32.totalorder %s6922_s25, %s6918_s20 }
  0x85   :  { %p6925_p6 = por %p6924_p5, %p6923_p4 }
  0x87   :  { %p6926_p7 = pnand %p6925_p6, %p6919_p3 }
  0x89   :  { %6929 = shalt.err (!%p6926_p7)
}
  0x8a   :  { %60 = dma.hbm_to_vmem [thread:$0]  %s7594_s2, 16, %s58_s16, [#allocation6]  }
  0x8b   :  { %s7114_s29 = smov [#allocation10]   ;;  %s7115_s7 = smov [#allocation13]  }
  0x8c   :  { %s79_s23 = sshll.u32 %s7114_s29, 4  ;;  %s101_s15 = sshll.u32 %s7115_s7, 4  ;;  %s80_s23 = int_to_ptr.vmem [resolvable:$true] %s79_s23  ;;  %s102_s15 = int_to_ptr.vmem [resolvable:$true] %s101_s15 }
  0x8d   :  { %s6930_s19 = scalar_lea.hbm %s7596_s4, 128 }
  0x8e   :  { %p6931_p8 = scmp.ne.s32.totalorder %s7596_s4, %s6930_s19  ;;  %p6934_p9 = scmp.lt.u32.totalorder %s6930_s19, %s7596_s4 }
  0x90   :  { %p6936_p10 = pnand %p6934_p9, %p6931_p8 }
  0x92   :  { %6939 = shalt.err (!%p6936_p10)
}
  0x93   :  { %s6940_s2 = scalar_lea.vmem %s80_s23, 128  ;;  %p6945_p12 = scmp.lt.s32.totalorder %s80_s23, %s80_s23 }
  0x94   :  { %p6941_p11 = scmp.ne.s32.totalorder %s80_s23, %s6940_s2  ;;  %p6946_p13 = scmp.lt.s32.totalorder %s6940_s2, %s6940_s2 }
  0x96   :  { %p6947_p0 = por %p6946_p13, %p6945_p12 }
  0x98   :  { %p6948_p1 = pnand %p6947_p0, %p6941_p11 }
  0x9a   :  { %6951 = shalt.err (!%p6948_p1)
}
  0x9b   :  { %82 = dma.hbm_to_vmem [thread:$0]  %s7596_s4, 128, %s80_s23, [#allocation9]  }
  0x9c   :  { %s6952_s21 = scalar_lea.hbm %s7598_s6, 128 }
  0x9d   :  { %p6953_p2 = scmp.ne.s32.totalorder %s7598_s6, %s6952_s21  ;;  %p6956_p3 = scmp.lt.u32.totalorder %s6952_s21, %s7598_s6 }
  0x9f   :  { %p6958_p4 = pnand %p6956_p3, %p6953_p2 }
  0xa1   :  { %6961 = shalt.err (!%p6958_p4)
}
  0xa2   :  { %s6962_s25 = scalar_lea.vmem %s102_s15, 128  ;;  %p6967_p6 = scmp.lt.s32.totalorder %s102_s15, %s102_s15 }
  0xa3   :  { %p6963_p5 = scmp.ne.s32.totalorder %s102_s15, %s6962_s25  ;;  %p6968_p7 = scmp.lt.s32.totalorder %s6962_s25, %s6962_s25 }
  0xa5   :  { %p6969_p8 = por %p6968_p7, %p6967_p6 }
  0xa7   :  { %p6970_p9 = pnand %p6969_p8, %p6963_p5 }
  0xa9   :  { %6973 = shalt.err (!%p6970_p9)
}
  0xaa   :  { %104 = dma.hbm_to_vmem [thread:$0]  %s7598_s6, 128, %s102_s15, [#allocation12]  }
  0xab   :  { %s7116_s26 = smov [#allocation16]   ;;  %s7117_s23 = smov [#allocation19]  }
  0xac   :  { %s123_s29 = sshll.u32 %s7116_s26, 4  ;;  %s145_s7 = sshll.u32 %s7117_s23, 4  ;;  %s124_s29 = int_to_ptr.vmem [resolvable:$true] %s123_s29  ;;  %s146_s7 = int_to_ptr.vmem [resolvable:$true] %s145_s7 }
  0xad   :  { %s6974_s19 = scalar_lea.hbm %s7600_s8, 16 }
  0xae   :  { %p6975_p10 = scmp.ne.s32.totalorder %s7600_s8, %s6974_s19  ;;  %p6978_p11 = scmp.lt.u32.totalorder %s6974_s19, %s7600_s8 }
  0xb0   :  { %p6980_p12 = pnand %p6978_p11, %p6975_p10 }
  0xb2   :  { %6983 = shalt.err (!%p6980_p12)
}
  0xb3   :  { %s6984_s6 = scalar_lea.vmem %s124_s29, 16  ;;  %s6988_s15 = scalar_lea.vmem %s124_s29, 32 }
  0xb4   :  { %p6985_p13 = scmp.ne.s32.totalorder %s124_s29, %s6984_s6  ;;  %p6989_p0 = scmp.lt.s32.totalorder %s124_s29, %s124_s29 }
  0xb5   :  { %p6990_p1 = scmp.lt.s32.totalorder %s6988_s15, %s6984_s6 }
  0xb7   :  { %p6991_p2 = por %p6990_p1, %p6989_p0 }
  0xb9   :  { %p6992_p3 = pnand %p6991_p2, %p6985_p13 }
  0xbb   :  { %6995 = shalt.err (!%p6992_p3)
}
  0xbc   :  { %126 = dma.hbm_to_vmem [thread:$0]  %s7600_s8, 16, %s124_s29, [#allocation15]  }
  0xbd   :  { %s6996_s27 = scalar_lea.hbm %s7602_s10, 16 }
  0xbe   :  { %p6997_p4 = scmp.ne.s32.totalorder %s7602_s10, %s6996_s27  ;;  %p7000_p5 = scmp.lt.u32.totalorder %s6996_s27, %s7602_s10 }
  0xc0   :  { %p7002_p6 = pnand %p7000_p5, %p6997_p4 }
  0xc2   :  { %7005 = shalt.err (!%p7002_p6)
}
  0xc3   :  { %s7006_s20 = scalar_lea.vmem %s146_s7, 16  ;;  %s7010_s25 = scalar_lea.vmem %s146_s7, 32 }
  0xc4   :  { %p7007_p7 = scmp.ne.s32.totalorder %s146_s7, %s7006_s20  ;;  %p7011_p8 = scmp.lt.s32.totalorder %s146_s7, %s146_s7 }
  0xc5   :  { %p7012_p9 = scmp.lt.s32.totalorder %s7010_s25, %s7006_s20 }
  0xc7   :  { %p7013_p10 = por %p7012_p9, %p7011_p8 }
  0xc9   :  { %p7014_p11 = pnand %p7013_p10, %p7007_p7 }
  0xcb   :  { %7017 = shalt.err (!%p7014_p11)
}
  0xcc   :  { %148 = dma.hbm_to_vmem [thread:$0]  %s7602_s10, 16, %s146_s7, [#allocation18]  }
  0xcd   :  { %s7118_s0 = smov [#allocation22]   ;;  %s7018_s17 = scalar_lea.hbm %s7604_s12, 16 }
  0xce   :  { %s167_s26 = sshll.u32 %s7118_s0, 4  ;;  %p7019_p12 = scmp.ne.s32.totalorder %s7604_s12, %s7018_s17  ;;  %s168_s26 = int_to_ptr.vmem [resolvable:$true] %s167_s26 }
  0xcf   :  { %p7022_p13 = scmp.lt.u32.totalorder %s7018_s17, %s7604_s12 }
  0xd1   :  { %p7024_p0 = pnand %p7022_p13, %p7019_p12 }
  0xd3   :  { %7027 = shalt.err (!%p7024_p0)
}
  0xd4   :  { %s7028_s24 = scalar_lea.vmem %s168_s26, 16  ;;  %s7032_s10 = scalar_lea.vmem %s168_s26, 32 }
  0xd5   :  { %p7029_p1 = scmp.ne.s32.totalorder %s168_s26, %s7028_s24  ;;  %p7033_p2 = scmp.lt.s32.totalorder %s168_s26, %s168_s26 }
  0xd6   :  { %p7034_p3 = scmp.lt.s32.totalorder %s7032_s10, %s7028_s24 }
  0xd8   :  { %p7035_p4 = por %p7034_p3, %p7033_p2 }
  0xda   :  { %p7036_p5 = pnand %p7035_p4, %p7029_p1 }
  0xdc   :  { %7039 = shalt.err (!%p7036_p5)
}
  0xdd   :  { %170 = dma.hbm_to_vmem [thread:$0]  %s7604_s12, 16, %s168_s26, [#allocation21]  }
  0xde   :  { %7084 = dma.done.wait [#allocation3], 128  }
  0xdf   :  { %7085 = vsyncadd [#allocation3], 4294967168 }
  0xe0   :  { %7086 = dma.done.wait [#allocation6], 1040  }
  0xe1   :  { %7087 = vsyncadd [#allocation6], 4294966256 }
  0xe2   :  { %7088 = dma.done.wait [#allocation9], 8320  }
  0xe3   :  { %7089 = vsyncadd [#allocation9], 4294958976 }
  0xe4   :  { %7090 = dma.done.wait [#allocation12], 65664  }
  0xe5   :  { %7091 = vsyncadd [#allocation12], 4294901632 }
  0xe6   :  { %7092 = dma.done.wait [#allocation15], 8208  }
  0xe7   :  { %7093 = vsyncadd [#allocation15], 4294959088 }
  0xe8   :  { %7094 = dma.done.wait [#allocation18], 1040  }
  0xe9   :  { %7095 = vsyncadd [#allocation18], 4294966256 }
  0xea   :  { %7096 = dma.done.wait [#allocation21], 1040  }
  0xeb   :  { %7097 = vsyncadd [#allocation21], 4294966256  ;;  %v7119_v0 = vmov 0.0   ;;  %vm7120_vm0 = vmmov 0   ;;  %v6664_v1 = vld [vmem:[#allocation5] sm:$0xff]   ;;  %v6665_v2 = vld [vmem:[#allocation5 + $0x8] sm:$0xff]  }
  0xec   :  { %6522 = vmatprep.subr.bf16.mxu0 %v7119_v0  ;;  %6538 = vmatprep.mubr.msk.bf16.mxu0 %vm7120_vm0, %v7119_v0  ;;  %v6666_v3 = vld [vmem:[#allocation5 + $0x10] sm:$0xff]   ;;  %v324_v4 = vld [vmem:[#allocation8] sm:$0xff]  ;;  %v6667_v9 = vld [vmem:[#allocation5 + $0x18] sm:$0xff]   ;;  %s7122_s16 = smov [#allocation24]  }
  0xed   :  { %6523 = vmatpush3.bf16.msra.mxu0 %v6664_v1  ;;  %v328_v5 = vld [vmem:[#allocation8 + $0x20] sm:$0xff]  ;;  %v6670_v24 = vld [vmem:[#allocation5 + $0x30] sm:$0xff]   ;;  %v6671_v31 = vld [vmem:[#allocation5 + $0x38] sm:$0xff]   ;;  %s5724_s3 = sshll.u32 %s7122_s16, 4  ;;  %s5725_s3 = int_to_ptr.vmem [resolvable:$true] %s5724_s3 }
  0xee   :  { %6524 = vmatprep.subr.bf16.mxu0 %v7119_v0  ;;  %v5752_v6 = vcombine.high %v324_v4, %v328_v5  ;;  %v5751_v7 = vcombine.low %v324_v4, %v328_v5  ;;  %v332_v8 = vld [vmem:[#allocation8 + $0x40] sm:$0xff]  ;;  %v325_v29 = vld [vmem:[#allocation8 + $0x8] sm:$0xff]  ;;  %v211_v32 = vld [vmem:[#allocation2] sm:$0xff]  ;;  %s7040_s30 = scalar_lea.vmem %s5725_s3, 128  ;;  %p7045_p7 = scmp.lt.s32.totalorder %s5725_s3, %s5725_s3 }
  0xef   :  { %v336_v10 = vld [vmem:[#allocation8 + $0x60] sm:$0xff]  ;;  %v329_v30 = vld [vmem:[#allocation8 + $0x28] sm:$0xff]  ;;  %v229_v41 = vpack.c.bf16 %v211_v32, %v211_v32  ;;  %v338_v32 = vld [vmem:[#allocation8 + $0x70] sm:$0xff]  ;;  %p7041_p6 = scmp.ne.s32.totalorder %s5725_s3, %s7040_s30  ;;  %p7046_p8 = scmp.lt.s32.totalorder %s7040_s30, %s7040_s30 }
  0xf0   :  { %786 = vmatprep.subr.bf16.mxu1 %v5752_v6  ;;  %v5760_v11 = vcombine.high %v332_v8, %v336_v10  ;;  %v340_v12 = vld [vmem:[#allocation8 + $0x80] sm:$0xff]  ;;  %v5759_v14 = vcombine.low %v332_v8, %v336_v10  ;;  %v333_v37 = vld [vmem:[#allocation8 + $0x48] sm:$0xff]  ;;  %v5754_v39 = vcombine.high %v325_v29, %v329_v30  ;;  %v5753_v43 = vcombine.low %v325_v29, %v329_v30  ;;  %v334_v30 = vld [vmem:[#allocation8 + $0x50] sm:$0xff] }
  0xf1   :  { %6525 = vmatpush3.bf16.msra.mxu0 %v6665_v2  ;;  %v344_v13 = vld [vmem:[#allocation8 + $0xa0] sm:$0xff]  ;;  %787 = vmatpush1.bf16.msra.mxu1 %v5751_v7  ;;  %v337_v38 = vld [vmem:[#allocation8 + $0x68] sm:$0xff]  ;;  %p7047_p9 = por %p7046_p8, %p7045_p7 }
  0xf2   :  { %6526 = vmatprep.subr.bf16.mxu0 %v7119_v0  ;;  %788 = vmatprep.subr.bf16.mxu1 %v5760_v11  ;;  %v5768_v15 = vcombine.high %v340_v12, %v344_v13  ;;  %v6668_v16 = vld [vmem:[#allocation5 + $0x20] sm:$0xff]   ;;  %v5767_v19 = vcombine.low %v340_v12, %v344_v13  ;;  %v6669_v20 = vld [vmem:[#allocation5 + $0x28] sm:$0xff]   ;;  %v5762_v46 = vcombine.high %v333_v37, %v337_v38  ;;  %v326_v12 = vld [vmem:[#allocation8 + $0x10] sm:$0xff] }
  0xf3   :  { %v348_v17 = vld [vmem:[#allocation8 + $0xc0] sm:$0xff]  ;;  %v341_v44 = vld [vmem:[#allocation8 + $0x88] sm:$0xff]  ;;  %v5761_v48 = vcombine.low %v333_v37, %v337_v38  ;;  %v330_v13 = vld [vmem:[#allocation8 + $0x30] sm:$0xff]  ;;  %v5764_v38 = vcombine.high %v334_v30, %v338_v32  ;;  %p7048_p10 = pnand %p7047_p9, %p7041_p6 }
  0xf4   :  { %v352_v18 = vld [vmem:[#allocation8 + $0xe0] sm:$0xff]  ;;  %v345_v45 = vld [vmem:[#allocation8 + $0xa8] sm:$0xff] }
  0xf5   :  { %6527 = vmatpush3.bf16.msra.mxu0 %v6666_v3  ;;  %789 = vmatpush1.bf16.msra.mxu1 %v5759_v14  ;;  %v5776_v21 = vcombine.high %v348_v17, %v352_v18  ;;  %v356_v22 = vld [vmem:[#allocation8 + $0x100] sm:$0xff]  ;;  %v5775_v25 = vcombine.low %v348_v17, %v352_v18  ;;  %v349_v49 = vld [vmem:[#allocation8 + $0xc8] sm:$0xff]  ;;  %v5770_v51 = vcombine.high %v341_v44, %v345_v45  ;;  %v327_v14 = vld [vmem:[#allocation8 + $0x18] sm:$0xff] }
  0xf6   :  { %6528 = vmatprep.subr.bf16.mxu0 %v7119_v0  ;;  %790 = vmatprep.subr.bf16.mxu1 %v5768_v15  ;;  %v360_v23 = vld [vmem:[#allocation8 + $0x120] sm:$0xff]  ;;  %v353_v50 = vld [vmem:[#allocation8 + $0xe8] sm:$0xff]  ;;  %v5769_v52 = vcombine.low %v341_v44, %v345_v45  ;;  %v5756_v15 = vcombine.high %v326_v12, %v330_v13  ;;  %v5755_v17 = vcombine.low %v326_v12, %v330_v13  ;;  %v379_v12 = vld [vmem:[#allocation8 + $0x1b8] sm:$0xff] }
  0xf7   :  { %v364_v26 = vld [vmem:[#allocation8 + $0x140] sm:$0xff]  ;;  %v5784_v28 = vcombine.high %v356_v22, %v360_v23  ;;  %v5783_v33 = vcombine.low %v356_v22, %v360_v23  ;;  %v357_v53 = vld [vmem:[#allocation8 + $0x108] sm:$0xff]  ;;  %v5778_v55 = vcombine.high %v349_v49, %v353_v50  ;;  %v5777_v56 = vcombine.low %v349_v49, %v353_v50  ;;  %v228_v23 = vld [vmem:[#allocation7] sm:$0x1] }
  0xf8   :  { %v368_v27 = vld [vmem:[#allocation8 + $0x160] sm:$0xff]  ;;  %v361_v54 = vld [vmem:[#allocation8 + $0x128] sm:$0xff]  ;;  %v5763_v44 = vcombine.low %v334_v30, %v338_v32  ;;  %v354_v49 = vld [vmem:[#allocation8 + $0xf0] sm:$0xff] }
  0xf9   :  { %6529 = vmatpush3.bf16.msra.mxu0 %v6667_v9  ;;  %791 = vmatpush1.bf16.msra.mxu1 %v5767_v19  ;;  %v372_v34 = vld [vmem:[#allocation8 + $0x180] sm:$0xff]  ;;  %v5792_v36 = vcombine.high %v364_v26, %v368_v27  ;;  %v5791_v40 = vcombine.low %v364_v26, %v368_v27  ;;  %v365_v57 = vld [vmem:[#allocation8 + $0x148] sm:$0xff]  ;;  %v5786_v59 = vcombine.high %v357_v53, %v361_v54  ;;  %v351_v50 = vld [vmem:[#allocation8 + $0xd8] sm:$0xff] }
  0xfa   :  { %6530 = vmatprep.subr.bf16.mxu0 %v7119_v0  ;;  %792 = vmatprep.subr.bf16.mxu1 %v5776_v21  ;;  %v376_v35 = vld [vmem:[#allocation8 + $0x1a0] sm:$0xff]  ;;  %v369_v58 = vld [vmem:[#allocation8 + $0x168] sm:$0xff]  ;;  %v5785_v60 = vcombine.low %v357_v53, %v361_v54  ;;  %v231_v21 = vlaneseq  ;;  %v963_v30 = vld [vmem:[#allocation11 + $0x28] sm:$0xff] }
  0xfb   :  { %v5800_v42 = vcombine.high %v372_v34, %v376_v35  ;;  %v5799_v47 = vcombine.low %v372_v34, %v376_v35  ;;  %v373_v61 = vld [vmem:[#allocation8 + $0x188] sm:$0xff]  ;;  %v5794_v63 = vcombine.high %v365_v57, %v369_v58  ;;  %v5793_v1 = vcombine.low %v365_v57, %v369_v58  ;;  %v380_v4 = vld [vmem:[#allocation8 + $0x1c0] sm:$0xff]  ;;  %v339_v34 = vld [vmem:[#allocation8 + $0x78] sm:$0xff] }
  0xfc   :  { %v377_v62 = vld [vmem:[#allocation8 + $0x1a8] sm:$0xff]  ;;  %v384_v5 = vld [vmem:[#allocation8 + $0x1e0] sm:$0xff]  ;;  %v7391_v22 = vshrl.u32 %v231_v21, 7  ;;  %v362_v57 = vld [vmem:[#allocation8 + $0x130] sm:$0xff] }
  0xfd   :  { %6531 = vmatpush3.bf16.msra.mxu0 %v6668_v16  ;;  %793 = vmatpush1.bf16.msra.mxu1 %v5775_v25  ;;  %v5802_v2 = vcombine.high %v373_v61, %v377_v62  ;;  %v5801_v3 = vcombine.low %v373_v61, %v377_v62  ;;  %v381_v6 = vld [vmem:[#allocation8 + $0x1c8] sm:$0xff]  ;;  %v5808_v7 = vcombine.high %v380_v4, %v384_v5  ;;  %v331_v16 = vld [vmem:[#allocation8 + $0x38] sm:$0xff] }
  0xfe   :  { %6532 = vmatprep.subr.bf16.mxu0 %v7119_v0  ;;  %794 = vmatprep.subr.bf16.mxu1 %v5784_v28  ;;  %v385_v8 = vld [vmem:[#allocation8 + $0x1e8] sm:$0xff]  ;;  %v5807_v11 = vcombine.low %v380_v4, %v384_v5  ;;  %v5757_v18 = vcombine.low %v327_v14, %v331_v16  ;;  %v5758_v19 = vcombine.high %v327_v14, %v331_v16  ;;  %v7394_v25 = vsub.s32 0, %v7391_v22  ;;  %v359_v58 = vld [vmem:[#allocation8 + $0x118] sm:$0xff] }
  0xff   :  { %v5809_v9 = vcombine.low %v381_v6, %v385_v8  ;;  %v5810_v10 = vcombine.high %v381_v6, %v385_v8  ;;  %v371_v4 = vld [vmem:[#allocation8 + $0x178] sm:$0xff] }
 0x101   :  { %6533 = vmatpush3.bf16.msra.mxu0 %v6669_v20  ;;  %795 = vmatpush1.bf16.msra.mxu1 %v5783_v33  ;;  %v7121_v20 = vmov 0   ;;  %v335_v33 = vld [vmem:[#allocation8 + $0x58] sm:$0xff] }
 0x102   :  { %6534 = vmatprep.subr.bf16.mxu0 %v7119_v0  ;;  %796 = vmatprep.subr.bf16.mxu1 %v5792_v36  ;;  %v5765_v45 = vcombine.low %v335_v33, %v339_v34 }
 0x103   :  { %818 = vmatprep.mubr.bf16.mxu1 %v7121_v20 }
 0x105   :  { %6535 = vmatpush3.bf16.msra.mxu0 %v6670_v24  ;;  %797 = vmatpush1.bf16.msra.mxu1 %v5791_v40  ;;  %v230_v24 = vunpack.c.l.bf16 %v228_v23  ;;  %v342_v40 = vld [vmem:[#allocation8 + $0x90] sm:$0xff] }
 0x106   :  { %6536 = vmatprep.subr.bf16.mxu0 %v7119_v0  ;;  %798 = vmatprep.subr.bf16.mxu1 %v5800_v42  ;;  %v343_v42 = vld [vmem:[#allocation8 + $0x98] sm:$0xff] }
 0x107   :  { %v234_v26 = vrot.slane %v230_v24, %v7394_v25 }
 0x109   :  { %6537 = vmatpush3.bf16.msra.mxu0 %v6671_v31  ;;  %799 = vmatpush1.bf16.msra.mxu1 %v5799_v47 }
 0x10a   :  { %827 = vmatprep.subr.bf16.mxu0 %v5754_v39  ;;  %800 = vmatprep.subr.bf16.mxu1 %v5808_v7  ;;  %v5766_v39 = vcombine.high %v335_v33, %v339_v34 }
 0x10c   :  { %6539 = vmatmul.mubr.bf16.vlgmr.msra.gmra.mrb[0].mxu0 %v229_v41  ;;  %v346_v41 = vld [vmem:[#allocation8 + $0xb0] sm:$0xff] }
 0x10d   :  { %828 = vmatpush1.bf16.msra.mxu0 %v5753_v43  ;;  %801 = vmatpush1.bf16.msra.mxu1 %v5807_v11  ;;  %v347_v43 = vld [vmem:[#allocation8 + $0xb8] sm:$0xff] }
 0x10e   :  { %829 = vmatprep.subr.bf16.mxu0 %v5762_v46  ;;  %859 = vmatprep.mubr.bf16.mxu0 %v7121_v20  ;;  %v5772_v46 = vcombine.high %v342_v40, %v346_v41  ;;  %v5774_v47 = vcombine.high %v343_v42, %v347_v43  ;;  %v5773_v53 = vcombine.low %v343_v42, %v347_v43  ;;  %v375_v11 = vld [vmem:[#allocation8 + $0x198] sm:$0xff] }
 0x10f   :  { %868 = vmatprep.subr.bf16.mxu1 %v5756_v15  ;;  %v5806_v16 = vcombine.high %v375_v11, %v379_v12  ;;  %v5805_v23 = vcombine.low %v375_v11, %v379_v12  ;;  %v1006_v12 = vld [vmem:[#allocation11 + $0x180] sm:$0xff] }
 0x111   :  { %830 = vmatpush1.bf16.msra.mxu0 %v5761_v48  ;;  %v350_v48 = vld [vmem:[#allocation8 + $0xd0] sm:$0xff] }
 0x112   :  { %831 = vmatprep.subr.bf16.mxu0 %v5770_v51  ;;  %v355_v51 = vld [vmem:[#allocation8 + $0xf8] sm:$0xff]  ;;  %v5780_v54 = vcombine.high %v350_v48, %v354_v49 }
 0x113   :  { %v5781_v61 = vcombine.low %v351_v50, %v355_v51 }
 0x115   :  { %832 = vmatpush1.bf16.msra.mxu0 %v5769_v52  ;;  %v5771_v52 = vcombine.low %v342_v40, %v346_v41 }
 0x116   :  { %833 = vmatprep.subr.bf16.mxu0 %v5778_v55  ;;  %v5782_v55 = vcombine.high %v351_v50, %v355_v51 }
 0x119   :  { %834 = vmatpush1.bf16.msra.mxu0 %v5777_v56  ;;  %v358_v56 = vld [vmem:[#allocation8 + $0x110] sm:$0xff] }
 0x11a   :  { %835 = vmatprep.subr.bf16.mxu0 %v5786_v59  ;;  %v363_v59 = vld [vmem:[#allocation8 + $0x138] sm:$0xff]  ;;  %v5788_v62 = vcombine.high %v358_v56, %v362_v57  ;;  %v5787_v5 = vcombine.low %v358_v56, %v362_v57 }
 0x11b   :  { %v5789_v6 = vcombine.low %v359_v58, %v363_v59 }
 0x11d   :  { %836 = vmatpush1.bf16.msra.mxu0 %v5785_v60  ;;  %v5779_v60 = vcombine.low %v350_v48, %v354_v49 }
 0x11e   :  { %837 = vmatprep.subr.bf16.mxu0 %v5794_v63  ;;  %v5790_v63 = vcombine.high %v359_v58, %v363_v59  ;;  %v990_v59 = vld [vmem:[#allocation11 + $0x100] sm:$0xff] }
 0x121   :  { %838 = vmatpush1.bf16.msra.mxu0 %v5793_v1  ;;  %v366_v1 = vld [vmem:[#allocation8 + $0x150] sm:$0xff] }
 0x122   :  { %839 = vmatprep.subr.bf16.mxu0 %v5802_v2  ;;  %v370_v2 = vld [vmem:[#allocation8 + $0x170] sm:$0xff] }
 0x123   :  { %v5796_v7 = vcombine.high %v366_v1, %v370_v2  ;;  %v5795_v13 = vcombine.low %v366_v1, %v370_v2 }
 0x125   :  { %840 = vmatpush1.bf16.msra.mxu0 %v5801_v3  ;;  %v367_v3 = vld [vmem:[#allocation8 + $0x158] sm:$0xff] }
 0x126   :  { %841 = vmatprep.subr.bf16.mxu0 %v5810_v10  ;;  %v5798_v8 = vcombine.high %v367_v3, %v371_v4  ;;  %v378_v10 = vld [vmem:[#allocation8 + $0x1b0] sm:$0xff]  ;;  %v5797_v14 = vcombine.low %v367_v3, %v371_v4  ;;  %v998_v4 = vld [vmem:[#allocation11 + $0x140] sm:$0xff] }
 0x129   :  { %842 = vmatpush1.bf16.msra.mxu0 %v5809_v9  ;;  %v374_v9 = vld [vmem:[#allocation8 + $0x190] sm:$0xff] }
 0x12a   :  { %909 = vmatprep.subr.bf16.mxu0 %v5758_v19  ;;  %v5804_v15 = vcombine.high %v374_v9, %v378_v10  ;;  %v383_v19 = vld [vmem:[#allocation8 + $0x1d8] sm:$0xff]  ;;  %v5803_v21 = vcombine.low %v374_v9, %v378_v10 }
 0x1df   :  { %v317_v27 = vpop.f32.mrb[0].mxu0 }
 0x1e0   :  { %v318_v28 = vadd.f32 %v317_v27, %v234_v26  ;;  %v6540_v29 = vpop.f32.mrb[1].mxu0  ;;  %v958_v27 = vld [vmem:[#allocation11] sm:$0xff] }
 0x1e1   :  { %v320_v31 = vpop.f32.mrb[2].mxu0  ;;  %v959_v29 = vld [vmem:[#allocation11 + $0x8] sm:$0xff] }
 0x1e2   :  { %v323_v35 = vmax.f32 %v318_v28, 0.0  ;;  %v6541_v36 = vpop.f32.mrb[3].mxu0  ;;  %v962_v28 = vld [vmem:[#allocation11 + $0x20] sm:$0xff]  ;;  %v5818_v34 = vcombine.high %v959_v29, %v963_v30  ;;  %v5817_v41 = vcombine.low %v959_v29, %v963_v30 }
 0x1e3   :  { %v5816_v33 = vcombine.high %v958_v27, %v962_v28  ;;  %v970_v36 = vld [vmem:[#allocation11 + $0x60] sm:$0xff]  ;;  %v5815_v40 = vcombine.low %v958_v27, %v962_v28 }
 0x1e4   :  { %v7397_v37 = vpack.c.bf16 %v323_v35, %v323_v35  ;;  %v966_v35 = vld [vmem:[#allocation11 + $0x40] sm:$0xff] }
 0x1e5   :  { %v5824_v42 = vcombine.high %v966_v35, %v970_v36  ;;  %v5823_v48 = vcombine.low %v966_v35, %v970_v36  ;;  %v1022_v30 = vld [vmem:[#allocation11 + $0x200] sm:$0xff] }
 0x1e6   :  { %819 = vmatmul.mubr.bf16.vlgmr.msra.gmra.mrb[0].mxu1 %v7397_v37  ;;  %860 = vmatmul.mubr.bf16.vlgmr.msra.gmra.mrb[4].mxu0 %v7397_v37 }
 0x1e7   :  { %869 = vmatpush1.bf16.msra.mxu1 %v5755_v17  ;;  %910 = vmatpush1.bf16.msra.mxu0 %v5757_v18  ;;  %v382_v17 = vld [vmem:[#allocation8 + $0x1d0] sm:$0xff] }
 0x1e8   :  { %870 = vmatprep.subr.bf16.mxu1 %v5764_v38  ;;  %911 = vmatprep.subr.bf16.mxu0 %v5766_v39  ;;  %v386_v18 = vld [vmem:[#allocation8 + $0x1f0] sm:$0xff] }
 0x1e9   :  { %900 = vmatprep.mubr.bf16.mxu1 %v7121_v20  ;;  %941 = vmatprep.mubr.bf16.mxu0 %v7121_v20  ;;  %v387_v20 = vld [vmem:[#allocation8 + $0x1f8] sm:$0xff]  ;;  %v5812_v24 = vcombine.high %v382_v17, %v386_v18  ;;  %v5811_v31 = vcombine.low %v382_v17, %v386_v18  ;;  %v967_v38 = vld [vmem:[#allocation11 + $0x48] sm:$0xff] }
 0x1ea   :  { %v5814_v26 = vcombine.high %v383_v19, %v387_v20  ;;  %v5813_v32 = vcombine.low %v383_v19, %v387_v20  ;;  %v971_v39 = vld [vmem:[#allocation11 + $0x68] sm:$0xff]  ;;  %v1014_v20 = vld [vmem:[#allocation11 + $0x1c0] sm:$0xff] }
 0x1eb   :  { %871 = vmatpush1.bf16.msra.mxu1 %v5763_v44  ;;  %912 = vmatpush1.bf16.msra.mxu0 %v5765_v45  ;;  %v5826_v43 = vcombine.high %v967_v38, %v971_v39  ;;  %v974_v44 = vld [vmem:[#allocation11 + $0x80] sm:$0xff]  ;;  %v5825_v49 = vcombine.low %v967_v38, %v971_v39 }
 0x1ec   :  { %872 = vmatprep.subr.bf16.mxu1 %v5772_v46  ;;  %913 = vmatprep.subr.bf16.mxu0 %v5774_v47  ;;  %v978_v45 = vld [vmem:[#allocation11 + $0xa0] sm:$0xff]  ;;  %v975_v46 = vld [vmem:[#allocation11 + $0x88] sm:$0xff] }
 0x1ed   :  { %v979_v47 = vld [vmem:[#allocation11 + $0xa8] sm:$0xff]  ;;  %v5832_v50 = vcombine.high %v974_v44, %v978_v45  ;;  %v5831_v56 = vcombine.low %v974_v44, %v978_v45  ;;  %v1030_v39 = vld [vmem:[#allocation11 + $0x240] sm:$0xff] }
 0x1ee   :  { %v5834_v51 = vcombine.high %v975_v46, %v979_v47  ;;  %v5833_v57 = vcombine.low %v975_v46, %v979_v47  ;;  %v1038_v47 = vld [vmem:[#allocation11 + $0x280] sm:$0xff] }
 0x1ef   :  { %873 = vmatpush1.bf16.msra.mxu1 %v5771_v52  ;;  %914 = vmatpush1.bf16.msra.mxu0 %v5773_v53  ;;  %v982_v52 = vld [vmem:[#allocation11 + $0xc0] sm:$0xff] }
 0x1f0   :  { %874 = vmatprep.subr.bf16.mxu1 %v5780_v54  ;;  %915 = vmatprep.subr.bf16.mxu0 %v5782_v55  ;;  %v986_v53 = vld [vmem:[#allocation11 + $0xe0] sm:$0xff]  ;;  %v983_v54 = vld [vmem:[#allocation11 + $0xc8] sm:$0xff] }
 0x1f1   :  { %v987_v55 = vld [vmem:[#allocation11 + $0xe8] sm:$0xff]  ;;  %v5840_v58 = vcombine.high %v982_v52, %v986_v53 }
 0x1f2   :  { %v5841_v1 = vcombine.low %v983_v54, %v987_v55 }
 0x1f3   :  { %875 = vmatpush1.bf16.msra.mxu1 %v5779_v60  ;;  %916 = vmatpush1.bf16.msra.mxu0 %v5781_v61  ;;  %v994_v60 = vld [vmem:[#allocation11 + $0x120] sm:$0xff]  ;;  %v991_v61 = vld [vmem:[#allocation11 + $0x108] sm:$0xff] }
 0x1f4   :  { %876 = vmatprep.subr.bf16.mxu1 %v5788_v62  ;;  %917 = vmatprep.subr.bf16.mxu0 %v5790_v63  ;;  %v995_v62 = vld [vmem:[#allocation11 + $0x128] sm:$0xff]  ;;  %v5839_v63 = vcombine.low %v982_v52, %v986_v53  ;;  %v5848_v2 = vcombine.high %v990_v59, %v994_v60 }
 0x1f5   :  { %v5850_v3 = vcombine.high %v991_v61, %v995_v62  ;;  %v5849_v9 = vcombine.low %v991_v61, %v995_v62  ;;  %v1054_v62 = vld [vmem:[#allocation11 + $0x300] sm:$0xff] }
 0x1f7   :  { %877 = vmatpush1.bf16.msra.mxu1 %v5787_v5  ;;  %918 = vmatpush1.bf16.msra.mxu0 %v5789_v6  ;;  %v1002_v5 = vld [vmem:[#allocation11 + $0x160] sm:$0xff]  ;;  %v999_v6 = vld [vmem:[#allocation11 + $0x148] sm:$0xff] }
 0x1f8   :  { %878 = vmatprep.subr.bf16.mxu1 %v5796_v7  ;;  %919 = vmatprep.subr.bf16.mxu0 %v5798_v8  ;;  %v1003_v7 = vld [vmem:[#allocation11 + $0x168] sm:$0xff]  ;;  %v5847_v8 = vcombine.low %v990_v59, %v994_v60  ;;  %v5856_v10 = vcombine.high %v998_v4, %v1002_v5 }
 0x1f9   :  { %v5858_v11 = vcombine.high %v999_v6, %v1003_v7  ;;  %v5857_v17 = vcombine.low %v999_v6, %v1003_v7  ;;  %v1062_v7 = vld [vmem:[#allocation11 + $0x340] sm:$0xff] }
 0x1fb   :  { %879 = vmatpush1.bf16.msra.mxu1 %v5795_v13  ;;  %920 = vmatpush1.bf16.msra.mxu0 %v5797_v14  ;;  %v1010_v13 = vld [vmem:[#allocation11 + $0x1a0] sm:$0xff]  ;;  %v1007_v14 = vld [vmem:[#allocation11 + $0x188] sm:$0xff] }
 0x1fc   :  { %880 = vmatprep.subr.bf16.mxu1 %v5804_v15  ;;  %921 = vmatprep.subr.bf16.mxu0 %v5806_v16  ;;  %v1011_v15 = vld [vmem:[#allocation11 + $0x1a8] sm:$0xff]  ;;  %v5855_v16 = vcombine.low %v998_v4, %v1002_v5  ;;  %v5864_v18 = vcombine.high %v1006_v12, %v1010_v13 }
 0x1fd   :  { %v5866_v19 = vcombine.high %v1007_v14, %v1011_v15  ;;  %v5865_v27 = vcombine.low %v1007_v14, %v1011_v15 }
 0x1ff   :  { %881 = vmatpush1.bf16.msra.mxu1 %v5803_v21  ;;  %922 = vmatpush1.bf16.msra.mxu0 %v5805_v23  ;;  %v1018_v21 = vld [vmem:[#allocation11 + $0x1e0] sm:$0xff]  ;;  %v1015_v23 = vld [vmem:[#allocation11 + $0x1c8] sm:$0xff] }
 0x200   :  { %882 = vmatprep.subr.bf16.mxu1 %v5812_v24  ;;  %923 = vmatprep.subr.bf16.mxu0 %v5814_v26  ;;  %v1019_v24 = vld [vmem:[#allocation11 + $0x1e8] sm:$0xff]  ;;  %v5863_v26 = vcombine.low %v1006_v12, %v1010_v13  ;;  %v5872_v28 = vcombine.high %v1014_v20, %v1018_v21 }
 0x201   :  { %v5874_v29 = vcombine.high %v1015_v23, %v1019_v24  ;;  %v5873_v35 = vcombine.low %v1015_v23, %v1019_v24 }
 0x203   :  { %883 = vmatpush1.bf16.msra.mxu1 %v5811_v31  ;;  %924 = vmatpush1.bf16.msra.mxu0 %v5813_v32  ;;  %v1026_v31 = vld [vmem:[#allocation11 + $0x220] sm:$0xff]  ;;  %v1023_v32 = vld [vmem:[#allocation11 + $0x208] sm:$0xff] }
 0x204   :  { %4115 = vmatprep.subr.bf16.mxu1 %v5816_v33  ;;  %4279 = vmatprep.subr.bf16.mxu0 %v5818_v34  ;;  %v1027_v33 = vld [vmem:[#allocation11 + $0x228] sm:$0xff]  ;;  %v5871_v34 = vcombine.low %v1014_v20, %v1018_v21  ;;  %v5880_v36 = vcombine.high %v1022_v30, %v1026_v31 }
 0x205   :  { %v5882_v38 = vcombine.high %v1023_v32, %v1027_v33  ;;  %v5881_v44 = vcombine.low %v1023_v32, %v1027_v33  ;;  %v1075_v21 = vld [vmem:[#allocation11 + $0x3a8] sm:$0xff] }
 0x206   :  { %901 = vmatmul.mubr.bf16.vlgmr.msra.gmra.mrb[4].mxu1 %v7397_v37  ;;  %942 = vmatmul.mubr.bf16.vlgmr.msra.gmra.mrb[8].mxu0 %v7397_v37  ;;  %v5842_v37 = vcombine.high %v983_v54, %v987_v55  ;;  %v1046_v55 = vld [vmem:[#allocation11 + $0x2c0] sm:$0xff] }
 0x207   :  { %4116 = vmatpush1.bf16.msra.mxu1 %v5815_v40  ;;  %4280 = vmatpush1.bf16.msra.mxu0 %v5817_v41  ;;  %v1034_v40 = vld [vmem:[#allocation11 + $0x260] sm:$0xff]  ;;  %v1031_v41 = vld [vmem:[#allocation11 + $0x248] sm:$0xff] }
 0x208   :  { %4117 = vmatprep.subr.bf16.mxu1 %v5824_v42  ;;  %4281 = vmatprep.subr.bf16.mxu0 %v5826_v43  ;;  %v1035_v42 = vld [vmem:[#allocation11 + $0x268] sm:$0xff]  ;;  %v5879_v43 = vcombine.low %v1022_v30, %v1026_v31  ;;  %v5888_v45 = vcombine.high %v1030_v39, %v1034_v40 }
 0x209   :  { %v5890_v46 = vcombine.high %v1031_v41, %v1035_v42  ;;  %v5889_v52 = vcombine.low %v1031_v41, %v1035_v42  ;;  %v1083_v31 = vld [vmem:[#allocation11 + $0x3e8] sm:$0xff] }
 0x20b   :  { %4118 = vmatpush1.bf16.msra.mxu1 %v5823_v48  ;;  %4282 = vmatpush1.bf16.msra.mxu0 %v5825_v49  ;;  %v1042_v48 = vld [vmem:[#allocation11 + $0x2a0] sm:$0xff]  ;;  %v1039_v49 = vld [vmem:[#allocation11 + $0x288] sm:$0xff] }
 0x20c   :  { %4119 = vmatprep.subr.bf16.mxu1 %v5832_v50  ;;  %4283 = vmatprep.subr.bf16.mxu0 %v5834_v51  ;;  %v1043_v50 = vld [vmem:[#allocation11 + $0x2a8] sm:$0xff]  ;;  %v5887_v51 = vcombine.low %v1030_v39, %v1034_v40  ;;  %v5896_v53 = vcombine.high %v1038_v47, %v1042_v48 }
 0x20d   :  { %v5898_v54 = vcombine.high %v1039_v49, %v1043_v50  ;;  %v5897_v59 = vcombine.low %v1039_v49, %v1043_v50  ;;  %v1091_v40 = vld [vmem:[#allocation11 + $0x428] sm:$0xff] }
 0x20f   :  { %4120 = vmatpush1.bf16.msra.mxu1 %v5831_v56  ;;  %4284 = vmatpush1.bf16.msra.mxu0 %v5833_v57  ;;  %v1050_v56 = vld [vmem:[#allocation11 + $0x2e0] sm:$0xff]  ;;  %v1047_v57 = vld [vmem:[#allocation11 + $0x2c8] sm:$0xff] }
 0x210   :  { %4121 = vmatprep.subr.bf16.mxu1 %v5840_v58  ;;  %4285 = vmatprep.subr.bf16.mxu0 %v5842_v37  ;;  %v1051_v58 = vld [vmem:[#allocation11 + $0x2e8] sm:$0xff]  ;;  %v5895_v37 = vcombine.low %v1038_v47, %v1042_v48  ;;  %v5904_v60 = vcombine.high %v1046_v55, %v1050_v56  ;;  %v7412_v47 = vsub.s32 6, %v7391_v22 }
 0x211   :  { %v5906_v61 = vcombine.high %v1047_v57, %v1051_v58  ;;  %v5905_v4 = vcombine.low %v1047_v57, %v1051_v58 }
 0x213   :  { %4122 = vmatpush1.bf16.msra.mxu1 %v5839_v63  ;;  %4286 = vmatpush1.bf16.msra.mxu0 %v5841_v1  ;;  %v1058_v63 = vld [vmem:[#allocation11 + $0x320] sm:$0xff]  ;;  %v1055_v1 = vld [vmem:[#allocation11 + $0x308] sm:$0xff] }
 0x214   :  { %4123 = vmatprep.subr.bf16.mxu1 %v5848_v2  ;;  %4287 = vmatprep.subr.bf16.mxu0 %v5850_v3  ;;  %v1059_v2 = vld [vmem:[#allocation11 + $0x328] sm:$0xff]  ;;  %v5903_v3 = vcombine.low %v1046_v55, %v1050_v56  ;;  %v5912_v5 = vcombine.high %v1054_v62, %v1058_v63 }
 0x215   :  { %v5914_v6 = vcombine.high %v1055_v1, %v1059_v2  ;;  %v5913_v12 = vcombine.low %v1055_v1, %v1059_v2 }
 0x217   :  { %4124 = vmatpush1.bf16.msra.mxu1 %v5847_v8  ;;  %4288 = vmatpush1.bf16.msra.mxu0 %v5849_v9  ;;  %v1066_v8 = vld [vmem:[#allocation11 + $0x360] sm:$0xff]  ;;  %v1063_v9 = vld [vmem:[#allocation11 + $0x348] sm:$0xff] }
 0x218   :  { %4125 = vmatprep.subr.bf16.mxu1 %v5856_v10  ;;  %4289 = vmatprep.subr.bf16.mxu0 %v5858_v11  ;;  %v1067_v10 = vld [vmem:[#allocation11 + $0x368] sm:$0xff]  ;;  %v5911_v11 = vcombine.low %v1054_v62, %v1058_v63  ;;  %v5920_v13 = vcombine.high %v1062_v7, %v1066_v8  ;;  %v5919_v15 = vcombine.low %v1062_v7, %v1066_v8 }
 0x219   :  { %v5922_v14 = vcombine.high %v1063_v9, %v1067_v10  ;;  %v1099_v7 = vld [vmem:[#allocation11 + $0x468] sm:$0xff] }
 0x21b   :  { %4126 = vmatpush1.bf16.msra.mxu1 %v5855_v16  ;;  %4290 = vmatpush1.bf16.msra.mxu0 %v5857_v17  ;;  %v5921_v16 = vcombine.low %v1063_v9, %v1067_v10  ;;  %v1070_v17 = vld [vmem:[#allocation11 + $0x380] sm:$0xff] }
 0x21c   :  { %4127 = vmatprep.subr.bf16.mxu1 %v5864_v18  ;;  %4291 = vmatprep.subr.bf16.mxu0 %v5866_v19  ;;  %v1074_v18 = vld [vmem:[#allocation11 + $0x3a0] sm:$0xff]  ;;  %v1071_v19 = vld [vmem:[#allocation11 + $0x388] sm:$0xff] }
 0x21d   :  { %v5928_v20 = vcombine.high %v1070_v17, %v1074_v18  ;;  %v5930_v23 = vcombine.high %v1071_v19, %v1075_v21  ;;  %v5927_v24 = vcombine.low %v1070_v17, %v1074_v18  ;;  %v1102_v10 = vld [vmem:[#allocation11 + $0x480] sm:$0xff] }
 0x21f   :  { %4128 = vmatpush1.bf16.msra.mxu1 %v5863_v26  ;;  %4292 = vmatpush1.bf16.msra.mxu0 %v5865_v27  ;;  %v5929_v26 = vcombine.low %v1071_v19, %v1075_v21  ;;  %v1078_v27 = vld [vmem:[#allocation11 + $0x3c0] sm:$0xff] }
 0x220   :  { %4129 = vmatprep.subr.bf16.mxu1 %v5872_v28  ;;  %4293 = vmatprep.subr.bf16.mxu0 %v5874_v29  ;;  %v1082_v28 = vld [vmem:[#allocation11 + $0x3e0] sm:$0xff]  ;;  %v1079_v29 = vld [vmem:[#allocation11 + $0x3c8] sm:$0xff] }
 0x221   :  { %v5936_v30 = vcombine.high %v1078_v27, %v1082_v28  ;;  %v5938_v32 = vcombine.high %v1079_v29, %v1083_v31  ;;  %v5935_v33 = vcombine.low %v1078_v27, %v1082_v28  ;;  %v1110_v21 = vld [vmem:[#allocation11 + $0x4c0] sm:$0xff] }
 0x223   :  { %4130 = vmatpush1.bf16.msra.mxu1 %v5871_v34  ;;  %4294 = vmatpush1.bf16.msra.mxu0 %v5873_v35  ;;  %v5937_v34 = vcombine.low %v1079_v29, %v1083_v31  ;;  %v1086_v35 = vld [vmem:[#allocation11 + $0x400] sm:$0xff] }
 0x224   :  { %4131 = vmatprep.subr.bf16.mxu1 %v5880_v36  ;;  %4295 = vmatprep.subr.bf16.mxu0 %v5882_v38  ;;  %v1090_v36 = vld [vmem:[#allocation11 + $0x420] sm:$0xff]  ;;  %v1087_v38 = vld [vmem:[#allocation11 + $0x408] sm:$0xff] }
 0x225   :  { %v5944_v39 = vcombine.high %v1086_v35, %v1090_v36  ;;  %v5943_v41 = vcombine.low %v1086_v35, %v1090_v36  ;;  %v5945_v42 = vcombine.low %v1087_v38, %v1091_v40  ;;  %v1118_v31 = vld [vmem:[#allocation11 + $0x500] sm:$0xff] }
 0x227   :  { %4132 = vmatpush1.bf16.msra.mxu1 %v5879_v43  ;;  %4296 = vmatpush1.bf16.msra.mxu0 %v5881_v44  ;;  %v5946_v43 = vcombine.high %v1087_v38, %v1091_v40  ;;  %v7403_v44 = vld [vmem:[#allocation10] sm:$0xff]  ;;  %v1126_v40 = vld [vmem:[#allocation11 + $0x540] sm:$0xff] }
 0x228   :  { %4133 = vmatprep.subr.bf16.mxu1 %v5888_v45  ;;  %4297 = vmatprep.subr.bf16.mxu0 %v5890_v46  ;;  %v7406_v45 = vunpack.c.l.bf16 %v7403_v44  ;;  %v7409_v46 = vsub.s32 2, %v7391_v22 }
 0x22a   :  { %v397_v48 = vrot.slane %v7406_v45, %v7394_v25  ;;  %v401_v49 = vrot.slane %v7406_v45, %v7409_v46  ;;  %v409_v50 = vrot.slane %v7406_v45, %v7412_v47 }
 0x22b   :  { %4134 = vmatpush1.bf16.msra.mxu1 %v5887_v51  ;;  %4298 = vmatpush1.bf16.msra.mxu0 %v5889_v52 }
 0x22c   :  { %4135 = vmatprep.subr.bf16.mxu1 %v5896_v53  ;;  %4299 = vmatprep.subr.bf16.mxu0 %v5898_v54  ;;  %v437_v51 = vrot.slane %v397_v48, %v7394_v25  ;;  %v441_v52 = vrot.slane %v401_v49, %v7394_v25  ;;  %v449_v53 = vrot.slane %v409_v50, %v7394_v25  ;;  %v7438_v48 = vunpack.c.h.bf16 %v7403_v44 }
 0x22f   :  { %4136 = vmatpush1.bf16.msra.mxu1 %v5895_v37  ;;  %4300 = vmatpush1.bf16.msra.mxu0 %v5897_v59 }
 0x230   :  { %4137 = vmatprep.subr.bf16.mxu1 %v5904_v60  ;;  %4301 = vmatprep.subr.bf16.mxu0 %v5906_v61 }
 0x233   :  { %4138 = vmatpush1.bf16.msra.mxu1 %v5903_v3  ;;  %4302 = vmatpush1.bf16.msra.mxu0 %v5905_v4  ;;  %v1094_v3 = vld [vmem:[#allocation11 + $0x440] sm:$0xff] }
 0x234   :  { %4139 = vmatprep.subr.bf16.mxu1 %v5912_v5  ;;  %4303 = vmatprep.subr.bf16.mxu0 %v5914_v6  ;;  %v1098_v5 = vld [vmem:[#allocation11 + $0x460] sm:$0xff]  ;;  %v1095_v6 = vld [vmem:[#allocation11 + $0x448] sm:$0xff] }
 0x235   :  { %v5951_v17 = vcombine.low %v1094_v3, %v1098_v5  ;;  %v5953_v18 = vcombine.low %v1095_v6, %v1099_v7 }
 0x237   :  { %4140 = vmatpush1.bf16.msra.mxu1 %v5911_v11  ;;  %4304 = vmatpush1.bf16.msra.mxu0 %v5913_v12  ;;  %v5952_v11 = vcombine.high %v1094_v3, %v1098_v5  ;;  %v5954_v12 = vcombine.high %v1095_v6, %v1099_v7  ;;  %v1147_v3 = vld [vmem:[#allocation11 + $0x5e8] sm:$0xff] }
 0x238   :  { %4141 = vmatprep.subr.bf16.mxu1 %v5920_v13  ;;  %4305 = vmatprep.subr.bf16.mxu0 %v5922_v14  ;;  %v1106_v13 = vld [vmem:[#allocation11 + $0x4a0] sm:$0xff]  ;;  %v1103_v14 = vld [vmem:[#allocation11 + $0x488] sm:$0xff] }
 0x239   :  { %v5960_v19 = vcombine.high %v1102_v10, %v1106_v13  ;;  %v5959_v27 = vcombine.low %v1102_v10, %v1106_v13  ;;  %v1150_v13 = vld [vmem:[#allocation11 + $0x600] sm:$0xff] }
 0x23b   :  { %4142 = vmatpush1.bf16.msra.mxu1 %v5919_v15  ;;  %4306 = vmatpush1.bf16.msra.mxu0 %v5921_v16  ;;  %v1107_v15 = vld [vmem:[#allocation11 + $0x4a8] sm:$0xff] }
 0x23c   :  { %4143 = vmatprep.subr.bf16.mxu1 %v5928_v20  ;;  %4307 = vmatprep.subr.bf16.mxu0 %v5930_v23  ;;  %v5962_v20 = vcombine.high %v1103_v14, %v1107_v15  ;;  %v1114_v23 = vld [vmem:[#allocation11 + $0x4e0] sm:$0xff]  ;;  %v5961_v28 = vcombine.low %v1103_v14, %v1107_v15 }
 0x23d   :  { %v5968_v29 = vcombine.high %v1110_v21, %v1114_v23  ;;  %v5967_v35 = vcombine.low %v1110_v21, %v1114_v23 }
 0x23f   :  { %4144 = vmatpush1.bf16.msra.mxu1 %v5927_v24  ;;  %4308 = vmatpush1.bf16.msra.mxu0 %v5929_v26  ;;  %v1111_v24 = vld [vmem:[#allocation11 + $0x4c8] sm:$0xff] }
 0x240   :  { %4145 = vmatprep.subr.bf16.mxu1 %v5936_v30  ;;  %4309 = vmatprep.subr.bf16.mxu0 %v5938_v32  ;;  %v1115_v26 = vld [vmem:[#allocation11 + $0x4e8] sm:$0xff]  ;;  %v1122_v32 = vld [vmem:[#allocation11 + $0x520] sm:$0xff] }
 0x241   :  { %v5970_v30 = vcombine.high %v1111_v24, %v1115_v26  ;;  %v5969_v36 = vcombine.low %v1111_v24, %v1115_v26  ;;  %v5976_v38 = vcombine.high %v1118_v31, %v1122_v32  ;;  %v5975_v49 = vcombine.low %v1118_v31, %v1122_v32 }
 0x243   :  { %4146 = vmatpush1.bf16.msra.mxu1 %v5935_v33  ;;  %4310 = vmatpush1.bf16.msra.mxu0 %v5937_v34  ;;  %v1119_v33 = vld [vmem:[#allocation11 + $0x508] sm:$0xff] }
 0x244   :  { %4156 = vmatprep.subr.bf16.mxu1 %v5944_v39  ;;  %4320 = vmatprep.subr.bf16.mxu0 %v5946_v43  ;;  %v1123_v34 = vld [vmem:[#allocation11 + $0x528] sm:$0xff] }
 0x245   :  { %v5978_v39 = vcombine.high %v1119_v33, %v1123_v34  ;;  %v1131_v43 = vld [vmem:[#allocation11 + $0x568] sm:$0xff]  ;;  %v5977_v50 = vcombine.low %v1119_v33, %v1123_v34 }
 0x2b9   :  { %v820_v54 = vpop.f32.mrb[0].mxu1  ;;  %v7423_v55 = vpop.f32.mrb[4].mxu0 }
 0x2ba   :  { %v821_v56 = vadd.f32 %v820_v54, %v437_v51  ;;  %v822_v57 = vpop.f32.mrb[1].mxu1  ;;  %v863_v58 = vpop.f32.mrb[5].mxu0  ;;  %v7441_v51 = vsub.s32 4, %v7391_v22  ;;  %v1134_v54 = vld [vmem:[#allocation11 + $0x580] sm:$0xff]  ;;  %v425_v22 = vrot.slane %v7438_v48, %v7412_v47 }
 0x2bb   :  { %v823_v37 = vadd.f32 %v822_v57, %v441_v52  ;;  %v864_v59 = vadd.f32 %v863_v58, %v449_v53  ;;  %v824_v60 = vpop.f32.mrb[2].mxu1  ;;  %v865_v61 = vpop.f32.mrb[6].mxu0  ;;  %v1135_v57 = vld [vmem:[#allocation11 + $0x588] sm:$0xff] }
 0x2bc   :  { %v950_v62 = vmax.f32 %v821_v56, 0.0  ;;  %v825_v63 = vpop.f32.mrb[3].mxu1  ;;  %v866_v1 = vpop.f32.mrb[7].mxu0  ;;  %v1138_v56 = vld [vmem:[#allocation11 + $0x5a0] sm:$0xff]  ;;  %v1139_v58 = vld [vmem:[#allocation11 + $0x5a8] sm:$0xff]  ;;  %v421_v44 = vrot.slane %v7438_v48, %v7441_v51  ;;  %v465_v6 = vrot.slane %v425_v22, %v7394_v25 }
 0x2bd   :  { %v951_v2 = vmax.f32 %v823_v37, 0.0  ;;  %v953_v4 = vmax.f32 %v864_v59, 0.0  ;;  %v413_v37 = vrot.slane %v7438_v48, %v7394_v25  ;;  %v5992_v61 = vcombine.high %v1134_v54, %v1138_v56  ;;  %v1142_v63 = vld [vmem:[#allocation11 + $0x5c0] sm:$0xff] }
 0x2be   :  { %v7427_v9 = vpack.c.bf16 %v950_v62, %v950_v62  ;;  %v5994_v62 = vcombine.high %v1135_v57, %v1139_v58  ;;  %v1146_v1 = vld [vmem:[#allocation11 + $0x5e0] sm:$0xff]  ;;  %v461_v5 = vrot.slane %v421_v44, %v7394_v25  ;;  %v5991_v7 = vcombine.low %v1134_v54, %v1138_v56 }
 0x2bf   :  { %v7425_v8 = vpack.c.bf16 %v951_v2, %v951_v2  ;;  %v7431_v16 = vpack.c.bf16 %v953_v4, %v953_v4  ;;  %v1143_v2 = vld [vmem:[#allocation11 + $0x5c8] sm:$0xff]  ;;  %v453_v4 = vrot.slane %v413_v37, %v7394_v25  ;;  %v5993_v10 = vcombine.low %v1135_v57, %v1139_v58  ;;  %v1174_v37 = vld [vmem:[#allocation11 + $0x6c0] sm:$0xff] }
 0x2c0   :  { %v1178_v44 = vld [vmem:[#allocation11 + $0x6e0] sm:$0xff] }
 0x2c1   :  { %4147 = vmatprep.mubr.bf16.mxu1 %v7425_v8  ;;  %4311 = vmatprep.mubr.bf16.mxu0 %v7425_v8 }
 0x2c2   :  { %4148 = vmatmul.mubr.bf16.vlgmr.msra.gmra.mrb[8].mxu1 %v7427_v9  ;;  %4312 = vmatmul.mubr.bf16.vlgmr.msra.gmra.mrb[12].mxu0 %v7427_v9 }
 0x2c3   :  { %4157 = vmatpush1.bf16.msra.mxu1 %v5943_v41  ;;  %4321 = vmatpush1.bf16.msra.mxu0 %v5945_v42  ;;  %v1130_v41 = vld [vmem:[#allocation11 + $0x560] sm:$0xff]  ;;  %v1127_v42 = vld [vmem:[#allocation11 + $0x548] sm:$0xff] }
 0x2c4   :  { %4188 = vmatprep.mubr.bf16.mxu1 %v7431_v16  ;;  %4352 = vmatprep.mubr.bf16.mxu0 %v7431_v16  ;;  %v5984_v52 = vcombine.high %v1126_v40, %v1130_v41  ;;  %v5986_v53 = vcombine.high %v1127_v42, %v1131_v43  ;;  %v5983_v59 = vcombine.low %v1126_v40, %v1130_v41 }
 0x2c5   :  { %4158 = vmatprep.subr.bf16.mxu1 %v5952_v11  ;;  %4322 = vmatprep.subr.bf16.mxu0 %v5954_v12  ;;  %v5985_v60 = vcombine.low %v1127_v42, %v1131_v43  ;;  %v6000_v11 = vcombine.high %v1142_v63, %v1146_v1  ;;  %v6002_v12 = vcombine.high %v1143_v2, %v1147_v3 }
 0x2c7   :  { %4159 = vmatpush1.bf16.msra.mxu1 %v5951_v17  ;;  %4323 = vmatpush1.bf16.msra.mxu0 %v5953_v18  ;;  %v1154_v17 = vld [vmem:[#allocation11 + $0x620] sm:$0xff]  ;;  %v1151_v18 = vld [vmem:[#allocation11 + $0x608] sm:$0xff] }
 0x2c8   :  { %4160 = vmatprep.subr.bf16.mxu1 %v5960_v19  ;;  %4324 = vmatprep.subr.bf16.mxu0 %v5962_v20  ;;  %v1155_v19 = vld [vmem:[#allocation11 + $0x628] sm:$0xff]  ;;  %v6008_v33 = vcombine.high %v1150_v13, %v1154_v17  ;;  %v6007_v40 = vcombine.low %v1150_v13, %v1154_v17 }
 0x2c9   :  { %v6010_v34 = vcombine.high %v1151_v18, %v1155_v19  ;;  %v6009_v41 = vcombine.low %v1151_v18, %v1155_v19  ;;  %v1191_v13 = vld [vmem:[#allocation11 + $0x748] sm:$0xff]  ;;  %v405_v18 = vrot.slane %v7406_v45, %v7441_v51 }
 0x2cb   :  { %4161 = vmatpush1.bf16.msra.mxu1 %v5959_v27  ;;  %4325 = vmatpush1.bf16.msra.mxu0 %v5961_v28 }
 0x2cc   :  { %4162 = vmatprep.subr.bf16.mxu1 %v5968_v29  ;;  %4326 = vmatprep.subr.bf16.mxu0 %v5970_v30  ;;  %v5999_v29 = vcombine.low %v1142_v63, %v1146_v1  ;;  %v6001_v30 = vcombine.low %v1143_v2, %v1147_v3  ;;  %v1182_v1 = vld [vmem:[#allocation11 + $0x700] sm:$0xff]  ;;  %v1183_v3 = vld [vmem:[#allocation11 + $0x708] sm:$0xff] }
 0x2cd   :  { %v1186_v2 = vld [vmem:[#allocation11 + $0x720] sm:$0xff] }
 0x2cf   :  { %4163 = vmatpush1.bf16.msra.mxu1 %v5967_v35  ;;  %4327 = vmatpush1.bf16.msra.mxu0 %v5969_v36  ;;  %v1158_v35 = vld [vmem:[#allocation11 + $0x640] sm:$0xff] }
 0x2d0   :  { %4164 = vmatprep.subr.bf16.mxu1 %v5976_v38  ;;  %4328 = vmatprep.subr.bf16.mxu0 %v5978_v39  ;;  %v1162_v36 = vld [vmem:[#allocation11 + $0x660] sm:$0xff]  ;;  %v1159_v38 = vld [vmem:[#allocation11 + $0x648] sm:$0xff] }
 0x2d1   :  { %v1163_v39 = vld [vmem:[#allocation11 + $0x668] sm:$0xff]  ;;  %v6016_v42 = vcombine.high %v1158_v35, %v1162_v36  ;;  %v6015_v54 = vcombine.low %v1158_v35, %v1162_v36  ;;  %v1206_v36 = vld [vmem:[#allocation11 + $0x7c0] sm:$0xff] }
 0x2d2   :  { %v6018_v43 = vcombine.high %v1159_v38, %v1163_v39  ;;  %v6017_v56 = vcombine.low %v1159_v38, %v1163_v39  ;;  %v1210_v39 = vld [vmem:[#allocation11 + $0x7e0] sm:$0xff] }
 0x2d3   :  { %4165 = vmatpush1.bf16.msra.mxu1 %v5975_v49  ;;  %4329 = vmatpush1.bf16.msra.mxu0 %v5977_v50  ;;  %v1166_v49 = vld [vmem:[#allocation11 + $0x680] sm:$0xff] }
 0x2d4   :  { %4166 = vmatprep.subr.bf16.mxu1 %v5984_v52  ;;  %4330 = vmatprep.subr.bf16.mxu0 %v5986_v53  ;;  %v1170_v50 = vld [vmem:[#allocation11 + $0x6a0] sm:$0xff]  ;;  %v1167_v52 = vld [vmem:[#allocation11 + $0x688] sm:$0xff] }
 0x2d5   :  { %v1171_v53 = vld [vmem:[#allocation11 + $0x6a8] sm:$0xff]  ;;  %v6024_v57 = vcombine.high %v1166_v49, %v1170_v50  ;;  %v6023_v22 = vcombine.low %v1166_v49, %v1170_v50  ;;  %v6064_v49 = vcombine.high %v1206_v36, %v1210_v39 }
 0x2d6   :  { %v6026_v58 = vcombine.high %v1167_v52, %v1171_v53 }
 0x2d7   :  { %4167 = vmatpush1.bf16.msra.mxu1 %v5983_v59  ;;  %4331 = vmatpush1.bf16.msra.mxu0 %v5985_v60  ;;  %v1175_v59 = vld [vmem:[#allocation11 + $0x6c8] sm:$0xff] }
 0x2d8   :  { %4168 = vmatprep.subr.bf16.mxu1 %v5992_v61  ;;  %4332 = vmatprep.subr.bf16.mxu0 %v5994_v62  ;;  %v1179_v60 = vld [vmem:[#allocation11 + $0x6e8] sm:$0xff]  ;;  %v6025_v61 = vcombine.low %v1167_v52, %v1171_v53  ;;  %v6032_v62 = vcombine.high %v1174_v37, %v1178_v44  ;;  %v1214_v52 = vld [vmem:[#allocation11 + $0x800] sm:$0xff] }
 0x2d9   :  { %v902_v14 = vpop.f32.mrb[4].mxu1  ;;  %v943_v15 = vpop.f32.mrb[8].mxu0  ;;  %v6034_v63 = vcombine.high %v1175_v59, %v1179_v60 }
 0x2da   :  { %v7452_v20 = vadd.f32 %v902_v14, %v453_v4  ;;  %v7454_v21 = vadd.f32 %v943_v15, %v461_v5  ;;  %v7456_v23 = vpop.f32.mrb[5].mxu1  ;;  %v945_v24 = vpop.f32.mrb[9].mxu0  ;;  %v1187_v4 = vld [vmem:[#allocation11 + $0x728] sm:$0xff]  ;;  %v6031_v5 = vcombine.low %v1174_v37, %v1178_v44  ;;  %v6039_v15 = vcombine.low %v1182_v1, %v1186_v2 }
 0x2db   :  { %v7458_v26 = vadd.f32 %v945_v24, %v465_v6  ;;  %v906_v27 = vpop.f32.mrb[6].mxu1  ;;  %v947_v28 = vpop.f32.mrb[10].mxu0  ;;  %4169 = vmatpush1.bf16.msra.mxu1 %v5991_v7  ;;  %4333 = vmatpush1.bf16.msra.mxu0 %v5993_v10  ;;  %v6033_v6 = vcombine.low %v1175_v59, %v1179_v60  ;;  %v6040_v7 = vcombine.high %v1182_v1, %v1186_v2  ;;  %v1195_v14 = vld [vmem:[#allocation11 + $0x768] sm:$0xff] }
 0x2dc   :  { %v907_v31 = vpop.f32.mrb[7].mxu1  ;;  %v948_v32 = vpop.f32.mrb[11].mxu0  ;;  %4170 = vmatprep.subr.bf16.mxu1 %v6000_v11  ;;  %4334 = vmatprep.subr.bf16.mxu0 %v6002_v12  ;;  %v6042_v10 = vcombine.high %v1183_v3, %v1187_v4  ;;  %v1190_v11 = vld [vmem:[#allocation11 + $0x740] sm:$0xff]  ;;  %v6041_v17 = vcombine.low %v1183_v3, %v1187_v4  ;;  %v6050_v24 = vcombine.high %v1191_v13, %v1195_v14 }
 0x2dd   :  { %v1194_v12 = vld [vmem:[#allocation11 + $0x760] sm:$0xff]  ;;  %v417_v28 = vrot.slane %v7438_v48, %v7409_v46  ;;  %v1203_v31 = vld [vmem:[#allocation11 + $0x7a8] sm:$0xff] }
 0x2de   :  { %v6048_v19 = vcombine.high %v1190_v11, %v1194_v12  ;;  %v1198_v27 = vld [vmem:[#allocation11 + $0x780] sm:$0xff]  ;;  %v6047_v32 = vcombine.low %v1190_v11, %v1194_v12  ;;  %v1235_v11 = vld [vmem:[#allocation11 + $0x8a8] sm:$0xff] }
 0x2df   :  { %4171 = vmatpush1.bf16.msra.mxu1 %v5999_v29  ;;  %4335 = vmatpush1.bf16.msra.mxu0 %v6001_v30  ;;  %v1202_v29 = vld [vmem:[#allocation11 + $0x7a0] sm:$0xff]  ;;  %v1199_v30 = vld [vmem:[#allocation11 + $0x788] sm:$0xff]  ;;  %v457_v38 = vrot.slane %v417_v28, %v7394_v25 }
 0x2e0   :  { %4172 = vmatprep.subr.bf16.mxu1 %v6008_v33  ;;  %4336 = vmatprep.subr.bf16.mxu0 %v6010_v34  ;;  %v6049_v33 = vcombine.low %v1191_v13, %v1195_v14  ;;  %v445_v34 = vrot.slane %v405_v18, %v7394_v25  ;;  %v6056_v45 = vcombine.high %v1198_v27, %v1202_v29  ;;  %v1242_v18 = vld [vmem:[#allocation11 + $0x8e0] sm:$0xff] }
 0x2e1   :  { %v6058_v35 = vcombine.high %v1199_v30, %v1203_v31  ;;  %v6055_v48 = vcombine.low %v1198_v27, %v1202_v29  ;;  %v905_v53 = vadd.f32 %v7456_v23, %v457_v38 }
 0x2e3   :  { %4173 = vmatpush1.bf16.msra.mxu1 %v6007_v40  ;;  %4337 = vmatpush1.bf16.msra.mxu0 %v6009_v41  ;;  %v1207_v40 = vld [vmem:[#allocation11 + $0x7c8] sm:$0xff] }
 0x2e4   :  { %4174 = vmatprep.subr.bf16.mxu1 %v6016_v42  ;;  %4338 = vmatprep.subr.bf16.mxu0 %v6018_v43  ;;  %v1211_v41 = vld [vmem:[#allocation11 + $0x7e8] sm:$0xff]  ;;  %v6057_v42 = vcombine.low %v1199_v30, %v1203_v31  ;;  %v862_v43 = vadd.f32 %v7423_v55, %v445_v34  ;;  %v955_v55 = vmax.f32 %v905_v53, 0.0  ;;  %v1246_v31 = vld [vmem:[#allocation11 + $0x900] sm:$0xff] }
 0x2e5   :  { %v6066_v50 = vcombine.high %v1207_v40, %v1211_v41  ;;  %v6065_v37 = vcombine.low %v1207_v40, %v1211_v41  ;;  %v1251_v34 = vld [vmem:[#allocation11 + $0x928] sm:$0xff]  ;;  %v1258_v40 = vld [vmem:[#allocation11 + $0x960] sm:$0xff] }
 0x2e6   :  { %v952_v44 = vmax.f32 %v862_v43, 0.0  ;;  %v7470_v3 = vpack.c.bf16 %v955_v55, %v955_v55  ;;  %v1255_v41 = vld [vmem:[#allocation11 + $0x948] sm:$0xff]  ;;  %v1266_v53 = vld [vmem:[#allocation11 + $0x9a0] sm:$0xff] }
 0x2e7   :  { %4175 = vmatpush1.bf16.msra.mxu1 %v6015_v54  ;;  %4339 = vmatpush1.bf16.msra.mxu0 %v6017_v56  ;;  %v1218_v54 = vld [vmem:[#allocation11 + $0x820] sm:$0xff]  ;;  %v1215_v56 = vld [vmem:[#allocation11 + $0x808] sm:$0xff] }
 0x2e8   :  { %4176 = vmatprep.subr.bf16.mxu1 %v6024_v57  ;;  %4340 = vmatprep.subr.bf16.mxu0 %v6026_v58  ;;  %v1219_v57 = vld [vmem:[#allocation11 + $0x828] sm:$0xff]  ;;  %v6063_v58 = vcombine.low %v1206_v36, %v1210_v39  ;;  %v6072_v59 = vcombine.high %v1214_v52, %v1218_v54  ;;  %v6071_v23 = vcombine.low %v1214_v52, %v1218_v54  ;;  %v1254_v39 = vld [vmem:[#allocation11 + $0x940] sm:$0xff] }
 0x2e9   :  { %v6074_v60 = vcombine.high %v1215_v56, %v1219_v57  ;;  %v7468_v1 = vpack.c.bf16 %v952_v44, %v952_v44  ;;  %v6073_v2 = vcombine.low %v1215_v56, %v1219_v57  ;;  %v1262_v52 = vld [vmem:[#allocation11 + $0x980] sm:$0xff]  ;;  %v1263_v54 = vld [vmem:[#allocation11 + $0x988] sm:$0xff]  ;;  %v6111_v57 = vcombine.low %v1254_v39, %v1258_v40 }
 0x2ea   :  { %v1267_v56 = vld [vmem:[#allocation11 + $0x9a8] sm:$0xff] }
 0x2eb   :  { %4177 = vmatpush1.bf16.msra.mxu1 %v6023_v22  ;;  %4341 = vmatpush1.bf16.msra.mxu0 %v6025_v61  ;;  %v1222_v22 = vld [vmem:[#allocation11 + $0x840] sm:$0xff]  ;;  %v6122_v44 = vcombine.high %v1263_v54, %v1267_v56  ;;  %v1271_v55 = vld [vmem:[#allocation11 + $0x9c8] sm:$0xff] }
 0x2ec   :  { %4178 = vmatprep.subr.bf16.mxu1 %v6032_v62  ;;  %4342 = vmatprep.subr.bf16.mxu0 %v6034_v63  ;;  %v1226_v61 = vld [vmem:[#allocation11 + $0x860] sm:$0xff]  ;;  %v1223_v62 = vld [vmem:[#allocation11 + $0x848] sm:$0xff] }
 0x2ed   :  { %v1227_v63 = vld [vmem:[#allocation11 + $0x868] sm:$0xff]  ;;  %v6080_v4 = vcombine.high %v1222_v22, %v1226_v61  ;;  %v6079_v12 = vcombine.low %v1222_v22, %v1226_v61  ;;  %v6119_v61 = vcombine.low %v1262_v52, %v1266_v53 }
 0x2ee   :  { %v6081_v13 = vcombine.low %v1223_v62, %v1227_v63  ;;  %v1275_v22 = vld [vmem:[#allocation11 + $0x9e8] sm:$0xff] }
 0x2ef   :  { %4179 = vmatpush1.bf16.msra.mxu1 %v6031_v5  ;;  %4343 = vmatpush1.bf16.msra.mxu0 %v6033_v6  ;;  %v6082_v5 = vcombine.high %v1223_v62, %v1227_v63  ;;  %v1230_v6 = vld [vmem:[#allocation11 + $0x880] sm:$0xff]  ;;  %v6121_v62 = vcombine.low %v1263_v54, %v1267_v56 }
 0x2f0   :  { %4180 = vmatprep.subr.bf16.mxu1 %v6040_v7  ;;  %4344 = vmatprep.subr.bf16.mxu0 %v6042_v10  ;;  %v1234_v7 = vld [vmem:[#allocation11 + $0x8a0] sm:$0xff]  ;;  %v1231_v10 = vld [vmem:[#allocation11 + $0x888] sm:$0xff] }
 0x2f1   :  { %v6088_v14 = vcombine.high %v1230_v6, %v1234_v7  ;;  %v6087_v27 = vcombine.low %v1230_v6, %v1234_v7  ;;  %v6089_v28 = vcombine.low %v1231_v10, %v1235_v11  ;;  %v1283_v6 = vld [vmem:[#allocation11 + $0xa28] sm:$0xff] }
 0x2f3   :  { %4181 = vmatpush1.bf16.msra.mxu1 %v6039_v15  ;;  %4345 = vmatpush1.bf16.msra.mxu0 %v6041_v17  ;;  %v6090_v15 = vcombine.high %v1231_v10, %v1235_v11  ;;  %v1238_v17 = vld [vmem:[#allocation11 + $0x8c0] sm:$0xff]  ;;  %v6129_v10 = vcombine.low %v1271_v55, %v1275_v22 }
 0x2f4   :  { %4182 = vmatprep.subr.bf16.mxu1 %v6048_v19  ;;  %4346 = vmatprep.subr.bf16.mxu0 %v6050_v24  ;;  %v1239_v19 = vld [vmem:[#allocation11 + $0x8c8] sm:$0xff]  ;;  %v6096_v29 = vcombine.high %v1238_v17, %v1242_v18 }
 0x2f5   :  { %v1243_v24 = vld [vmem:[#allocation11 + $0x8e8] sm:$0xff] }
 0x2f6   :  { %v6098_v30 = vcombine.high %v1239_v19, %v1243_v24 }
 0x2f7   :  { %4183 = vmatpush1.bf16.msra.mxu1 %v6047_v32  ;;  %4347 = vmatpush1.bf16.msra.mxu0 %v6049_v33  ;;  %v1250_v32 = vld [vmem:[#allocation11 + $0x920] sm:$0xff]  ;;  %v1247_v33 = vld [vmem:[#allocation11 + $0x908] sm:$0xff] }
 0x2f8   :  { %4184 = vmatprep.subr.bf16.mxu1 %v6056_v45  ;;  %4348 = vmatprep.subr.bf16.mxu0 %v6058_v35  ;;  %v6095_v45 = vcombine.low %v1238_v17, %v1242_v18  ;;  %v6097_v35 = vcombine.low %v1239_v19, %v1243_v24  ;;  %v6104_v36 = vcombine.high %v1246_v31, %v1250_v32  ;;  %v1291_v17 = vld [vmem:[#allocation11 + $0xa68] sm:$0xff] }
 0x2f9   :  { %v6106_v38 = vcombine.high %v1247_v33, %v1251_v34  ;;  %v6105_v43 = vcombine.low %v1247_v33, %v1251_v34 }
 0x2fb   :  { %4185 = vmatpush1.bf16.msra.mxu1 %v6055_v48  ;;  %4349 = vmatpush1.bf16.msra.mxu0 %v6057_v42  ;;  %v1259_v48 = vld [vmem:[#allocation11 + $0x968] sm:$0xff]  ;;  %v6103_v42 = vcombine.low %v1246_v31, %v1250_v32 }
 0x2fc   :  { %4186 = vmatprep.subr.bf16.mxu1 %v6064_v49  ;;  %4350 = vmatprep.subr.bf16.mxu0 %v6066_v50  ;;  %v6112_v49 = vcombine.high %v1254_v39, %v1258_v40  ;;  %v6114_v50 = vcombine.high %v1255_v41, %v1259_v48  ;;  %v1299_v31 = vld [vmem:[#allocation11 + $0xaa8] sm:$0xff] }
 0x2fd   :  { %v1307_v39 = vld [vmem:[#allocation11 + $0xae8] sm:$0xff] }
 0x2ff   :  { %4187 = vmatpush1.bf16.msra.mxu1 %v6063_v58  ;;  %4351 = vmatpush1.bf16.msra.mxu0 %v6065_v37  ;;  %v6113_v58 = vcombine.low %v1255_v41, %v1259_v48  ;;  %v6120_v37 = vcombine.high %v1262_v52, %v1266_v53  ;;  %v1315_v52 = vld [vmem:[#allocation11 + $0xb28] sm:$0xff] }
 0x300   :  { %4197 = vmatprep.subr.bf16.mxu1 %v6072_v59  ;;  %4361 = vmatprep.subr.bf16.mxu0 %v6074_v60  ;;  %v1270_v59 = vld [vmem:[#allocation11 + $0x9c0] sm:$0xff] }
 0x301   :  { %v1274_v60 = vld [vmem:[#allocation11 + $0x9e0] sm:$0xff] }
 0x302   :  { %4189 = vmatmul.mubr.bf16.vlgmr.msra.gmra.mrb[8].mxu1 %v7468_v1  ;;  %4353 = vmatmul.mubr.bf16.vlgmr.msra.gmra.mrb[12].mxu0 %v7468_v1  ;;  %v6128_v63 = vcombine.high %v1270_v59, %v1274_v60  ;;  %v6127_v7 = vcombine.low %v1270_v59, %v1274_v60  ;;  %v1323_v59 = vld [vmem:[#allocation11 + $0xb68] sm:$0xff] }
 0x303   :  { %4198 = vmatpush1.bf16.msra.mxu1 %v6071_v23  ;;  %4229 = vmatprep.mubr.bf16.mxu1 %v7470_v3  ;;  %v6130_v23 = vcombine.high %v1271_v55, %v1275_v22 }
 0x304   :  { %4362 = vmatpush1.bf16.msra.mxu0 %v6073_v2  ;;  %4393 = vmatprep.mubr.bf16.mxu0 %v7470_v3  ;;  %v1278_v2 = vld [vmem:[#allocation11 + $0xa00] sm:$0xff] }
 0x305   :  { %4199 = vmatprep.subr.bf16.mxu1 %v6080_v4  ;;  %4363 = vmatprep.subr.bf16.mxu0 %v6082_v5  ;;  %v1282_v4 = vld [vmem:[#allocation11 + $0xa20] sm:$0xff]  ;;  %v1279_v5 = vld [vmem:[#allocation11 + $0xa08] sm:$0xff] }
 0x306   :  { %v6136_v11 = vcombine.high %v1278_v2, %v1282_v4  ;;  %v6135_v18 = vcombine.low %v1278_v2, %v1282_v4  ;;  %v6137_v19 = vcombine.low %v1279_v5, %v1283_v6  ;;  %v1331_v2 = vld [vmem:[#allocation11 + $0xba8] sm:$0xff] }
 0x307   :  { %4200 = vmatpush1.bf16.msra.mxu1 %v6079_v12  ;;  %v6138_v12 = vcombine.high %v1279_v5, %v1283_v6 }
 0x308   :  { %4364 = vmatpush1.bf16.msra.mxu0 %v6081_v13  ;;  %4201 = vmatprep.subr.bf16.mxu1 %v6088_v14  ;;  %v1286_v13 = vld [vmem:[#allocation11 + $0xa40] sm:$0xff] }
 0x309   :  { %4365 = vmatprep.subr.bf16.mxu0 %v6090_v15  ;;  %v1290_v14 = vld [vmem:[#allocation11 + $0xa60] sm:$0xff]  ;;  %v1287_v15 = vld [vmem:[#allocation11 + $0xa48] sm:$0xff] }
 0x30a   :  { %v6144_v24 = vcombine.high %v1286_v13, %v1290_v14  ;;  %v6143_v32 = vcombine.low %v1286_v13, %v1290_v14  ;;  %v6145_v33 = vcombine.low %v1287_v15, %v1291_v17  ;;  %v1339_v13 = vld [vmem:[#allocation11 + $0xbe8] sm:$0xff] }
 0x30b   :  { %4202 = vmatpush1.bf16.msra.mxu1 %v6087_v27  ;;  %v6146_v27 = vcombine.high %v1287_v15, %v1291_v17 }
 0x30c   :  { %4366 = vmatpush1.bf16.msra.mxu0 %v6089_v28  ;;  %4203 = vmatprep.subr.bf16.mxu1 %v6096_v29  ;;  %v1294_v28 = vld [vmem:[#allocation11 + $0xa80] sm:$0xff] }
 0x30d   :  { %4367 = vmatprep.subr.bf16.mxu0 %v6098_v30  ;;  %v1298_v29 = vld [vmem:[#allocation11 + $0xaa0] sm:$0xff]  ;;  %v1295_v30 = vld [vmem:[#allocation11 + $0xa88] sm:$0xff] }
 0x30e   :  { %v6152_v34 = vcombine.high %v1294_v28, %v1298_v29  ;;  %v6151_v40 = vcombine.low %v1294_v28, %v1298_v29  ;;  %v6153_v41 = vcombine.low %v1295_v30, %v1299_v31  ;;  %v1347_v28 = vld [vmem:[#allocation11 + $0xc28] sm:$0xff] }
 0x30f   :  { %4204 = vmatpush1.bf16.msra.mxu1 %v6095_v45  ;;  %v6154_v45 = vcombine.high %v1295_v30, %v1299_v31  ;;  %v954_v30 = vmax.f32 %v7452_v20, 0.0 }
 0x310   :  { %4368 = vmatpush1.bf16.msra.mxu0 %v6097_v35  ;;  %4205 = vmatprep.subr.bf16.mxu1 %v6104_v36  ;;  %v1302_v35 = vld [vmem:[#allocation11 + $0xac0] sm:$0xff] }
 0x311   :  { %4369 = vmatprep.subr.bf16.mxu0 %v6106_v38  ;;  %v1306_v36 = vld [vmem:[#allocation11 + $0xae0] sm:$0xff]  ;;  %v1303_v38 = vld [vmem:[#allocation11 + $0xac8] sm:$0xff] }
 0x312   :  { %v6160_v48 = vcombine.high %v1302_v35, %v1306_v36  ;;  %v6159_v53 = vcombine.low %v1302_v35, %v1306_v36  ;;  %v6161_v54 = vcombine.low %v1303_v38, %v1307_v39  ;;  %v1354_v35 = vld [vmem:[#allocation11 + $0xc60] sm:$0xff] }
 0x313   :  { %4206 = vmatpush1.bf16.msra.mxu1 %v6103_v42  ;;  %v6162_v42 = vcombine.high %v1303_v38, %v1307_v39  ;;  %v1351_v38 = vld [vmem:[#allocation11 + $0xc48] sm:$0xff] }
 0x314   :  { %4370 = vmatpush1.bf16.msra.mxu0 %v6105_v43  ;;  %4207 = vmatprep.subr.bf16.mxu1 %v6112_v49  ;;  %v1310_v43 = vld [vmem:[#allocation11 + $0xb00] sm:$0xff]  ;;  %v1355_v39 = vld [vmem:[#allocation11 + $0xc68] sm:$0xff] }
 0x315   :  { %4371 = vmatprep.subr.bf16.mxu0 %v6114_v50  ;;  %v1314_v49 = vld [vmem:[#allocation11 + $0xb20] sm:$0xff]  ;;  %v1311_v50 = vld [vmem:[#allocation11 + $0xb08] sm:$0xff] }
 0x316   :  { %v6168_v56 = vcombine.high %v1310_v43, %v1314_v49  ;;  %v6167_v60 = vcombine.low %v1310_v43, %v1314_v49  ;;  %v6169_v55 = vcombine.low %v1311_v50, %v1315_v52  ;;  %v1359_v49 = vld [vmem:[#allocation11 + $0xc88] sm:$0xff] }
 0x317   :  { %4208 = vmatpush1.bf16.msra.mxu1 %v6111_v57  ;;  %v6170_v57 = vcombine.high %v1311_v50, %v1315_v52  ;;  %v1363_v50 = vld [vmem:[#allocation11 + $0xca8] sm:$0xff] }
 0x318   :  { %4372 = vmatpush1.bf16.msra.mxu0 %v6113_v58  ;;  %4209 = vmatprep.subr.bf16.mxu1 %v6120_v37  ;;  %v1318_v58 = vld [vmem:[#allocation11 + $0xb40] sm:$0xff] }
 0x319   :  { %4373 = vmatprep.subr.bf16.mxu0 %v6122_v44  ;;  %v1322_v37 = vld [vmem:[#allocation11 + $0xb60] sm:$0xff]  ;;  %v1319_v44 = vld [vmem:[#allocation11 + $0xb48] sm:$0xff] }
 0x31a   :  { %v6176_v22 = vcombine.high %v1318_v58, %v1322_v37  ;;  %v6175_v4 = vcombine.low %v1318_v58, %v1322_v37  ;;  %v6177_v5 = vcombine.low %v1319_v44, %v1323_v59  ;;  %v1370_v58 = vld [vmem:[#allocation11 + $0xce0] sm:$0xff]  ;;  %v1367_v37 = vld [vmem:[#allocation11 + $0xcc8] sm:$0xff] }
 0x31b   :  { %4210 = vmatpush1.bf16.msra.mxu1 %v6119_v61  ;;  %v6178_v61 = vcombine.high %v1319_v44, %v1323_v59  ;;  %v1371_v44 = vld [vmem:[#allocation11 + $0xce8] sm:$0xff] }
 0x31c   :  { %4374 = vmatpush1.bf16.msra.mxu0 %v6121_v62  ;;  %4211 = vmatprep.subr.bf16.mxu1 %v6128_v63  ;;  %v1326_v62 = vld [vmem:[#allocation11 + $0xb80] sm:$0xff] }
 0x31d   :  { %4375 = vmatprep.subr.bf16.mxu0 %v6130_v23  ;;  %v1330_v63 = vld [vmem:[#allocation11 + $0xba0] sm:$0xff]  ;;  %v1327_v23 = vld [vmem:[#allocation11 + $0xb88] sm:$0xff] }
 0x31e   :  { %v6184_v6 = vcombine.high %v1326_v62, %v1330_v63  ;;  %v6183_v14 = vcombine.low %v1326_v62, %v1330_v63  ;;  %v6185_v15 = vcombine.low %v1327_v23, %v1331_v2  ;;  %v1378_v62 = vld [vmem:[#allocation11 + $0xd20] sm:$0xff]  ;;  %v1375_v63 = vld [vmem:[#allocation11 + $0xd08] sm:$0xff] }
 0x31f   :  { %4212 = vmatpush1.bf16.msra.mxu1 %v6127_v7  ;;  %v6186_v7 = vcombine.high %v1327_v23, %v1331_v2  ;;  %v1379_v23 = vld [vmem:[#allocation11 + $0xd28] sm:$0xff] }
 0x320   :  { %4376 = vmatpush1.bf16.msra.mxu0 %v6129_v10  ;;  %4213 = vmatprep.subr.bf16.mxu1 %v6136_v11  ;;  %v1334_v10 = vld [vmem:[#allocation11 + $0xbc0] sm:$0xff] }
 0x321   :  { %4377 = vmatprep.subr.bf16.mxu0 %v6138_v12  ;;  %v1338_v11 = vld [vmem:[#allocation11 + $0xbe0] sm:$0xff]  ;;  %v1335_v12 = vld [vmem:[#allocation11 + $0xbc8] sm:$0xff] }
 0x322   :  { %v6192_v17 = vcombine.high %v1334_v10, %v1338_v11  ;;  %v6191_v29 = vcombine.low %v1334_v10, %v1338_v11  ;;  %v6193_v31 = vcombine.low %v1335_v12, %v1339_v13  ;;  %v1386_v10 = vld [vmem:[#allocation11 + $0xd60] sm:$0xff]  ;;  %v1383_v11 = vld [vmem:[#allocation11 + $0xd48] sm:$0xff] }
 0x323   :  { %4214 = vmatpush1.bf16.msra.mxu1 %v6135_v18  ;;  %v6194_v18 = vcombine.high %v1335_v12, %v1339_v13  ;;  %v1387_v12 = vld [vmem:[#allocation11 + $0xd68] sm:$0xff] }
 0x324   :  { %4378 = vmatpush1.bf16.msra.mxu0 %v6137_v19  ;;  %4215 = vmatprep.subr.bf16.mxu1 %v6144_v24  ;;  %v1342_v19 = vld [vmem:[#allocation11 + $0xc00] sm:$0xff] }
 0x325   :  { %4379 = vmatprep.subr.bf16.mxu0 %v6146_v27  ;;  %v1346_v24 = vld [vmem:[#allocation11 + $0xc20] sm:$0xff]  ;;  %v1343_v27 = vld [vmem:[#allocation11 + $0xc08] sm:$0xff] }
 0x326   :  { %v6199_v36 = vcombine.low %v1342_v19, %v1346_v24 }
 0x327   :  { %4216 = vmatpush1.bf16.msra.mxu1 %v6143_v32  ;;  %v6200_v32 = vcombine.high %v1342_v19, %v1346_v24  ;;  %v1394_v19 = vld [vmem:[#allocation11 + $0xda0] sm:$0xff]  ;;  %v1391_v24 = vld [vmem:[#allocation11 + $0xd88] sm:$0xff] }
 0x328   :  { %4380 = vmatpush1.bf16.msra.mxu0 %v6145_v33  ;;  %4217 = vmatprep.subr.bf16.mxu1 %v6152_v34  ;;  %v6202_v33 = vcombine.high %v1343_v27, %v1347_v28  ;;  %v957_v34 = vmax.f32 %v7458_v26, 0.0  ;;  %v6210_v26 = vcombine.high %v1351_v38, %v1355_v39 }
 0x329   :  { %4381 = vmatprep.subr.bf16.mxu0 %v6154_v45  ;;  %v1350_v45 = vld [vmem:[#allocation11 + $0xc40] sm:$0xff] }
 0x32a   :  { %v6208_v20 = vcombine.high %v1350_v45, %v1354_v35  ;;  %v7480_v43 = vpack.c.bf16 %v957_v34, %v957_v34  ;;  %v6207_v52 = vcombine.low %v1350_v45, %v1354_v35  ;;  %v1399_v34 = vld [vmem:[#allocation11 + $0xdc8] sm:$0xff] }
 0x32b   :  { %4218 = vmatpush1.bf16.msra.mxu1 %v6151_v40  ;;  %v7478_v40 = vpack.c.bf16 %v954_v30, %v954_v30  ;;  %v1403_v45 = vld [vmem:[#allocation11 + $0xde8] sm:$0xff] }
 0x32c   :  { %4382 = vmatpush1.bf16.msra.mxu0 %v6153_v41  ;;  %4219 = vmatprep.subr.bf16.mxu1 %v6160_v48  ;;  %v6201_v41 = vcombine.low %v1343_v27, %v1347_v28  ;;  %v1358_v48 = vld [vmem:[#allocation11 + $0xc80] sm:$0xff]  ;;  %v1395_v27 = vld [vmem:[#allocation11 + $0xda8] sm:$0xff] }
 0x32d   :  { %4383 = vmatprep.subr.bf16.mxu0 %v6162_v42  ;;  %v1362_v42 = vld [vmem:[#allocation11 + $0xca0] sm:$0xff] }
 0x32e   :  { %v6215_v59 = vcombine.low %v1358_v48, %v1362_v42 }
 0x32f   :  { %4220 = vmatpush1.bf16.msra.mxu1 %v6159_v53  ;;  %v6209_v53 = vcombine.low %v1351_v38, %v1355_v39  ;;  %v6258_v39 = vcombine.high %v1399_v34, %v1403_v45 }
 0x330   :  { %4384 = vmatpush1.bf16.msra.mxu0 %v6161_v54  ;;  %4221 = vmatprep.subr.bf16.mxu1 %v6168_v56  ;;  %v6216_v54 = vcombine.high %v1358_v48, %v1362_v42  ;;  %v6218_v56 = vcombine.high %v1359_v49, %v1363_v50  ;;  %v1407_v48 = vld [vmem:[#allocation11 + $0xe08] sm:$0xff] }
 0x331   :  { %4385 = vmatprep.subr.bf16.mxu0 %v6170_v57  ;;  %v1366_v57 = vld [vmem:[#allocation11 + $0xcc0] sm:$0xff]  ;;  %v1411_v42 = vld [vmem:[#allocation11 + $0xe28] sm:$0xff] }
 0x332   :  { %v6223_v2 = vcombine.low %v1366_v57, %v1370_v58 }
 0x333   :  { %4222 = vmatpush1.bf16.msra.mxu1 %v6167_v60  ;;  %v6217_v60 = vcombine.low %v1359_v49, %v1363_v50  ;;  %v6257_v49 = vcombine.low %v1399_v34, %v1403_v45 }
 0x334   :  { %4386 = vmatpush1.bf16.msra.mxu0 %v6169_v55  ;;  %4223 = vmatprep.subr.bf16.mxu1 %v6176_v22  ;;  %v6224_v55 = vcombine.high %v1366_v57, %v1370_v58  ;;  %v6226_v22 = vcombine.high %v1367_v37, %v1371_v44  ;;  %v1419_v57 = vld [vmem:[#allocation11 + $0xe68] sm:$0xff] }
 0x335   :  { %4387 = vmatprep.subr.bf16.mxu0 %v6178_v61  ;;  %v1374_v61 = vld [vmem:[#allocation11 + $0xd00] sm:$0xff] }
 0x336   :  { %v6231_v13 = vcombine.low %v1374_v61, %v1378_v62 }
 0x337   :  { %4224 = vmatpush1.bf16.msra.mxu1 %v6175_v4  ;;  %v6225_v4 = vcombine.low %v1367_v37, %v1371_v44  ;;  %v6265_v37 = vcombine.low %v1407_v48, %v1411_v42 }
 0x338   :  { %4388 = vmatpush1.bf16.msra.mxu0 %v6177_v5  ;;  %4225 = vmatprep.subr.bf16.mxu1 %v6184_v6  ;;  %v6232_v5 = vcombine.high %v1374_v61, %v1378_v62  ;;  %v6234_v6 = vcombine.high %v1375_v63, %v1379_v23  ;;  %v1427_v61 = vld [vmem:[#allocation11 + $0xea8] sm:$0xff] }
 0x339   :  { %4389 = vmatprep.subr.bf16.mxu0 %v6186_v7  ;;  %v1382_v7 = vld [vmem:[#allocation11 + $0xd40] sm:$0xff] }
 0x33a   :  { %v6239_v28 = vcombine.low %v1382_v7, %v1386_v10 }
 0x33b   :  { %4226 = vmatpush1.bf16.msra.mxu1 %v6183_v14  ;;  %v6233_v14 = vcombine.low %v1375_v63, %v1379_v23 }
 0x33c   :  { %4390 = vmatpush1.bf16.msra.mxu0 %v6185_v15  ;;  %4227 = vmatprep.subr.bf16.mxu1 %v6192_v17  ;;  %v6240_v15 = vcombine.high %v1382_v7, %v1386_v10  ;;  %v6242_v17 = vcombine.high %v1383_v11, %v1387_v12  ;;  %v1435_v7 = vld [vmem:[#allocation11 + $0xee8] sm:$0xff] }
 0x33d   :  { %4391 = vmatprep.subr.bf16.mxu0 %v6194_v18  ;;  %v1390_v18 = vld [vmem:[#allocation11 + $0xd80] sm:$0xff] }
 0x33e   :  { %v6248_v30 = vcombine.high %v1390_v18, %v1394_v19  ;;  %v6247_v35 = vcombine.low %v1390_v18, %v1394_v19  ;;  %v1443_v18 = vld [vmem:[#allocation11 + $0xf28] sm:$0xff] }
 0x33f   :  { %4228 = vmatpush1.bf16.msra.mxu1 %v6191_v29  ;;  %v6241_v29 = vcombine.low %v1383_v11, %v1387_v12 }
 0x340   :  { %4392 = vmatpush1.bf16.msra.mxu0 %v6193_v31  ;;  %4238 = vmatprep.subr.bf16.mxu1 %v6200_v32  ;;  %v6250_v31 = vcombine.high %v1391_v24, %v1395_v27  ;;  %v1398_v32 = vld [vmem:[#allocation11 + $0xdc0] sm:$0xff] }
 0x341   :  { %4402 = vmatprep.subr.bf16.mxu0 %v6202_v33  ;;  %v1402_v33 = vld [vmem:[#allocation11 + $0xde0] sm:$0xff] }
 0x342   :  { %4230 = vmatmul.mubr.bf16.vlgmr.msra.gmra.mrb[8].mxu1 %v7478_v40  ;;  %v6256_v38 = vcombine.high %v1398_v32, %v1402_v33 }
 0x343   :  { %4394 = vmatmul.mubr.bf16.vlgmr.msra.gmra.mrb[12].mxu0 %v7478_v40  ;;  %4239 = vmatpush1.bf16.msra.mxu1 %v6199_v36  ;;  %v6249_v36 = vcombine.low %v1391_v24, %v1395_v27 }
 0x344   :  { %4270 = vmatprep.mubr.bf16.mxu1 %v7480_v43  ;;  %4403 = vmatpush1.bf16.msra.mxu0 %v6201_v41  ;;  %v1406_v41 = vld [vmem:[#allocation11 + $0xe00] sm:$0xff] }
 0x345   :  { %4434 = vmatprep.mubr.bf16.mxu0 %v7480_v43  ;;  %4240 = vmatprep.subr.bf16.mxu1 %v6208_v20  ;;  %v1410_v20 = vld [vmem:[#allocation11 + $0xe20] sm:$0xff] }
 0x346   :  { %4404 = vmatprep.subr.bf16.mxu0 %v6210_v26  ;;  %v6255_v26 = vcombine.low %v1398_v32, %v1402_v33  ;;  %v6264_v50 = vcombine.high %v1406_v41, %v1410_v20  ;;  %v6263_v58 = vcombine.low %v1406_v41, %v1410_v20  ;;  %v1451_v32 = vld [vmem:[#allocation11 + $0xf68] sm:$0xff] }
 0x347   :  { %4241 = vmatpush1.bf16.msra.mxu1 %v6207_v52  ;;  %v6266_v52 = vcombine.high %v1407_v48, %v1411_v42  ;;  %v1459_v41 = vld [vmem:[#allocation11 + $0xfa8] sm:$0xff] }
 0x348   :  { %4405 = vmatpush1.bf16.msra.mxu0 %v6209_v53  ;;  %4242 = vmatprep.subr.bf16.mxu1 %v6216_v54  ;;  %v1414_v53 = vld [vmem:[#allocation11 + $0xe40] sm:$0xff] }
 0x349   :  { %4406 = vmatprep.subr.bf16.mxu0 %v6218_v56  ;;  %v1418_v54 = vld [vmem:[#allocation11 + $0xe60] sm:$0xff]  ;;  %v1415_v56 = vld [vmem:[#allocation11 + $0xe48] sm:$0xff] }
 0x34a   :  { %v6272_v44 = vcombine.high %v1414_v53, %v1418_v54  ;;  %v6271_v62 = vcombine.low %v1414_v53, %v1418_v54  ;;  %v6273_v63 = vcombine.low %v1415_v56, %v1419_v57  ;;  %v1467_v53 = vld [vmem:[#allocation11 + $0xfe8] sm:$0xff] }
 0x34b   :  { %4243 = vmatpush1.bf16.msra.mxu1 %v6215_v59  ;;  %v6274_v59 = vcombine.high %v1415_v56, %v1419_v57 }
 0x34c   :  { %4407 = vmatpush1.bf16.msra.mxu0 %v6217_v60  ;;  %4244 = vmatprep.subr.bf16.mxu1 %v6224_v55  ;;  %v1422_v60 = vld [vmem:[#allocation11 + $0xe80] sm:$0xff] }
 0x34d   :  { %4408 = vmatprep.subr.bf16.mxu0 %v6226_v22  ;;  %v1426_v55 = vld [vmem:[#allocation11 + $0xea0] sm:$0xff]  ;;  %v1423_v22 = vld [vmem:[#allocation11 + $0xe88] sm:$0xff] }
 0x34e   :  { %v6280_v23 = vcombine.high %v1422_v60, %v1426_v55  ;;  %v6279_v10 = vcombine.low %v1422_v60, %v1426_v55  ;;  %v6281_v11 = vcombine.low %v1423_v22, %v1427_v61  ;;  %v965_v60 = vld [vmem:[#allocation11 + $0x38] sm:$0xff] }
 0x34f   :  { %4245 = vmatpush1.bf16.msra.mxu1 %v6223_v2  ;;  %v6282_v2 = vcombine.high %v1423_v22, %v1427_v61  ;;  %v956_v22 = vmax.f32 %v7454_v21, 0.0  ;;  %v976_v21 = vld [vmem:[#allocation11 + $0x90] sm:$0xff] }
 0x350   :  { %4409 = vmatpush1.bf16.msra.mxu0 %v6225_v4  ;;  %4246 = vmatprep.subr.bf16.mxu1 %v6232_v5  ;;  %v1430_v4 = vld [vmem:[#allocation11 + $0xec0] sm:$0xff] }
 0x351   :  { %4410 = vmatprep.subr.bf16.mxu0 %v6234_v6  ;;  %v1434_v5 = vld [vmem:[#allocation11 + $0xee0] sm:$0xff]  ;;  %v1431_v6 = vld [vmem:[#allocation11 + $0xec8] sm:$0xff] }
 0x352   :  { %v6288_v12 = vcombine.high %v1430_v4, %v1434_v5  ;;  %v6287_v19 = vcombine.low %v1430_v4, %v1434_v5  ;;  %v6289_v24 = vcombine.low %v1431_v6, %v1435_v7  ;;  %v969_v5 = vld [vmem:[#allocation11 + $0x58] sm:$0xff] }
 0x353   :  { %4247 = vmatpush1.bf16.msra.mxu1 %v6231_v13  ;;  %v6290_v13 = vcombine.high %v1431_v6, %v1435_v7  ;;  %v973_v6 = vld [vmem:[#allocation11 + $0x78] sm:$0xff]  ;;  %v7487_v7 = vpack.c.bf16 %v956_v22, %v956_v22  ;;  %v1016_v22 = vld [vmem:[#allocation11 + $0x1d0] sm:$0xff] }
 0x354   :  { %4411 = vmatpush1.bf16.msra.mxu0 %v6233_v14  ;;  %4248 = vmatprep.subr.bf16.mxu1 %v6240_v15  ;;  %v1438_v14 = vld [vmem:[#allocation11 + $0xf00] sm:$0xff] }
 0x355   :  { %4412 = vmatprep.subr.bf16.mxu0 %v6242_v17  ;;  %v1442_v15 = vld [vmem:[#allocation11 + $0xf20] sm:$0xff]  ;;  %v1439_v17 = vld [vmem:[#allocation11 + $0xf08] sm:$0xff] }
 0x356   :  { %v6296_v27 = vcombine.high %v1438_v14, %v1442_v15  ;;  %v6295_v33 = vcombine.low %v1438_v14, %v1442_v15  ;;  %v6297_v34 = vcombine.low %v1439_v17, %v1443_v18  ;;  %v977_v14 = vld [vmem:[#allocation11 + $0x98] sm:$0xff] }
 0x357   :  { %4249 = vmatpush1.bf16.msra.mxu1 %v6239_v28  ;;  %v6298_v28 = vcombine.high %v1439_v17, %v1443_v18  ;;  %v981_v15 = vld [vmem:[#allocation11 + $0xb8] sm:$0xff]  ;;  %v5829_v18 = vcombine.low %v969_v5, %v973_v6 }
 0x358   :  { %4413 = vmatpush1.bf16.msra.mxu0 %v6241_v29  ;;  %4250 = vmatprep.subr.bf16.mxu1 %v6248_v30  ;;  %v1446_v29 = vld [vmem:[#allocation11 + $0xf40] sm:$0xff] }
 0x359   :  { %4414 = vmatprep.subr.bf16.mxu0 %v6250_v31  ;;  %v1450_v30 = vld [vmem:[#allocation11 + $0xf60] sm:$0xff]  ;;  %v1447_v31 = vld [vmem:[#allocation11 + $0xf48] sm:$0xff] }
 0x35a   :  { %v6304_v45 = vcombine.high %v1446_v29, %v1450_v30  ;;  %v6303_v20 = vcombine.low %v1446_v29, %v1450_v30  ;;  %v6305_v48 = vcombine.low %v1447_v31, %v1451_v32  ;;  %v985_v29 = vld [vmem:[#allocation11 + $0xd8] sm:$0xff] }
 0x35b   :  { %4251 = vmatpush1.bf16.msra.mxu1 %v6247_v35  ;;  %v6306_v35 = vcombine.high %v1447_v31, %v1451_v32  ;;  %v989_v30 = vld [vmem:[#allocation11 + $0xf8] sm:$0xff]  ;;  %v5837_v32 = vcombine.low %v977_v14, %v981_v15 }
 0x35c   :  { %4415 = vmatpush1.bf16.msra.mxu0 %v6249_v36  ;;  %4252 = vmatprep.subr.bf16.mxu1 %v6256_v38  ;;  %v1454_v36 = vld [vmem:[#allocation11 + $0xf80] sm:$0xff] }
 0x35d   :  { %4416 = vmatprep.subr.bf16.mxu0 %v6258_v39  ;;  %v1458_v38 = vld [vmem:[#allocation11 + $0xfa0] sm:$0xff]  ;;  %v1455_v39 = vld [vmem:[#allocation11 + $0xf88] sm:$0xff] }
 0x35e   :  { %v6312_v42 = vcombine.high %v1454_v36, %v1458_v38  ;;  %v6311_v54 = vcombine.low %v1454_v36, %v1458_v38  ;;  %v6313_v56 = vcombine.low %v1455_v39, %v1459_v41  ;;  %v993_v36 = vld [vmem:[#allocation11 + $0x118] sm:$0xff] }
 0x35f   :  { %4253 = vmatpush1.bf16.msra.mxu1 %v6255_v26  ;;  %v6314_v26 = vcombine.high %v1455_v39, %v1459_v41  ;;  %v997_v38 = vld [vmem:[#allocation11 + $0x138] sm:$0xff]  ;;  %v5845_v39 = vcombine.low %v985_v29, %v989_v30 }
 0x360   :  { %4417 = vmatpush1.bf16.msra.mxu0 %v6257_v49  ;;  %4254 = vmatprep.subr.bf16.mxu1 %v6264_v50  ;;  %v1462_v49 = vld [vmem:[#allocation11 + $0xfc0] sm:$0xff] }
 0x361   :  { %4418 = vmatprep.subr.bf16.mxu0 %v6266_v52  ;;  %v1466_v50 = vld [vmem:[#allocation11 + $0xfe0] sm:$0xff]  ;;  %v1463_v52 = vld [vmem:[#allocation11 + $0xfc8] sm:$0xff] }
 0x362   :  { %v6320_v57 = vcombine.high %v1462_v49, %v1466_v50  ;;  %v6319_v55 = vcombine.low %v1462_v49, %v1466_v50  ;;  %v6321_v61 = vcombine.low %v1463_v52, %v1467_v53  ;;  %v1005_v49 = vld [vmem:[#allocation11 + $0x178] sm:$0xff] }
 0x363   :  { %4255 = vmatpush1.bf16.msra.mxu1 %v6263_v58  ;;  %v6322_v58 = vcombine.high %v1463_v52, %v1467_v53  ;;  %v5853_v52 = vcombine.low %v993_v36, %v997_v38 }
 0x364   :  { %4419 = vmatpush1.bf16.msra.mxu0 %v6265_v37  ;;  %4256 = vmatprep.subr.bf16.mxu1 %v6272_v44  ;;  %v960_v37 = vld [vmem:[#allocation11 + $0x10] sm:$0xff] }
 0x365   :  { %4420 = vmatprep.subr.bf16.mxu0 %v6274_v59  ;;  %v964_v44 = vld [vmem:[#allocation11 + $0x30] sm:$0xff]  ;;  %v961_v59 = vld [vmem:[#allocation11 + $0x18] sm:$0xff] }
 0x366   :  { %v5819_v4 = vcombine.low %v960_v37, %v964_v44 }
 0x367   :  { %4257 = vmatpush1.bf16.msra.mxu1 %v6271_v62  ;;  %v5820_v62 = vcombine.high %v960_v37, %v964_v44  ;;  %v1013_v37 = vld [vmem:[#allocation11 + $0x1b8] sm:$0xff] }
 0x368   :  { %4421 = vmatpush1.bf16.msra.mxu0 %v6273_v63  ;;  %4258 = vmatprep.subr.bf16.mxu1 %v6280_v23  ;;  %v5822_v63 = vcombine.high %v961_v59, %v965_v60  ;;  %v968_v23 = vld [vmem:[#allocation11 + $0x50] sm:$0xff] }
 0x369   :  { %4422 = vmatprep.subr.bf16.mxu0 %v6282_v2  ;;  %v972_v2 = vld [vmem:[#allocation11 + $0x70] sm:$0xff] }
 0x36a   :  { %v5827_v17 = vcombine.low %v968_v23, %v972_v2 }
 0x36b   :  { %4259 = vmatpush1.bf16.msra.mxu1 %v6279_v10  ;;  %v5821_v10 = vcombine.low %v961_v59, %v965_v60 }
 0x36c   :  { %4423 = vmatpush1.bf16.msra.mxu0 %v6281_v11  ;;  %4260 = vmatprep.subr.bf16.mxu1 %v6288_v12  ;;  %v5828_v11 = vcombine.high %v968_v23, %v972_v2  ;;  %v980_v12 = vld [vmem:[#allocation11 + $0xb0] sm:$0xff] }
 0x36d   :  { %4424 = vmatprep.subr.bf16.mxu0 %v6290_v13  ;;  %v5830_v13 = vcombine.high %v969_v5, %v973_v6  ;;  %v5835_v31 = vcombine.low %v976_v21, %v980_v12  ;;  %v1024_v6 = vld [vmem:[#allocation11 + $0x210] sm:$0xff] }
 0x36f   :  { %4261 = vmatpush1.bf16.msra.mxu1 %v6287_v19  ;;  %v5836_v19 = vcombine.high %v976_v21, %v980_v12  ;;  %v1029_v21 = vld [vmem:[#allocation11 + $0x238] sm:$0xff] }
 0x370   :  { %4425 = vmatpush1.bf16.msra.mxu0 %v6289_v24  ;;  %4262 = vmatprep.subr.bf16.mxu1 %v6296_v27  ;;  %v5838_v24 = vcombine.high %v977_v14, %v981_v15  ;;  %v984_v27 = vld [vmem:[#allocation11 + $0xd0] sm:$0xff] }
 0x371   :  { %4426 = vmatprep.subr.bf16.mxu0 %v6298_v28  ;;  %v988_v28 = vld [vmem:[#allocation11 + $0xf0] sm:$0xff] }
 0x373   :  { %4263 = vmatpush1.bf16.msra.mxu1 %v6295_v33  ;;  %v5844_v33 = vcombine.high %v984_v27, %v988_v28 }
 0x374   :  { %4427 = vmatpush1.bf16.msra.mxu0 %v6297_v34  ;;  %4264 = vmatprep.subr.bf16.mxu1 %v6304_v45  ;;  %v5846_v34 = vcombine.high %v985_v29, %v989_v30  ;;  %v992_v45 = vld [vmem:[#allocation11 + $0x110] sm:$0xff] }
 0x375   :  { %4428 = vmatprep.subr.bf16.mxu0 %v6306_v35  ;;  %v996_v35 = vld [vmem:[#allocation11 + $0x130] sm:$0xff] }
 0x376   :  { %v5852_v41 = vcombine.high %v992_v45, %v996_v35  ;;  %v5851_v50 = vcombine.low %v992_v45, %v996_v35 }
 0x377   :  { %4265 = vmatpush1.bf16.msra.mxu1 %v6303_v20  ;;  %v5854_v20 = vcombine.high %v993_v36, %v997_v38 }
 0x378   :  { %4429 = vmatpush1.bf16.msra.mxu0 %v6305_v48  ;;  %4266 = vmatprep.subr.bf16.mxu1 %v6312_v42  ;;  %v1000_v48 = vld [vmem:[#allocation11 + $0x150] sm:$0xff] }
 0x379   :  { %4430 = vmatprep.subr.bf16.mxu0 %v6314_v26  ;;  %v1004_v42 = vld [vmem:[#allocation11 + $0x170] sm:$0xff]  ;;  %v1001_v26 = vld [vmem:[#allocation11 + $0x158] sm:$0xff] }
 0x37a   :  { %v5860_v53 = vcombine.high %v1000_v48, %v1004_v42  ;;  %v5859_v44 = vcombine.low %v1000_v48, %v1004_v42  ;;  %v5861_v59 = vcombine.low %v1001_v26, %v1005_v49 }
 0x37b   :  { %4267 = vmatpush1.bf16.msra.mxu1 %v6311_v54  ;;  %v5862_v54 = vcombine.high %v1001_v26, %v1005_v49 }
 0x37c   :  { %4431 = vmatpush1.bf16.msra.mxu0 %v6313_v56  ;;  %4268 = vmatprep.subr.bf16.mxu1 %v6320_v57  ;;  %v1008_v56 = vld [vmem:[#allocation11 + $0x190] sm:$0xff] }
 0x37d   :  { %4432 = vmatprep.subr.bf16.mxu0 %v6322_v58  ;;  %v1012_v57 = vld [vmem:[#allocation11 + $0x1b0] sm:$0xff]  ;;  %v1009_v58 = vld [vmem:[#allocation11 + $0x198] sm:$0xff] }
 0x37e   :  { %v5868_v60 = vcombine.high %v1008_v56, %v1012_v57  ;;  %v5867_v23 = vcombine.low %v1008_v56, %v1012_v57  ;;  %v5869_v2 = vcombine.low %v1009_v58, %v1013_v37 }
 0x37f   :  { %4269 = vmatpush1.bf16.msra.mxu1 %v6319_v55  ;;  %v5870_v55 = vcombine.high %v1009_v58, %v1013_v37 }
 0x380   :  { %4433 = vmatpush1.bf16.msra.mxu0 %v6321_v61  ;;  %4443 = vmatprep.subr.bf16.mxu1 %v5820_v62  ;;  %v1020_v61 = vld [vmem:[#allocation11 + $0x1f0] sm:$0xff]  ;;  %v1017_v62 = vld [vmem:[#allocation11 + $0x1d8] sm:$0xff] }
 0x381   :  { %4607 = vmatprep.subr.bf16.mxu0 %v5822_v63  ;;  %v1021_v63 = vld [vmem:[#allocation11 + $0x1f8] sm:$0xff]  ;;  %v5875_v12 = vcombine.low %v1016_v22, %v1020_v61 }
 0x382   :  { %4271 = vmatmul.mubr.bf16.vlgmr.msra.gmra.mrb[8].mxu1 %v7487_v7  ;;  %v5878_v5 = vcombine.high %v1017_v62, %v1021_v63 }
 0x383   :  { %4435 = vmatmul.mubr.bf16.vlgmr.msra.gmra.mrb[12].mxu0 %v7487_v7  ;;  %4444 = vmatpush1.bf16.msra.mxu1 %v5819_v4  ;;  %v5876_v4 = vcombine.high %v1016_v22, %v1020_v61 }
 0x384   :  { %4475 = vmatprep.mubr.bf16.mxu1 %v7425_v8  ;;  %4608 = vmatpush1.bf16.msra.mxu0 %v5821_v10  ;;  %v1028_v10 = vld [vmem:[#allocation11 + $0x230] sm:$0xff] }
 0x385   :  { %4639 = vmatprep.mubr.bf16.mxu0 %v7425_v8  ;;  %4445 = vmatprep.subr.bf16.mxu1 %v5828_v11  ;;  %v5843_v8 = vcombine.low %v984_v27, %v988_v28  ;;  %v1025_v11 = vld [vmem:[#allocation11 + $0x218] sm:$0xff]  ;;  %v5884_v14 = vcombine.high %v1024_v6, %v1028_v10  ;;  %v5883_v27 = vcombine.low %v1024_v6, %v1028_v10 }
 0x386   :  { %4609 = vmatprep.subr.bf16.mxu0 %v5830_v13  ;;  %v5877_v13 = vcombine.low %v1017_v62, %v1021_v63  ;;  %v5886_v15 = vcombine.high %v1025_v11, %v1029_v21  ;;  %v5885_v28 = vcombine.low %v1025_v11, %v1029_v21 }
 0x387   :  { %4446 = vmatpush1.bf16.msra.mxu1 %v5827_v17  ;;  %v1032_v17 = vld [vmem:[#allocation11 + $0x250] sm:$0xff] }
 0x388   :  { %4610 = vmatpush1.bf16.msra.mxu0 %v5829_v18  ;;  %4447 = vmatprep.subr.bf16.mxu1 %v5836_v19  ;;  %v1036_v18 = vld [vmem:[#allocation11 + $0x270] sm:$0xff]  ;;  %v1033_v19 = vld [vmem:[#allocation11 + $0x258] sm:$0xff] }
 0x389   :  { %4611 = vmatprep.subr.bf16.mxu0 %v5838_v24  ;;  %v1037_v24 = vld [vmem:[#allocation11 + $0x278] sm:$0xff]  ;;  %v5892_v29 = vcombine.high %v1032_v17, %v1036_v18  ;;  %v5891_v45 = vcombine.low %v1032_v17, %v1036_v18 }
 0x38a   :  { %v5894_v30 = vcombine.high %v1033_v19, %v1037_v24  ;;  %v5893_v35 = vcombine.low %v1033_v19, %v1037_v24 }
 0x38b   :  { %4448 = vmatpush1.bf16.msra.mxu1 %v5835_v31  ;;  %v1040_v31 = vld [vmem:[#allocation11 + $0x290] sm:$0xff] }
 0x38c   :  { %4612 = vmatpush1.bf16.msra.mxu0 %v5837_v32  ;;  %4449 = vmatprep.subr.bf16.mxu1 %v5844_v33  ;;  %v1044_v32 = vld [vmem:[#allocation11 + $0x2b0] sm:$0xff]  ;;  %v1041_v33 = vld [vmem:[#allocation11 + $0x298] sm:$0xff] }
 0x38d   :  { %4613 = vmatprep.subr.bf16.mxu0 %v5846_v34  ;;  %v1045_v34 = vld [vmem:[#allocation11 + $0x2b8] sm:$0xff]  ;;  %v5900_v36 = vcombine.high %v1040_v31, %v1044_v32  ;;  %v5899_v48 = vcombine.low %v1040_v31, %v1044_v32 }
 0x38e   :  { %v5902_v38 = vcombine.high %v1041_v33, %v1045_v34  ;;  %v5901_v42 = vcombine.low %v1041_v33, %v1045_v34 }
 0x38f   :  { %4450 = vmatpush1.bf16.msra.mxu1 %v5843_v8  ;;  %v1048_v8 = vld [vmem:[#allocation11 + $0x2d0] sm:$0xff] }
 0x390   :  { %4614 = vmatpush1.bf16.msra.mxu0 %v5845_v39  ;;  %4451 = vmatprep.subr.bf16.mxu1 %v5852_v41  ;;  %v1052_v39 = vld [vmem:[#allocation11 + $0x2f0] sm:$0xff]  ;;  %v1049_v41 = vld [vmem:[#allocation11 + $0x2d8] sm:$0xff] }
 0x391   :  { %4615 = vmatprep.subr.bf16.mxu0 %v5854_v20  ;;  %v1053_v20 = vld [vmem:[#allocation11 + $0x2f8] sm:$0xff]  ;;  %v5908_v26 = vcombine.high %v1048_v8, %v1052_v39  ;;  %v5907_v56 = vcombine.low %v1048_v8, %v1052_v39 }
 0x392   :  { %v5910_v49 = vcombine.high %v1049_v41, %v1053_v20  ;;  %v5909_v57 = vcombine.low %v1049_v41, %v1053_v20  ;;  %v1101_v8 = vld [vmem:[#allocation11 + $0x478] sm:$0xff]  ;;  %v1104_v20 = vld [vmem:[#allocation11 + $0x490] sm:$0xff] }
 0x393   :  { %4452 = vmatpush1.bf16.msra.mxu1 %v5851_v50  ;;  %v1056_v50 = vld [vmem:[#allocation11 + $0x310] sm:$0xff] }
 0x394   :  { %4616 = vmatpush1.bf16.msra.mxu0 %v5853_v52  ;;  %4453 = vmatprep.subr.bf16.mxu1 %v5860_v53  ;;  %v1060_v52 = vld [vmem:[#allocation11 + $0x330] sm:$0xff]  ;;  %v1057_v53 = vld [vmem:[#allocation11 + $0x318] sm:$0xff] }
 0x395   :  { %4617 = vmatprep.subr.bf16.mxu0 %v5862_v54  ;;  %v1061_v54 = vld [vmem:[#allocation11 + $0x338] sm:$0xff]  ;;  %v5916_v58 = vcombine.high %v1056_v50, %v1060_v52  ;;  %v5915_v22 = vcombine.low %v1056_v50, %v1060_v52 }
 0x396   :  { %v5918_v37 = vcombine.high %v1057_v53, %v1061_v54  ;;  %v5917_v61 = vcombine.low %v1057_v53, %v1061_v54 }
 0x397   :  { %4454 = vmatpush1.bf16.msra.mxu1 %v5859_v44  ;;  %v1064_v44 = vld [vmem:[#allocation11 + $0x350] sm:$0xff] }
 0x398   :  { %4618 = vmatpush1.bf16.msra.mxu0 %v5861_v59  ;;  %4455 = vmatprep.subr.bf16.mxu1 %v5868_v60  ;;  %v1068_v59 = vld [vmem:[#allocation11 + $0x370] sm:$0xff]  ;;  %v1065_v60 = vld [vmem:[#allocation11 + $0x358] sm:$0xff] }
 0x399   :  { %4619 = vmatprep.subr.bf16.mxu0 %v5870_v55  ;;  %v1069_v55 = vld [vmem:[#allocation11 + $0x378] sm:$0xff]  ;;  %v5924_v62 = vcombine.high %v1064_v44, %v1068_v59  ;;  %v5923_v6 = vcombine.low %v1064_v44, %v1068_v59 }
 0x39a   :  { %v5926_v63 = vcombine.high %v1065_v60, %v1069_v55  ;;  %v5925_v10 = vcombine.low %v1065_v60, %v1069_v55  ;;  %v1120_v55 = vld [vmem:[#allocation11 + $0x510] sm:$0xff] }
 0x39b   :  { %4456 = vmatpush1.bf16.msra.mxu1 %v5867_v23  ;;  %v1072_v23 = vld [vmem:[#allocation11 + $0x390] sm:$0xff] }
 0x39c   :  { %4620 = vmatpush1.bf16.msra.mxu0 %v5869_v2  ;;  %4457 = vmatprep.subr.bf16.mxu1 %v5876_v4  ;;  %v1076_v2 = vld [vmem:[#allocation11 + $0x3b0] sm:$0xff]  ;;  %v1073_v4 = vld [vmem:[#allocation11 + $0x398] sm:$0xff] }
 0x39d   :  { %4621 = vmatprep.subr.bf16.mxu0 %v5878_v5  ;;  %v1077_v5 = vld [vmem:[#allocation11 + $0x3b8] sm:$0xff]  ;;  %v5932_v11 = vcombine.high %v1072_v23, %v1076_v2  ;;  %v5931_v17 = vcombine.low %v1072_v23, %v1076_v2 }
 0x39e   :  { %v5934_v21 = vcombine.high %v1073_v4, %v1077_v5  ;;  %v5933_v18 = vcombine.low %v1073_v4, %v1077_v5  ;;  %v1128_v4 = vld [vmem:[#allocation11 + $0x550] sm:$0xff] }
 0x39f   :  { %4458 = vmatpush1.bf16.msra.mxu1 %v5875_v12  ;;  %v1080_v12 = vld [vmem:[#allocation11 + $0x3d0] sm:$0xff] }
 0x3a0   :  { %4622 = vmatpush1.bf16.msra.mxu0 %v5877_v13  ;;  %4459 = vmatprep.subr.bf16.mxu1 %v5884_v14  ;;  %v1084_v13 = vld [vmem:[#allocation11 + $0x3f0] sm:$0xff]  ;;  %v1081_v14 = vld [vmem:[#allocation11 + $0x3d8] sm:$0xff] }
 0x3a1   :  { %4623 = vmatprep.subr.bf16.mxu0 %v5886_v15  ;;  %v1085_v15 = vld [vmem:[#allocation11 + $0x3f8] sm:$0xff]  ;;  %v5940_v19 = vcombine.high %v1080_v12, %v1084_v13  ;;  %v5939_v31 = vcombine.low %v1080_v12, %v1084_v13  ;;  %v1132_v5 = vld [vmem:[#allocation11 + $0x570] sm:$0xff] }
 0x3a2   :  { %v5942_v24 = vcombine.high %v1081_v14, %v1085_v15  ;;  %v5941_v32 = vcombine.low %v1081_v14, %v1085_v15  ;;  %v5988_v12 = vcombine.high %v1128_v4, %v1132_v5  ;;  %v1136_v14 = vld [vmem:[#allocation11 + $0x590] sm:$0xff] }
 0x3a3   :  { %4460 = vmatpush1.bf16.msra.mxu1 %v5883_v27  ;;  %v1088_v27 = vld [vmem:[#allocation11 + $0x410] sm:$0xff] }
 0x3a4   :  { %4624 = vmatpush1.bf16.msra.mxu0 %v5885_v28  ;;  %4461 = vmatprep.subr.bf16.mxu1 %v5892_v29  ;;  %v1092_v28 = vld [vmem:[#allocation11 + $0x430] sm:$0xff]  ;;  %v1089_v29 = vld [vmem:[#allocation11 + $0x418] sm:$0xff] }
 0x3a5   :  { %4625 = vmatprep.subr.bf16.mxu0 %v5894_v30  ;;  %v1093_v30 = vld [vmem:[#allocation11 + $0x438] sm:$0xff]  ;;  %v5948_v33 = vcombine.high %v1088_v27, %v1092_v28  ;;  %v1140_v15 = vld [vmem:[#allocation11 + $0x5b0] sm:$0xff] }
 0x3a6   :  { %v5950_v34 = vcombine.high %v1089_v29, %v1093_v30  ;;  %v5949_v39 = vcombine.low %v1089_v29, %v1093_v30  ;;  %v1144_v29 = vld [vmem:[#allocation11 + $0x5d0] sm:$0xff] }
 0x3a7   :  { %4462 = vmatpush1.bf16.msra.mxu1 %v5891_v45  ;;  %v1096_v45 = vld [vmem:[#allocation11 + $0x450] sm:$0xff] }
 0x3a8   :  { %4626 = vmatpush1.bf16.msra.mxu0 %v5893_v35  ;;  %4463 = vmatprep.subr.bf16.mxu1 %v5900_v36  ;;  %v1100_v35 = vld [vmem:[#allocation11 + $0x470] sm:$0xff]  ;;  %v5947_v36 = vcombine.low %v1088_v27, %v1092_v28  ;;  %v5996_v27 = vcombine.high %v1136_v14, %v1140_v15 }
 0x3a9   :  { %4627 = vmatprep.subr.bf16.mxu0 %v5902_v38  ;;  %v1097_v38 = vld [vmem:[#allocation11 + $0x458] sm:$0xff]  ;;  %v5956_v41 = vcombine.high %v1096_v45, %v1100_v35  ;;  %v5955_v50 = vcombine.low %v1096_v45, %v1100_v35  ;;  %v1148_v30 = vld [vmem:[#allocation11 + $0x5f0] sm:$0xff] }
 0x3aa   :  { %v5957_v52 = vcombine.low %v1097_v38, %v1101_v8  ;;  %v6004_v45 = vcombine.high %v1144_v29, %v1148_v30 }
 0x3ab   :  { %4464 = vmatpush1.bf16.msra.mxu1 %v5899_v48  ;;  %v1108_v48 = vld [vmem:[#allocation11 + $0x4b0] sm:$0xff] }
 0x3ac   :  { %4628 = vmatpush1.bf16.msra.mxu0 %v5901_v42  ;;  %4465 = vmatprep.subr.bf16.mxu1 %v5908_v26  ;;  %v5958_v42 = vcombine.high %v1097_v38, %v1101_v8  ;;  %v1105_v26 = vld [vmem:[#allocation11 + $0x498] sm:$0xff]  ;;  %v5964_v53 = vcombine.high %v1104_v20, %v1108_v48  ;;  %v5963_v44 = vcombine.low %v1104_v20, %v1108_v48  ;;  %v1156_v38 = vld [vmem:[#allocation11 + $0x630] sm:$0xff] }
 0x3ad   :  { %4629 = vmatprep.subr.bf16.mxu0 %v5910_v49  ;;  %v1109_v49 = vld [vmem:[#allocation11 + $0x4b8] sm:$0xff] }
 0x3ae   :  { %v5966_v54 = vcombine.high %v1105_v26, %v1109_v49  ;;  %v1153_v8 = vld [vmem:[#allocation11 + $0x618] sm:$0xff] }
 0x3af   :  { %4466 = vmatpush1.bf16.msra.mxu1 %v5907_v56  ;;  %v1112_v56 = vld [vmem:[#allocation11 + $0x4d0] sm:$0xff] }
 0x3b0   :  { %4630 = vmatpush1.bf16.msra.mxu0 %v5909_v57  ;;  %4467 = vmatprep.subr.bf16.mxu1 %v5916_v58  ;;  %v1116_v57 = vld [vmem:[#allocation11 + $0x4f0] sm:$0xff]  ;;  %v1113_v58 = vld [vmem:[#allocation11 + $0x4d8] sm:$0xff] }
 0x3b1   :  { %4631 = vmatprep.subr.bf16.mxu0 %v5918_v37  ;;  %v1117_v37 = vld [vmem:[#allocation11 + $0x4f8] sm:$0xff]  ;;  %v5972_v59 = vcombine.high %v1112_v56, %v1116_v57 }
 0x3b2   :  { %v5974_v60 = vcombine.high %v1113_v58, %v1117_v37 }
 0x3b3   :  { %4468 = vmatpush1.bf16.msra.mxu1 %v5915_v22  ;;  %v1124_v22 = vld [vmem:[#allocation11 + $0x530] sm:$0xff] }
 0x3b4   :  { %4632 = vmatpush1.bf16.msra.mxu0 %v5917_v61  ;;  %4469 = vmatprep.subr.bf16.mxu1 %v5924_v62  ;;  %v1121_v61 = vld [vmem:[#allocation11 + $0x518] sm:$0xff]  ;;  %v5980_v23 = vcombine.high %v1120_v55, %v1124_v22 }
 0x3b5   :  { %4633 = vmatprep.subr.bf16.mxu0 %v5926_v63  ;;  %v1125_v62 = vld [vmem:[#allocation11 + $0x538] sm:$0xff]  ;;  %v5973_v63 = vcombine.low %v1113_v58, %v1117_v37  ;;  %v1168_v58 = vld [vmem:[#allocation11 + $0x690] sm:$0xff] }
 0x3b6   :  { %v5982_v2 = vcombine.high %v1121_v61, %v1125_v62  ;;  %v1172_v37 = vld [vmem:[#allocation11 + $0x6b0] sm:$0xff] }
 0x3b7   :  { %4470 = vmatpush1.bf16.msra.mxu1 %v5923_v6  ;;  %v1129_v6 = vld [vmem:[#allocation11 + $0x558] sm:$0xff] }
 0x3b8   :  { %4634 = vmatpush1.bf16.msra.mxu0 %v5925_v10  ;;  %4471 = vmatprep.subr.bf16.mxu1 %v5932_v11  ;;  %v1133_v10 = vld [vmem:[#allocation11 + $0x578] sm:$0xff]  ;;  %v5979_v11 = vcombine.low %v1120_v55, %v1124_v22  ;;  %v6028_v55 = vcombine.high %v1168_v58, %v1172_v37 }
 0x3b9   :  { %4635 = vmatprep.subr.bf16.mxu0 %v5934_v21  ;;  %v5981_v21 = vcombine.low %v1121_v61, %v1125_v62  ;;  %v5990_v13 = vcombine.high %v1129_v6, %v1133_v10  ;;  %v1176_v61 = vld [vmem:[#allocation11 + $0x6d0] sm:$0xff] }
 0x3ba   :  { %v1180_v62 = vld [vmem:[#allocation11 + $0x6f0] sm:$0xff] }
 0x3bb   :  { %4472 = vmatpush1.bf16.msra.mxu1 %v5931_v17  ;;  %v1137_v17 = vld [vmem:[#allocation11 + $0x598] sm:$0xff] }
 0x3bc   :  { %4636 = vmatpush1.bf16.msra.mxu0 %v5933_v18  ;;  %4473 = vmatprep.subr.bf16.mxu1 %v5940_v19  ;;  %v1141_v18 = vld [vmem:[#allocation11 + $0x5b8] sm:$0xff]  ;;  %v5987_v19 = vcombine.low %v1128_v4, %v1132_v5  ;;  %v6036_v4 = vcombine.high %v1176_v61, %v1180_v62 }
 0x3bd   :  { %4637 = vmatprep.subr.bf16.mxu0 %v5942_v24  ;;  %v5989_v24 = vcombine.low %v1129_v6, %v1133_v10  ;;  %v5998_v28 = vcombine.high %v1137_v17, %v1141_v18  ;;  %v1184_v6 = vld [vmem:[#allocation11 + $0x710] sm:$0xff] }
 0x3be   :  { %v1188_v10 = vld [vmem:[#allocation11 + $0x730] sm:$0xff] }
 0x3bf   :  { %4474 = vmatpush1.bf16.msra.mxu1 %v5939_v31  ;;  %v1145_v31 = vld [vmem:[#allocation11 + $0x5d8] sm:$0xff] }
 0x3c0   :  { %4638 = vmatpush1.bf16.msra.mxu0 %v5941_v32  ;;  %4484 = vmatprep.subr.bf16.mxu1 %v5948_v33  ;;  %v1149_v32 = vld [vmem:[#allocation11 + $0x5f8] sm:$0xff]  ;;  %v5995_v33 = vcombine.low %v1136_v14, %v1140_v15  ;;  %v6044_v14 = vcombine.high %v1184_v6, %v1188_v10 }
 0x3c1   :  { %4648 = vmatprep.subr.bf16.mxu0 %v5950_v34  ;;  %v5997_v34 = vcombine.low %v1137_v17, %v1141_v18  ;;  %v6006_v35 = vcombine.high %v1145_v31, %v1149_v32  ;;  %v6005_v20 = vcombine.low %v1145_v31, %v1149_v32  ;;  %v1192_v17 = vld [vmem:[#allocation11 + $0x750] sm:$0xff] }
 0x3c2   :  { %4476 = vmatmul.mubr.bf16.vlgmr.msra.gmra.mrb[12].mxu1 %v7427_v9  ;;  %v1196_v18 = vld [vmem:[#allocation11 + $0x770] sm:$0xff] }
 0x3c3   :  { %4640 = vmatmul.mubr.bf16.vlgmr.msra.gmra.mrb[16].mxu0 %v7427_v9  ;;  %4485 = vmatpush1.bf16.msra.mxu1 %v5947_v36  ;;  %v5965_v9 = vcombine.low %v1105_v26, %v1109_v49  ;;  %v1152_v36 = vld [vmem:[#allocation11 + $0x610] sm:$0xff] }
 0x3c4   :  { %4516 = vmatprep.mubr.bf16.mxu1 %v7431_v16  ;;  %4649 = vmatpush1.bf16.msra.mxu0 %v5949_v39  ;;  %v1157_v39 = vld [vmem:[#allocation11 + $0x638] sm:$0xff]  ;;  %v6012_v48 = vcombine.high %v1152_v36, %v1156_v38  ;;  %v1160_v26 = vld [vmem:[#allocation11 + $0x650] sm:$0xff] }
 0x3c5   :  { %4680 = vmatprep.mubr.bf16.mxu0 %v7431_v16  ;;  %4486 = vmatprep.subr.bf16.mxu1 %v5956_v41  ;;  %v5971_v16 = vcombine.low %v1112_v56, %v1116_v57  ;;  %v6003_v41 = vcombine.low %v1144_v29, %v1148_v30  ;;  %v1164_v49 = vld [vmem:[#allocation11 + $0x670] sm:$0xff]  ;;  %v6052_v29 = vcombine.high %v1192_v17, %v1196_v18 }
 0x3c6   :  { %4650 = vmatprep.subr.bf16.mxu0 %v5958_v42  ;;  %v6014_v42 = vcombine.high %v1153_v8, %v1157_v39  ;;  %v6020_v56 = vcombine.high %v1160_v26, %v1164_v49  ;;  %v1200_v31 = vld [vmem:[#allocation11 + $0x790] sm:$0xff] }
 0x3c7   :  { %4487 = vmatpush1.bf16.msra.mxu1 %v5955_v50  ;;  %v1161_v50 = vld [vmem:[#allocation11 + $0x658] sm:$0xff]  ;;  %v1204_v32 = vld [vmem:[#allocation11 + $0x7b0] sm:$0xff] }
 0x3c8   :  { %4651 = vmatpush1.bf16.msra.mxu0 %v5957_v52  ;;  %4488 = vmatprep.subr.bf16.mxu1 %v5964_v53  ;;  %v1165_v52 = vld [vmem:[#allocation11 + $0x678] sm:$0xff]  ;;  %v6011_v53 = vcombine.low %v1152_v36, %v1156_v38  ;;  %v6060_v36 = vcombine.high %v1200_v31, %v1204_v32 }
 0x3c9   :  { %4652 = vmatprep.subr.bf16.mxu0 %v5966_v54  ;;  %v6013_v54 = vcombine.low %v1153_v8, %v1157_v39  ;;  %v6022_v57 = vcombine.high %v1161_v50, %v1165_v52  ;;  %v1208_v8 = vld [vmem:[#allocation11 + $0x7d0] sm:$0xff] }
 0x3ca   :  { %v1212_v39 = vld [vmem:[#allocation11 + $0x7f0] sm:$0xff] }
 0x3cb   :  { %4489 = vmatpush1.bf16.msra.mxu1 %v5963_v44  ;;  %v1169_v44 = vld [vmem:[#allocation11 + $0x698] sm:$0xff] }
 0x3cc   :  { %4653 = vmatpush1.bf16.msra.mxu0 %v5965_v9  ;;  %4490 = vmatprep.subr.bf16.mxu1 %v5972_v59  ;;  %v1173_v9 = vld [vmem:[#allocation11 + $0x6b8] sm:$0xff]  ;;  %v6019_v59 = vcombine.low %v1160_v26, %v1164_v49  ;;  %v6068_v26 = vcombine.high %v1208_v8, %v1212_v39 }
 0x3cd   :  { %4654 = vmatprep.subr.bf16.mxu0 %v5974_v60  ;;  %v6021_v60 = vcombine.low %v1161_v50, %v1165_v52  ;;  %v6030_v22 = vcombine.high %v1169_v44, %v1173_v9  ;;  %v1216_v50 = vld [vmem:[#allocation11 + $0x810] sm:$0xff] }
 0x3ce   :  { %v1220_v52 = vld [vmem:[#allocation11 + $0x830] sm:$0xff] }
 0x3cf   :  { %4491 = vmatpush1.bf16.msra.mxu1 %v5971_v16  ;;  %v1177_v16 = vld [vmem:[#allocation11 + $0x6d8] sm:$0xff] }
 0x3d0   :  { %4655 = vmatpush1.bf16.msra.mxu0 %v5973_v63  ;;  %4492 = vmatprep.subr.bf16.mxu1 %v5980_v23  ;;  %v1181_v63 = vld [vmem:[#allocation11 + $0x6f8] sm:$0xff]  ;;  %v6027_v23 = vcombine.low %v1168_v58, %v1172_v37  ;;  %v6076_v58 = vcombine.high %v1216_v50, %v1220_v52 }
 0x3d1   :  { %4656 = vmatprep.subr.bf16.mxu0 %v5982_v2  ;;  %v6029_v2 = vcombine.low %v1169_v44, %v1173_v9  ;;  %v6038_v5 = vcombine.high %v1177_v16, %v1181_v63  ;;  %v1224_v44 = vld [vmem:[#allocation11 + $0x850] sm:$0xff] }
 0x3d2   :  { %v1228_v9 = vld [vmem:[#allocation11 + $0x870] sm:$0xff] }
 0x3d3   :  { %4493 = vmatpush1.bf16.msra.mxu1 %v5979_v11  ;;  %v1185_v11 = vld [vmem:[#allocation11 + $0x718] sm:$0xff] }
 0x3d4   :  { %4657 = vmatpush1.bf16.msra.mxu0 %v5981_v21  ;;  %4494 = vmatprep.subr.bf16.mxu1 %v5988_v12  ;;  %v1189_v21 = vld [vmem:[#allocation11 + $0x738] sm:$0xff]  ;;  %v6035_v12 = vcombine.low %v1176_v61, %v1180_v62  ;;  %v6084_v61 = vcombine.high %v1224_v44, %v1228_v9  ;;  %v1232_v62 = vld [vmem:[#allocation11 + $0x890] sm:$0xff] }
 0x3d5   :  { %4658 = vmatprep.subr.bf16.mxu0 %v5990_v13  ;;  %v6037_v13 = vcombine.low %v1177_v16, %v1181_v63  ;;  %v6046_v15 = vcombine.high %v1185_v11, %v1189_v21  ;;  %v1236_v16 = vld [vmem:[#allocation11 + $0x8b0] sm:$0xff] }
 0x3d7   :  { %4495 = vmatpush1.bf16.msra.mxu1 %v5987_v19  ;;  %v1193_v19 = vld [vmem:[#allocation11 + $0x758] sm:$0xff] }
 0x3d8   :  { %4659 = vmatpush1.bf16.msra.mxu0 %v5989_v24  ;;  %4496 = vmatprep.subr.bf16.mxu1 %v5996_v27  ;;  %v1197_v24 = vld [vmem:[#allocation11 + $0x778] sm:$0xff]  ;;  %v6043_v27 = vcombine.low %v1184_v6, %v1188_v10  ;;  %v6092_v6 = vcombine.high %v1232_v62, %v1236_v16 }
 0x3d9   :  { %4660 = vmatprep.subr.bf16.mxu0 %v5998_v28  ;;  %v6045_v28 = vcombine.low %v1185_v11, %v1189_v21  ;;  %v6054_v30 = vcombine.high %v1193_v19, %v1197_v24  ;;  %v1240_v11 = vld [vmem:[#allocation11 + $0x8d0] sm:$0xff] }
 0x3da   :  { %v1244_v21 = vld [vmem:[#allocation11 + $0x8f0] sm:$0xff] }
 0x3db   :  { %4497 = vmatpush1.bf16.msra.mxu1 %v5995_v33  ;;  %v1201_v33 = vld [vmem:[#allocation11 + $0x798] sm:$0xff] }
 0x3dc   :  { %4661 = vmatpush1.bf16.msra.mxu0 %v5997_v34  ;;  %4498 = vmatprep.subr.bf16.mxu1 %v6004_v45  ;;  %v1205_v34 = vld [vmem:[#allocation11 + $0x7b8] sm:$0xff]  ;;  %v6051_v45 = vcombine.low %v1192_v17, %v1196_v18  ;;  %v1248_v18 = vld [vmem:[#allocation11 + $0x910] sm:$0xff] }
 0x3dd   :  { %4662 = vmatprep.subr.bf16.mxu0 %v6006_v35  ;;  %v6053_v35 = vcombine.low %v1193_v19, %v1197_v24  ;;  %v6062_v38 = vcombine.high %v1201_v33, %v1205_v34  ;;  %v1252_v19 = vld [vmem:[#allocation11 + $0x930] sm:$0xff]  ;;  %v1249_v24 = vld [vmem:[#allocation11 + $0x918] sm:$0xff] }
 0x3df   :  { %4499 = vmatpush1.bf16.msra.mxu1 %v6003_v41  ;;  %v1209_v41 = vld [vmem:[#allocation11 + $0x7d8] sm:$0xff] }
 0x3e0   :  { %4663 = vmatpush1.bf16.msra.mxu0 %v6005_v20  ;;  %4500 = vmatprep.subr.bf16.mxu1 %v6012_v48  ;;  %v1213_v20 = vld [vmem:[#allocation11 + $0x7f8] sm:$0xff]  ;;  %v6059_v48 = vcombine.low %v1200_v31, %v1204_v32  ;;  %v1256_v31 = vld [vmem:[#allocation11 + $0x950] sm:$0xff] }
 0x3e1   :  { %4664 = vmatprep.subr.bf16.mxu0 %v6014_v42  ;;  %v6061_v42 = vcombine.low %v1201_v33, %v1205_v34  ;;  %v6070_v49 = vcombine.high %v1209_v41, %v1213_v20  ;;  %v1260_v32 = vld [vmem:[#allocation11 + $0x970] sm:$0xff]  ;;  %v1257_v33 = vld [vmem:[#allocation11 + $0x958] sm:$0xff] }
 0x3e2   :  { %v1261_v34 = vld [vmem:[#allocation11 + $0x978] sm:$0xff] }
 0x3e3   :  { %4501 = vmatpush1.bf16.msra.mxu1 %v6011_v53  ;;  %v1217_v53 = vld [vmem:[#allocation11 + $0x818] sm:$0xff] }
 0x3e4   :  { %4665 = vmatpush1.bf16.msra.mxu0 %v6013_v54  ;;  %4502 = vmatprep.subr.bf16.mxu1 %v6020_v56  ;;  %v1221_v54 = vld [vmem:[#allocation11 + $0x838] sm:$0xff]  ;;  %v6067_v56 = vcombine.low %v1208_v8, %v1212_v39  ;;  %v1264_v8 = vld [vmem:[#allocation11 + $0x990] sm:$0xff] }
 0x3e5   :  { %4666 = vmatprep.subr.bf16.mxu0 %v6022_v57  ;;  %v6069_v57 = vcombine.low %v1209_v41, %v1213_v20  ;;  %v6078_v37 = vcombine.high %v1217_v53, %v1221_v54  ;;  %v1268_v39 = vld [vmem:[#allocation11 + $0x9b0] sm:$0xff]  ;;  %v1265_v41 = vld [vmem:[#allocation11 + $0x998] sm:$0xff] }
 0x3e6   :  { %v1269_v20 = vld [vmem:[#allocation11 + $0x9b8] sm:$0xff] }
 0x3e7   :  { %4503 = vmatpush1.bf16.msra.mxu1 %v6019_v59  ;;  %v6075_v59 = vcombine.low %v1216_v50, %v1220_v52  ;;  %v1272_v50 = vld [vmem:[#allocation11 + $0x9d0] sm:$0xff] }
 0x3e8   :  { %4667 = vmatpush1.bf16.msra.mxu0 %v6021_v60  ;;  %4504 = vmatprep.subr.bf16.mxu1 %v6028_v55  ;;  %v1225_v60 = vld [vmem:[#allocation11 + $0x858] sm:$0xff]  ;;  %v1276_v52 = vld [vmem:[#allocation11 + $0x9f0] sm:$0xff] }
 0x3e9   :  { %4668 = vmatprep.subr.bf16.mxu0 %v6030_v22  ;;  %v1229_v55 = vld [vmem:[#allocation11 + $0x878] sm:$0xff]  ;;  %v6077_v22 = vcombine.low %v1217_v53, %v1221_v54 }
 0x3ea   :  { %v6086_v63 = vcombine.high %v1225_v60, %v1229_v55  ;;  %v1273_v53 = vld [vmem:[#allocation11 + $0x9d8] sm:$0xff] }
 0x3eb   :  { %4505 = vmatpush1.bf16.msra.mxu1 %v6027_v23  ;;  %v1233_v23 = vld [vmem:[#allocation11 + $0x898] sm:$0xff] }
 0x3ec   :  { %4669 = vmatpush1.bf16.msra.mxu0 %v6029_v2  ;;  %4506 = vmatprep.subr.bf16.mxu1 %v6036_v4  ;;  %v1237_v2 = vld [vmem:[#allocation11 + $0x8b8] sm:$0xff]  ;;  %v6083_v4 = vcombine.low %v1224_v44, %v1228_v9  ;;  %v1280_v44 = vld [vmem:[#allocation11 + $0xa10] sm:$0xff] }
 0x3ed   :  { %4670 = vmatprep.subr.bf16.mxu0 %v6038_v5  ;;  %v6085_v5 = vcombine.low %v1225_v60, %v1229_v55  ;;  %v6094_v10 = vcombine.high %v1233_v23, %v1237_v2  ;;  %v1277_v54 = vld [vmem:[#allocation11 + $0x9f8] sm:$0xff]  ;;  %v1284_v9 = vld [vmem:[#allocation11 + $0xa30] sm:$0xff]  ;;  %v6131_v55 = vcombine.low %v1272_v50, %v1276_v52 }
 0x3ee   :  { %v1285_v60 = vld [vmem:[#allocation11 + $0xa38] sm:$0xff] }
 0x3ef   :  { %4507 = vmatpush1.bf16.msra.mxu1 %v6035_v12  ;;  %v1241_v12 = vld [vmem:[#allocation11 + $0x8d8] sm:$0xff] }
 0x3f0   :  { %4671 = vmatpush1.bf16.msra.mxu0 %v6037_v13  ;;  %4508 = vmatprep.subr.bf16.mxu1 %v6044_v14  ;;  %v1245_v13 = vld [vmem:[#allocation11 + $0x8f8] sm:$0xff]  ;;  %v6091_v14 = vcombine.low %v1232_v62, %v1236_v16  ;;  %v1288_v16 = vld [vmem:[#allocation11 + $0xa50] sm:$0xff] }
 0x3f1   :  { %4672 = vmatprep.subr.bf16.mxu0 %v6046_v15  ;;  %v6100_v15 = vcombine.high %v1240_v11, %v1244_v21  ;;  %v6102_v17 = vcombine.high %v1241_v12, %v1245_v13 }
 0x3f3   :  { %4509 = vmatpush1.bf16.msra.mxu1 %v6043_v27  ;;  %v1253_v27 = vld [vmem:[#allocation11 + $0x938] sm:$0xff] }
 0x3f4   :  { %4673 = vmatpush1.bf16.msra.mxu0 %v6045_v28  ;;  %4510 = vmatprep.subr.bf16.mxu1 %v6052_v29  ;;  %v6101_v28 = vcombine.low %v1241_v12, %v1245_v13  ;;  %v6108_v29 = vcombine.high %v1248_v18, %v1252_v19  ;;  %v1297_v12 = vld [vmem:[#allocation11 + $0xa98] sm:$0xff] }
 0x3f5   :  { %4674 = vmatprep.subr.bf16.mxu0 %v6054_v30  ;;  %v6110_v30 = vcombine.high %v1249_v24, %v1253_v27  ;;  %v1301_v13 = vld [vmem:[#allocation11 + $0xab8] sm:$0xff] }
 0x3f7   :  { %4511 = vmatpush1.bf16.msra.mxu1 %v6051_v45  ;;  %v6107_v45 = vcombine.low %v1248_v18, %v1252_v19  ;;  %v1304_v18 = vld [vmem:[#allocation11 + $0xad0] sm:$0xff] }
 0x3f8   :  { %4675 = vmatpush1.bf16.msra.mxu0 %v6053_v35  ;;  %4512 = vmatprep.subr.bf16.mxu1 %v6060_v36  ;;  %v6109_v35 = vcombine.low %v1249_v24, %v1253_v27  ;;  %v6116_v36 = vcombine.high %v1256_v31, %v1260_v32  ;;  %v1308_v19 = vld [vmem:[#allocation11 + $0xaf0] sm:$0xff]  ;;  %v1305_v24 = vld [vmem:[#allocation11 + $0xad8] sm:$0xff] }
 0x3f9   :  { %4676 = vmatprep.subr.bf16.mxu0 %v6062_v38  ;;  %v6118_v38 = vcombine.high %v1257_v33, %v1261_v34  ;;  %v1309_v27 = vld [vmem:[#allocation11 + $0xaf8] sm:$0xff] }
 0x3fb   :  { %4513 = vmatpush1.bf16.msra.mxu1 %v6059_v48  ;;  %v6115_v48 = vcombine.low %v1256_v31, %v1260_v32  ;;  %v1312_v31 = vld [vmem:[#allocation11 + $0xb10] sm:$0xff] }
 0x3fc   :  { %4677 = vmatpush1.bf16.msra.mxu0 %v6061_v42  ;;  %4514 = vmatprep.subr.bf16.mxu1 %v6068_v26  ;;  %v6117_v42 = vcombine.low %v1257_v33, %v1261_v34  ;;  %v6124_v26 = vcombine.high %v1264_v8, %v1268_v39  ;;  %v1316_v32 = vld [vmem:[#allocation11 + $0xb30] sm:$0xff]  ;;  %v1313_v33 = vld [vmem:[#allocation11 + $0xb18] sm:$0xff] }
 0x3fd   :  { %4678 = vmatprep.subr.bf16.mxu0 %v6070_v49  ;;  %v6126_v49 = vcombine.high %v1265_v41, %v1269_v20  ;;  %v1317_v34 = vld [vmem:[#allocation11 + $0xb38] sm:$0xff] }
 0x3ff   :  { %4515 = vmatpush1.bf16.msra.mxu1 %v6067_v56  ;;  %v6123_v56 = vcombine.low %v1264_v8, %v1268_v39  ;;  %v1320_v8 = vld [vmem:[#allocation11 + $0xb50] sm:$0xff] }
 0x400   :  { %4679 = vmatpush1.bf16.msra.mxu0 %v6069_v57  ;;  %4525 = vmatprep.subr.bf16.mxu1 %v6076_v58  ;;  %v6125_v57 = vcombine.low %v1265_v41, %v1269_v20  ;;  %v6132_v58 = vcombine.high %v1272_v50, %v1276_v52  ;;  %v1324_v39 = vld [vmem:[#allocation11 + $0xb70] sm:$0xff]  ;;  %v1321_v41 = vld [vmem:[#allocation11 + $0xb58] sm:$0xff] }
 0x401   :  { %4689 = vmatprep.subr.bf16.mxu0 %v6078_v37  ;;  %v6134_v37 = vcombine.high %v1273_v53, %v1277_v54  ;;  %v1325_v20 = vld [vmem:[#allocation11 + $0xb78] sm:$0xff]  ;;  %v1328_v50 = vld [vmem:[#allocation11 + $0xb90] sm:$0xff] }
 0x402   :  { %4517 = vmatmul.mubr.bf16.vlgmr.msra.gmra.mrb[12].mxu1 %v7468_v1  ;;  %v1332_v52 = vld [vmem:[#allocation11 + $0xbb0] sm:$0xff] }
 0x403   :  { %4681 = vmatmul.mubr.bf16.vlgmr.msra.gmra.mrb[16].mxu0 %v7468_v1  ;;  %4526 = vmatpush1.bf16.msra.mxu1 %v6075_v59  ;;  %v6093_v1 = vcombine.low %v1233_v23, %v1237_v2  ;;  %v1281_v59 = vld [vmem:[#allocation11 + $0xa18] sm:$0xff] }
 0x404   :  { %4557 = vmatprep.mubr.bf16.mxu1 %v7470_v3  ;;  %4690 = vmatpush1.bf16.msra.mxu0 %v6077_v22  ;;  %v6133_v22 = vcombine.low %v1273_v53, %v1277_v54  ;;  %v6142_v62 = vcombine.high %v1281_v59, %v1285_v60  ;;  %v1289_v23 = vld [vmem:[#allocation11 + $0xa58] sm:$0xff] }
 0x405   :  { %4721 = vmatprep.mubr.bf16.mxu0 %v7470_v3  ;;  %4527 = vmatprep.subr.bf16.mxu1 %v6084_v61  ;;  %v6099_v3 = vcombine.low %v1240_v11, %v1244_v21  ;;  %v6140_v61 = vcombine.high %v1280_v44, %v1284_v9  ;;  %v1293_v2 = vld [vmem:[#allocation11 + $0xa78] sm:$0xff]  ;;  %v1296_v11 = vld [vmem:[#allocation11 + $0xa90] sm:$0xff] }
 0x406   :  { %4691 = vmatprep.subr.bf16.mxu0 %v6086_v63  ;;  %v1292_v63 = vld [vmem:[#allocation11 + $0xa70] sm:$0xff]  ;;  %v1329_v53 = vld [vmem:[#allocation11 + $0xb98] sm:$0xff] }
 0x407   :  { %4528 = vmatpush1.bf16.msra.mxu1 %v6083_v4  ;;  %v6139_v4 = vcombine.low %v1280_v44, %v1284_v9  ;;  %v1300_v21 = vld [vmem:[#allocation11 + $0xab0] sm:$0xff]  ;;  %v1333_v54 = vld [vmem:[#allocation11 + $0xbb8] sm:$0xff] }
 0x408   :  { %4692 = vmatpush1.bf16.msra.mxu0 %v6085_v5  ;;  %4529 = vmatprep.subr.bf16.mxu1 %v6092_v6  ;;  %v6141_v5 = vcombine.low %v1281_v59, %v1285_v60  ;;  %v6148_v6 = vcombine.high %v1288_v16, %v1292_v63  ;;  %v1336_v44 = vld [vmem:[#allocation11 + $0xbd0] sm:$0xff]  ;;  %v1337_v59 = vld [vmem:[#allocation11 + $0xbd8] sm:$0xff] }
 0x409   :  { %4693 = vmatprep.subr.bf16.mxu0 %v6094_v10  ;;  %v6150_v10 = vcombine.high %v1289_v23, %v1293_v2  ;;  %v1340_v9 = vld [vmem:[#allocation11 + $0xbf0] sm:$0xff]  ;;  %v1341_v60 = vld [vmem:[#allocation11 + $0xbf8] sm:$0xff] }
 0x40b   :  { %4530 = vmatpush1.bf16.msra.mxu1 %v6091_v14  ;;  %v6147_v14 = vcombine.low %v1288_v16, %v1292_v63  ;;  %v1344_v16 = vld [vmem:[#allocation11 + $0xc10] sm:$0xff] }
 0x40c   :  { %4694 = vmatpush1.bf16.msra.mxu0 %v6093_v1  ;;  %4531 = vmatprep.subr.bf16.mxu1 %v6100_v15  ;;  %v6149_v1 = vcombine.low %v1289_v23, %v1293_v2  ;;  %v6156_v15 = vcombine.high %v1296_v11, %v1300_v21  ;;  %v1348_v63 = vld [vmem:[#allocation11 + $0xc30] sm:$0xff]  ;;  %v1345_v23 = vld [vmem:[#allocation11 + $0xc18] sm:$0xff] }
 0x40d   :  { %4695 = vmatprep.subr.bf16.mxu0 %v6102_v17  ;;  %v6158_v17 = vcombine.high %v1297_v12, %v1301_v13  ;;  %v1349_v2 = vld [vmem:[#allocation11 + $0xc38] sm:$0xff] }
 0x40f   :  { %4532 = vmatpush1.bf16.msra.mxu1 %v6099_v3  ;;  %v6155_v3 = vcombine.low %v1296_v11, %v1300_v21  ;;  %v1352_v11 = vld [vmem:[#allocation11 + $0xc50] sm:$0xff] }
 0x410   :  { %4696 = vmatpush1.bf16.msra.mxu0 %v6101_v28  ;;  %4533 = vmatprep.subr.bf16.mxu1 %v6108_v29  ;;  %v6157_v28 = vcombine.low %v1297_v12, %v1301_v13  ;;  %v6164_v29 = vcombine.high %v1304_v18, %v1308_v19  ;;  %v1356_v21 = vld [vmem:[#allocation11 + $0xc70] sm:$0xff]  ;;  %v6203_v12 = vcombine.low %v1344_v16, %v1348_v63  ;;  %v1353_v13 = vld [vmem:[#allocation11 + $0xc58] sm:$0xff] }
 0x411   :  { %4697 = vmatprep.subr.bf16.mxu0 %v6110_v30  ;;  %v6166_v30 = vcombine.high %v1305_v24, %v1309_v27 }
 0x413   :  { %4534 = vmatpush1.bf16.msra.mxu1 %v6107_v45  ;;  %v6163_v45 = vcombine.low %v1304_v18, %v1308_v19  ;;  %v1364_v18 = vld [vmem:[#allocation11 + $0xcb0] sm:$0xff] }
 0x414   :  { %4698 = vmatpush1.bf16.msra.mxu0 %v6109_v35  ;;  %4535 = vmatprep.subr.bf16.mxu1 %v6116_v36  ;;  %v6165_v35 = vcombine.low %v1305_v24, %v1309_v27  ;;  %v6172_v36 = vcombine.high %v1312_v31, %v1316_v32  ;;  %v1361_v24 = vld [vmem:[#allocation11 + $0xc98] sm:$0xff] }
 0x415   :  { %4699 = vmatprep.subr.bf16.mxu0 %v6118_v38  ;;  %v6174_v38 = vcombine.high %v1313_v33, %v1317_v34  ;;  %v1365_v27 = vld [vmem:[#allocation11 + $0xcb8] sm:$0xff] }
 0x417   :  { %4536 = vmatpush1.bf16.msra.mxu1 %v6115_v48  ;;  %v6171_v48 = vcombine.low %v1312_v31, %v1316_v32  ;;  %v1368_v31 = vld [vmem:[#allocation11 + $0xcd0] sm:$0xff] }
 0x418   :  { %4700 = vmatpush1.bf16.msra.mxu0 %v6117_v42  ;;  %4537 = vmatprep.subr.bf16.mxu1 %v6124_v26  ;;  %v6173_v42 = vcombine.low %v1313_v33, %v1317_v34  ;;  %v6180_v26 = vcombine.high %v1320_v8, %v1324_v39  ;;  %v1372_v32 = vld [vmem:[#allocation11 + $0xcf0] sm:$0xff]  ;;  %v1369_v33 = vld [vmem:[#allocation11 + $0xcd8] sm:$0xff] }
 0x419   :  { %4701 = vmatprep.subr.bf16.mxu0 %v6126_v49  ;;  %v6182_v49 = vcombine.high %v1321_v41, %v1325_v20  ;;  %v1373_v34 = vld [vmem:[#allocation11 + $0xcf8] sm:$0xff] }
 0x41b   :  { %4538 = vmatpush1.bf16.msra.mxu1 %v6123_v56  ;;  %v6179_v56 = vcombine.low %v1320_v8, %v1324_v39  ;;  %v1380_v8 = vld [vmem:[#allocation11 + $0xd30] sm:$0xff]  ;;  %v1377_v39 = vld [vmem:[#allocation11 + $0xd18] sm:$0xff] }
 0x41c   :  { %4702 = vmatpush1.bf16.msra.mxu0 %v6125_v57  ;;  %4539 = vmatprep.subr.bf16.mxu1 %v6132_v58  ;;  %v6181_v57 = vcombine.low %v1321_v41, %v1325_v20  ;;  %v6188_v58 = vcombine.high %v1328_v50, %v1332_v52  ;;  %v1381_v41 = vld [vmem:[#allocation11 + $0xd38] sm:$0xff]  ;;  %v6229_v20 = vcombine.low %v1369_v33, %v1373_v34 }
 0x41d   :  { %4703 = vmatprep.subr.bf16.mxu0 %v6134_v37  ;;  %v6190_v37 = vcombine.high %v1329_v53, %v1333_v54 }
 0x41f   :  { %4540 = vmatpush1.bf16.msra.mxu1 %v6131_v55  ;;  %v6187_v55 = vcombine.low %v1328_v50, %v1332_v52  ;;  %v1385_v50 = vld [vmem:[#allocation11 + $0xd58] sm:$0xff] }
 0x420   :  { %4704 = vmatpush1.bf16.msra.mxu0 %v6133_v22  ;;  %4541 = vmatprep.subr.bf16.mxu1 %v6140_v61  ;;  %v6189_v22 = vcombine.low %v1329_v53, %v1333_v54  ;;  %v6196_v61 = vcombine.high %v1336_v44, %v1340_v9  ;;  %v1389_v52 = vld [vmem:[#allocation11 + $0xd78] sm:$0xff]  ;;  %v6237_v54 = vcombine.low %v1377_v39, %v1381_v41 }
 0x421   :  { %4705 = vmatprep.subr.bf16.mxu0 %v6142_v62  ;;  %v6198_v62 = vcombine.high %v1337_v59, %v1341_v60 }
 0x423   :  { %4542 = vmatpush1.bf16.msra.mxu1 %v6139_v4  ;;  %v6195_v4 = vcombine.low %v1336_v44, %v1340_v9  ;;  %v1393_v44 = vld [vmem:[#allocation11 + $0xd98] sm:$0xff] }
 0x424   :  { %4706 = vmatpush1.bf16.msra.mxu0 %v6141_v5  ;;  %4543 = vmatprep.subr.bf16.mxu1 %v6148_v6  ;;  %v6197_v5 = vcombine.low %v1337_v59, %v1341_v60  ;;  %v6204_v6 = vcombine.high %v1344_v16, %v1348_v63  ;;  %v1397_v9 = vld [vmem:[#allocation11 + $0xdb8] sm:$0xff]  ;;  %v6245_v60 = vcombine.low %v1385_v50, %v1389_v52  ;;  %v1404_v16 = vld [vmem:[#allocation11 + $0xdf0] sm:$0xff] }
 0x425   :  { %4707 = vmatprep.subr.bf16.mxu0 %v6150_v10  ;;  %v6206_v10 = vcombine.high %v1345_v23, %v1349_v2 }
 0x427   :  { %4544 = vmatpush1.bf16.msra.mxu1 %v6147_v14  ;;  %v1357_v14 = vld [vmem:[#allocation11 + $0xc78] sm:$0xff] }
 0x428   :  { %4708 = vmatpush1.bf16.msra.mxu0 %v6149_v1  ;;  %4545 = vmatprep.subr.bf16.mxu1 %v6156_v15  ;;  %v6205_v1 = vcombine.low %v1345_v23, %v1349_v2  ;;  %v6212_v15 = vcombine.high %v1352_v11, %v1356_v21  ;;  %v6214_v19 = vcombine.high %v1353_v13, %v1357_v14  ;;  %v1401_v2 = vld [vmem:[#allocation11 + $0xdd8] sm:$0xff] }
 0x429   :  { %4709 = vmatprep.subr.bf16.mxu0 %v6158_v17  ;;  %v1360_v17 = vld [vmem:[#allocation11 + $0xc90] sm:$0xff] }
 0x42b   :  { %4546 = vmatpush1.bf16.msra.mxu1 %v6155_v3  ;;  %v6211_v3 = vcombine.low %v1352_v11, %v1356_v21 }
 0x42c   :  { %4710 = vmatpush1.bf16.msra.mxu0 %v6157_v28  ;;  %4547 = vmatprep.subr.bf16.mxu1 %v6164_v29  ;;  %v6213_v28 = vcombine.low %v1353_v13, %v1357_v14  ;;  %v6220_v29 = vcombine.high %v1360_v17, %v1364_v18 }
 0x42d   :  { %4711 = vmatprep.subr.bf16.mxu0 %v6166_v30  ;;  %v6222_v30 = vcombine.high %v1361_v24, %v1365_v27 }
 0x42f   :  { %4548 = vmatpush1.bf16.msra.mxu1 %v6163_v45  ;;  %v6219_v45 = vcombine.low %v1360_v17, %v1364_v18  ;;  %v1412_v17 = vld [vmem:[#allocation11 + $0xe30] sm:$0xff]  ;;  %v1409_v18 = vld [vmem:[#allocation11 + $0xe18] sm:$0xff] }
 0x430   :  { %4712 = vmatpush1.bf16.msra.mxu0 %v6165_v35  ;;  %4549 = vmatprep.subr.bf16.mxu1 %v6172_v36  ;;  %v6228_v35 = vcombine.high %v1368_v31, %v1372_v32  ;;  %v6230_v36 = vcombine.high %v1369_v33, %v1373_v34 }
 0x431   :  { %4713 = vmatprep.subr.bf16.mxu0 %v6174_v38  ;;  %v1376_v38 = vld [vmem:[#allocation11 + $0xd10] sm:$0xff] }
 0x432   :  { %v6235_v53 = vcombine.low %v1376_v38, %v1380_v8 }
 0x433   :  { %4550 = vmatpush1.bf16.msra.mxu1 %v6171_v48  ;;  %v6236_v48 = vcombine.high %v1376_v38, %v1380_v8  ;;  %v1425_v38 = vld [vmem:[#allocation11 + $0xe98] sm:$0xff] }
 0x434   :  { %4714 = vmatpush1.bf16.msra.mxu0 %v6173_v42  ;;  %4551 = vmatprep.subr.bf16.mxu1 %v6180_v26  ;;  %v6238_v42 = vcombine.high %v1377_v39, %v1381_v41  ;;  %v1384_v26 = vld [vmem:[#allocation11 + $0xd50] sm:$0xff]  ;;  %v1429_v8 = vld [vmem:[#allocation11 + $0xeb8] sm:$0xff] }
 0x435   :  { %4715 = vmatprep.subr.bf16.mxu0 %v6182_v49  ;;  %v1388_v49 = vld [vmem:[#allocation11 + $0xd70] sm:$0xff] }
 0x436   :  { %v6243_v59 = vcombine.low %v1384_v26, %v1388_v49 }
 0x437   :  { %4552 = vmatpush1.bf16.msra.mxu1 %v6179_v56  ;;  %v6244_v56 = vcombine.high %v1384_v26, %v1388_v49  ;;  %v1433_v26 = vld [vmem:[#allocation11 + $0xed8] sm:$0xff] }
 0x438   :  { %4716 = vmatpush1.bf16.msra.mxu0 %v6181_v57  ;;  %4553 = vmatprep.subr.bf16.mxu1 %v6188_v58  ;;  %v6246_v57 = vcombine.high %v1385_v50, %v1389_v52  ;;  %v1392_v58 = vld [vmem:[#allocation11 + $0xd90] sm:$0xff]  ;;  %v1437_v49 = vld [vmem:[#allocation11 + $0xef8] sm:$0xff]  ;;  %v6285_v52 = vcombine.low %v1425_v38, %v1429_v8 }
 0x439   :  { %4717 = vmatprep.subr.bf16.mxu0 %v6190_v37  ;;  %v1396_v37 = vld [vmem:[#allocation11 + $0xdb0] sm:$0xff] }
 0x43b   :  { %4554 = vmatpush1.bf16.msra.mxu1 %v6187_v55  ;;  %v6252_v55 = vcombine.high %v1392_v58, %v1396_v37 }
 0x43c   :  { %4718 = vmatpush1.bf16.msra.mxu0 %v6189_v22  ;;  %4555 = vmatprep.subr.bf16.mxu1 %v6196_v61  ;;  %v6254_v61 = vcombine.high %v1393_v44, %v1397_v9 }
 0x43d   :  { %4719 = vmatprep.subr.bf16.mxu0 %v6198_v62  ;;  %v1400_v62 = vld [vmem:[#allocation11 + $0xdd0] sm:$0xff] }
 0x43e   :  { %v6260_v13 = vcombine.high %v1400_v62, %v1404_v16 }
 0x43f   :  { %4556 = vmatpush1.bf16.msra.mxu1 %v6195_v4  ;;  %v1405_v4 = vld [vmem:[#allocation11 + $0xdf8] sm:$0xff] }
 0x440   :  { %4720 = vmatpush1.bf16.msra.mxu0 %v6197_v5  ;;  %4566 = vmatprep.subr.bf16.mxu1 %v6204_v6 }
 0x441   :  { %4730 = vmatprep.subr.bf16.mxu0 %v6206_v10  ;;  %v6251_v10 = vcombine.low %v1392_v58, %v1396_v37  ;;  %v1441_v58 = vld [vmem:[#allocation11 + $0xf18] sm:$0xff] }
 0x442   :  { %4558 = vmatmul.mubr.bf16.vlgmr.msra.gmra.mrb[12].mxu1 %v7478_v40  ;;  %v1445_v37 = vld [vmem:[#allocation11 + $0xf38] sm:$0xff] }
 0x443   :  { %4722 = vmatmul.mubr.bf16.vlgmr.msra.gmra.mrb[16].mxu0 %v7478_v40  ;;  %4567 = vmatpush1.bf16.msra.mxu1 %v6203_v12  ;;  %v6221_v40 = vcombine.low %v1361_v24, %v1365_v27  ;;  %v6253_v12 = vcombine.low %v1393_v44, %v1397_v9  ;;  %v6259_v24 = vcombine.low %v1400_v62, %v1404_v16  ;;  %v7513_v44 = vld [vmem:[#allocation13] sm:$0xff]  ;;  %v1452_v62 = vld [vmem:[#allocation11 + $0xf70] sm:$0xff] }
 0x444   :  { %4598 = vmatprep.mubr.bf16.mxu1 %v7480_v43  ;;  %4731 = vmatpush1.bf16.msra.mxu0 %v6205_v1  ;;  %v6262_v1 = vcombine.high %v1401_v2, %v1405_v4  ;;  %v6261_v27 = vcombine.low %v1401_v2, %v1405_v4  ;;  %v7516_v16 = vunpack.c.l.bf16 %v7513_v44  ;;  %v1449_v2 = vld [vmem:[#allocation11 + $0xf58] sm:$0xff] }
 0x445   :  { %4762 = vmatprep.mubr.bf16.mxu0 %v7480_v43  ;;  %4568 = vmatprep.subr.bf16.mxu1 %v6212_v15  ;;  %v6227_v43 = vcombine.low %v1368_v31, %v1372_v32  ;;  %v1408_v15 = vld [vmem:[#allocation11 + $0xe10] sm:$0xff]  ;;  %v1417_v31 = vld [vmem:[#allocation11 + $0xe58] sm:$0xff] }
 0x446   :  { %4732 = vmatprep.subr.bf16.mxu0 %v6214_v19  ;;  %v1413_v19 = vld [vmem:[#allocation11 + $0xe38] sm:$0xff]  ;;  %v6267_v33 = vcombine.low %v1408_v15, %v1412_v17 }
 0x447   :  { %4569 = vmatpush1.bf16.msra.mxu1 %v6211_v3  ;;  %v6268_v3 = vcombine.high %v1408_v15, %v1412_v17  ;;  %v1421_v32 = vld [vmem:[#allocation11 + $0xe78] sm:$0xff]  ;;  %v6269_v34 = vcombine.low %v1409_v18, %v1413_v19  ;;  %v1498_v17 = vrot.slane %v7516_v16, %v7412_v47 }
 0x448   :  { %4733 = vmatpush1.bf16.msra.mxu0 %v6213_v28  ;;  %4570 = vmatprep.subr.bf16.mxu1 %v6220_v29  ;;  %v6270_v28 = vcombine.high %v1409_v18, %v1413_v19  ;;  %v1416_v29 = vld [vmem:[#allocation11 + $0xe50] sm:$0xff]  ;;  %v6277_v41 = vcombine.low %v1417_v31, %v1421_v32  ;;  %v1453_v4 = vld [vmem:[#allocation11 + $0xf78] sm:$0xff] }
 0x449   :  { %4734 = vmatprep.subr.bf16.mxu0 %v6222_v30  ;;  %v1420_v30 = vld [vmem:[#allocation11 + $0xe70] sm:$0xff]  ;;  %v1461_v15 = vld [vmem:[#allocation11 + $0xfb8] sm:$0xff]  ;;  %v6309_v19 = vcombine.low %v1449_v2, %v1453_v4 }
 0x44a   :  { %v6275_v39 = vcombine.low %v1416_v29, %v1420_v30 }
 0x44b   :  { %4571 = vmatpush1.bf16.msra.mxu1 %v6219_v45  ;;  %v6276_v45 = vcombine.high %v1416_v29, %v1420_v30  ;;  %v1465_v30 = vld [vmem:[#allocation11 + $0xfd8] sm:$0xff] }
 0x44c   :  { %4735 = vmatpush1.bf16.msra.mxu0 %v6221_v40  ;;  %4572 = vmatprep.subr.bf16.mxu1 %v6228_v35  ;;  %v6278_v40 = vcombine.high %v1417_v31, %v1421_v32  ;;  %v1424_v35 = vld [vmem:[#allocation11 + $0xe90] sm:$0xff]  ;;  %v1469_v31 = vld [vmem:[#allocation11 + $0xff8] sm:$0xff]  ;;  %v1538_v32 = vrot.slane %v1498_v17, %v7394_v25  ;;  %v6700_v17 = vld [vmem:[#allocation14 + $0x78] sm:$0xff]  }
 0x44d   :  { %4736 = vmatprep.subr.bf16.mxu0 %v6230_v36  ;;  %v1428_v36 = vld [vmem:[#allocation11 + $0xeb0] sm:$0xff] }
 0x44e   :  { %v6283_v50 = vcombine.low %v1424_v35, %v1428_v36 }
 0x44f   :  { %4573 = vmatpush1.bf16.msra.mxu1 %v6227_v43  ;;  %v6284_v43 = vcombine.high %v1424_v35, %v1428_v36 }
 0x450   :  { %4737 = vmatpush1.bf16.msra.mxu0 %v6229_v20  ;;  %4574 = vmatprep.subr.bf16.mxu1 %v6236_v48  ;;  %v6286_v20 = vcombine.high %v1425_v38, %v1429_v8  ;;  %v1432_v48 = vld [vmem:[#allocation11 + $0xed0] sm:$0xff]  ;;  %v6325_v8 = vcombine.low %v1465_v30, %v1469_v31 }
 0x451   :  { %4738 = vmatprep.subr.bf16.mxu0 %v6238_v42  ;;  %v1436_v42 = vld [vmem:[#allocation11 + $0xef0] sm:$0xff] }
 0x452   :  { %v6291_v9 = vcombine.low %v1432_v48, %v1436_v42 }
 0x453   :  { %4575 = vmatpush1.bf16.msra.mxu1 %v6235_v53  ;;  %v6292_v53 = vcombine.high %v1432_v48, %v1436_v42  ;;  %v6674_v48 = vld [vmem:[#allocation14] sm:$0xff]  }
 0x454   :  { %4739 = vmatpush1.bf16.msra.mxu0 %v6237_v54  ;;  %4576 = vmatprep.subr.bf16.mxu1 %v6244_v56  ;;  %v6294_v54 = vcombine.high %v1433_v26, %v1437_v49  ;;  %v1440_v56 = vld [vmem:[#allocation11 + $0xf10] sm:$0xff]  ;;  %v6675_v42 = vld [vmem:[#allocation14 + $0x80] sm:$0xff]  }
 0x455   :  { %v7505_v22 = vpop.f32.mrb[8].mxu1  ;;  %4740 = vmatprep.subr.bf16.mxu0 %v6246_v57  ;;  %v1444_v57 = vld [vmem:[#allocation11 + $0xf30] sm:$0xff] }
 0x456   :  { %v7507_v63 = vpop.f32.mrb[12].mxu0  ;;  %v7509_v23 = vpop.f32.mrb[9].mxu1 }
 0x457   :  { %v7511_v5 = vpop.f32.mrb[13].mxu0  ;;  %v4276_v6 = vpop.f32.mrb[10].mxu1  ;;  %4577 = vmatpush1.bf16.msra.mxu1 %v6243_v59  ;;  %v6293_v59 = vcombine.low %v1433_v26, %v1437_v49  ;;  %v6676_v26 = vld [vmem:[#allocation14 + $0x48] sm:$0xff]  }
 0x458   :  { %v4440_v11 = vpop.f32.mrb[14].mxu0  ;;  %4741 = vmatpush1.bf16.msra.mxu0 %v6245_v60  ;;  %v4277_v21 = vpop.f32.mrb[11].mxu1  ;;  %4578 = vmatprep.subr.bf16.mxu1 %v6252_v55  ;;  %v6300_v60 = vcombine.high %v1440_v56, %v1444_v57  ;;  %v6302_v55 = vcombine.high %v1441_v58, %v1445_v37  ;;  %v6299_v6 = vcombine.low %v1440_v56, %v1444_v57  ;;  %v6682_v56 = vld [vmem:[#allocation14 + $0x10] sm:$0xff]  }
 0x459   :  { %v4441_v14 = vpop.f32.mrb[15].mxu0  ;;  %4742 = vmatprep.subr.bf16.mxu0 %v6254_v61  ;;  %v1448_v61 = vld [vmem:[#allocation11 + $0xf50] sm:$0xff]  ;;  %v6310_v21 = vcombine.high %v1449_v2, %v1453_v4  ;;  %v6585_v36 = vadd.f32 %v7511_v5, %v1538_v32  ;;  %v6683_v57 = vld [vmem:[#allocation14 + $0x90] sm:$0xff]   ;;  %v1494_v4 = vrot.slane %v7516_v16, %v7441_v51  ;;  %v6707_v32 = vld [vmem:[#allocation14 + $0x180] sm:$0xff]  }
 0x45a   :  { %v6308_v11 = vcombine.high %v1448_v61, %v1452_v62  ;;  %v1490_v14 = vrot.slane %v7516_v16, %v7409_v46  ;;  %v6307_v18 = vcombine.low %v1448_v61, %v1452_v62  ;;  %v6677_v5 = vld [vmem:[#allocation14 + $0xc8] sm:$0xff]   ;;  %v1486_v61 = vrot.slane %v7516_v16, %v7394_v25  ;;  %v6691_v62 = vld [vmem:[#allocation14 + $0xa0] sm:$0xff]   ;;  %v6699_v16 = vld [vmem:[#allocation14 + $0xb0] sm:$0xff]  }
 0x45b   :  { %4579 = vmatpush1.bf16.msra.mxu1 %v6251_v10  ;;  %v6301_v10 = vcombine.low %v1441_v58, %v1445_v37  ;;  %v6684_v58 = vld [vmem:[#allocation14 + $0x58] sm:$0xff]   ;;  %v6692_v2 = vld [vmem:[#allocation14 + $0x68] sm:$0xff]  }
 0x45c   :  { %4743 = vmatpush1.bf16.msra.mxu0 %v6253_v12  ;;  %4580 = vmatprep.subr.bf16.mxu1 %v6260_v13  ;;  %v1456_v12 = vld [vmem:[#allocation11 + $0xf90] sm:$0xff]  ;;  %v1530_v29 = vrot.slane %v1490_v14, %v7394_v25  ;;  %v6685_v37 = vld [vmem:[#allocation14 + $0xd8] sm:$0xff]   ;;  %v6697_v14 = vld [vmem:[#allocation14 + $0xf0] sm:$0xff]  }
 0x45d   :  { %4744 = vmatprep.subr.bf16.mxu0 %v6262_v1  ;;  %v1460_v13 = vld [vmem:[#allocation11 + $0xfb0] sm:$0xff]  ;;  %v1457_v1 = vld [vmem:[#allocation11 + $0xf98] sm:$0xff] }
 0x45e   :  { %v6583_v35 = vadd.f32 %v7509_v23, %v1530_v29 }
 0x45f   :  { %4581 = vmatpush1.bf16.msra.mxu1 %v6259_v24  ;;  %v6316_v24 = vcombine.high %v1456_v12, %v1460_v13 }
 0x460   :  { %4745 = vmatpush1.bf16.msra.mxu0 %v6261_v27  ;;  %4582 = vmatprep.subr.bf16.mxu1 %v6268_v3  ;;  %v6318_v27 = vcombine.high %v1457_v1, %v1461_v15  ;;  %v1464_v3 = vld [vmem:[#allocation11 + $0xfd0] sm:$0xff] }
 0x461   :  { %4746 = vmatprep.subr.bf16.mxu0 %v6270_v28  ;;  %v1468_v28 = vld [vmem:[#allocation11 + $0xff0] sm:$0xff] }
 0x462   :  { %v6323_v38 = vcombine.low %v1464_v3, %v1468_v28 }
 0x463   :  { %4583 = vmatpush1.bf16.msra.mxu1 %v6267_v33  ;;  %v6315_v33 = vcombine.low %v1456_v12, %v1460_v13  ;;  %v6696_v12 = vld [vmem:[#allocation14 + $0x70] sm:$0xff]   ;;  %v1534_v13 = vrot.slane %v1494_v4, %v7394_v25 }
 0x464   :  { %4747 = vmatpush1.bf16.msra.mxu0 %v6269_v34  ;;  %4584 = vmatprep.subr.bf16.mxu1 %v6276_v45  ;;  %v6317_v34 = vcombine.low %v1457_v1, %v1461_v15  ;;  %v6324_v45 = vcombine.high %v1464_v3, %v1468_v28  ;;  %v6698_v1 = vld [vmem:[#allocation14 + $0x30] sm:$0xff]   ;;  %v6703_v3 = vld [vmem:[#allocation14 + $0xb8] sm:$0xff]   ;;  %v6704_v28 = vld [vmem:[#allocation14 + $0x140] sm:$0xff]  }
 0x465   :  { %4748 = vmatprep.subr.bf16.mxu0 %v6278_v40  ;;  %v6326_v40 = vcombine.high %v1465_v30, %v1469_v31  ;;  %v6705_v30 = vld [vmem:[#allocation14 + $0x1c0] sm:$0xff]  }
 0x467   :  { %4585 = vmatpush1.bf16.msra.mxu1 %v6275_v39  ;;  %v6672_v39 = vld [vmem:[#allocation14 + $0x40] sm:$0xff]  }
 0x468   :  { %4749 = vmatpush1.bf16.msra.mxu0 %v6277_v41  ;;  %4586 = vmatprep.subr.bf16.mxu1 %v6284_v43  ;;  %v6673_v41 = vld [vmem:[#allocation14 + $0xc0] sm:$0xff]   ;;  %v4772_v43 = vmax.f32 %v6583_v35, 0.0  ;;  %v6712_v35 = vld [vmem:[#allocation14 + $0x150] sm:$0xff]  }
 0x469   :  { %4750 = vmatprep.subr.bf16.mxu0 %v6286_v20  ;;  %v4774_v20 = vmax.f32 %v6585_v36, 0.0  ;;  %v6713_v36 = vld [vmem:[#allocation14 + $0x1d0] sm:$0xff]  }
 0x46a   :  { %v4909_v23 = vpack.c.bf16 %v4772_v43, %v4772_v43  ;;  %v6718_v43 = vld [vmem:[#allocation14 + $0x118] sm:$0xff]  }
 0x46b   :  { %4587 = vmatpush1.bf16.msra.mxu1 %v6283_v50  ;;  %v4911_v49 = vpack.c.bf16 %v4774_v20, %v4774_v20  ;;  %v6678_v50 = vld [vmem:[#allocation14 + $0x8] sm:$0xff]   ;;  %v6719_v20 = vld [vmem:[#allocation14 + $0x198] sm:$0xff]  }
 0x46c   :  { %4751 = vmatpush1.bf16.msra.mxu0 %v6285_v52  ;;  %4588 = vmatprep.subr.bf16.mxu1 %v6292_v53  ;;  %v6679_v52 = vld [vmem:[#allocation14 + $0x88] sm:$0xff]   ;;  %v6680_v53 = vld [vmem:[#allocation14 + $0x50] sm:$0xff]  }
 0x46d   :  { %4752 = vmatprep.subr.bf16.mxu0 %v6294_v54  ;;  %v6681_v54 = vld [vmem:[#allocation14 + $0xd0] sm:$0xff]  }
 0x46f   :  { %4589 = vmatpush1.bf16.msra.mxu1 %v6291_v9  ;;  %v6687_v9 = vld [vmem:[#allocation14 + $0x98] sm:$0xff]  }
 0x470   :  { %4753 = vmatpush1.bf16.msra.mxu0 %v6293_v59  ;;  %4590 = vmatprep.subr.bf16.mxu1 %v6300_v60  ;;  %v6688_v59 = vld [vmem:[#allocation14 + $0x60] sm:$0xff]  }
 0x471   :  { %4754 = vmatprep.subr.bf16.mxu0 %v6302_v55  ;;  %v6689_v60 = vld [vmem:[#allocation14 + $0xe0] sm:$0xff]  }
 0x472   :  { %v6690_v55 = vld [vmem:[#allocation14 + $0x20] sm:$0xff]  }
 0x473   :  { %4591 = vmatpush1.bf16.msra.mxu1 %v6299_v6  ;;  %v6693_v6 = vld [vmem:[#allocation14 + $0xe8] sm:$0xff]  }
 0x474   :  { %4755 = vmatpush1.bf16.msra.mxu0 %v6301_v10  ;;  %4592 = vmatprep.subr.bf16.mxu1 %v6308_v11  ;;  %v6694_v10 = vld [vmem:[#allocation14 + $0x28] sm:$0xff]   ;;  %v1526_v11 = vrot.slane %v1486_v61, %v7394_v25 }
 0x475   :  { %4756 = vmatprep.subr.bf16.mxu0 %v6310_v21  ;;  %v6695_v21 = vld [vmem:[#allocation14 + $0xa8] sm:$0xff]  }
 0x476   :  { %v6582_v15 = vadd.f32 %v7505_v22, %v1526_v11  ;;  %v6706_v22 = vld [vmem:[#allocation14 + $0x100] sm:$0xff]  }
 0x477   :  { %4593 = vmatpush1.bf16.msra.mxu1 %v6307_v18  ;;  %v6584_v18 = vadd.f32 %v7507_v63, %v1534_v13 }
 0x478   :  { %4757 = vmatpush1.bf16.msra.mxu0 %v6309_v19  ;;  %4594 = vmatprep.subr.bf16.mxu1 %v6316_v24  ;;  %v6701_v19 = vld [vmem:[#allocation14 + $0xf8] sm:$0xff]  }
 0x479   :  { %4758 = vmatprep.subr.bf16.mxu0 %v6318_v27  ;;  %v6702_v24 = vld [vmem:[#allocation14 + $0x38] sm:$0xff]   ;;  %v4771_v27 = vmax.f32 %v6582_v15, 0.0  ;;  %v4773_v29 = vmax.f32 %v6584_v18, 0.0 }
 0x47b   :  { %4595 = vmatpush1.bf16.msra.mxu1 %v6315_v33  ;;  %v4908_v31 = vpack.c.bf16 %v4771_v27, %v4771_v27  ;;  %v6708_v33 = vld [vmem:[#allocation14 + $0x148] sm:$0xff]   ;;  %v4910_v63 = vpack.c.bf16 %v4773_v29, %v4773_v29 }
 0x47c   :  { %4759 = vmatpush1.bf16.msra.mxu0 %v6317_v34  ;;  %4596 = vmatprep.subr.bf16.mxu1 %v6324_v45  ;;  %v6709_v34 = vld [vmem:[#allocation14 + $0x1c8] sm:$0xff]  }
 0x47d   :  { %4760 = vmatprep.subr.bf16.mxu0 %v6326_v40  ;;  %v6710_v45 = vld [vmem:[#allocation14 + $0x108] sm:$0xff]  }
 0x47e   :  { %v6711_v40 = vld [vmem:[#allocation14 + $0x188] sm:$0xff]  }
 0x47f   :  { %4597 = vmatpush1.bf16.msra.mxu1 %v6323_v38  ;;  %v6714_v38 = vld [vmem:[#allocation14 + $0x110] sm:$0xff]  }
 0x480   :  { %4761 = vmatpush1.bf16.msra.mxu0 %v6325_v8  ;;  %6416 = vmatprep.subr.bf16.mxu1 %v6672_v39  ;;  %v6715_v8 = vld [vmem:[#allocation14 + $0x190] sm:$0xff]   ;;  %v6716_v39 = vld [vmem:[#allocation14 + $0x158] sm:$0xff]  }
 0x481   :  { %6438 = vmatprep.subr.bf16.mxu0 %v6673_v41  ;;  %v6717_v41 = vld [vmem:[#allocation14 + $0x1d8] sm:$0xff]  }
 0x482   :  { %4599 = vmatmul.mubr.bf16.vlgmr.msra.gmra.mrb[12].mxu1 %v7487_v7 }
 0x483   :  { %4763 = vmatmul.mubr.bf16.vlgmr.msra.gmra.mrb[16].mxu0 %v7487_v7  ;;  %6417 = vmatpush3.bf16.msra.mxu1 %v6674_v48  ;;  %v6686_v7 = vld [vmem:[#allocation14 + $0x18] sm:$0xff]   ;;  %v6720_v48 = vld [vmem:[#allocation14 + $0x160] sm:$0xff]  }
 0x484   :  { %5337 = vmatprep.mubr.bf16.mxu1 %v4909_v23  ;;  %6439 = vmatpush3.bf16.msra.mxu0 %v6675_v42  ;;  %v6721_v42 = vld [vmem:[#allocation14 + $0x1e0] sm:$0xff]  }
 0x485   :  { %5377 = vmatprep.mubr.bf16.mxu0 %v4911_v49  ;;  %6418 = vmatprep.subr.bf16.mxu1 %v6676_v26  ;;  %v6722_v26 = vld [vmem:[#allocation14 + $0x120] sm:$0xff]   ;;  %v6725_v49 = vld [vmem:[#allocation14 + $0x1e8] sm:$0xff]  }
 0x486   :  { %6440 = vmatprep.subr.bf16.mxu0 %v6677_v5  ;;  %v6723_v23 = vld [vmem:[#allocation14 + $0x1a0] sm:$0xff]   ;;  %v6724_v5 = vld [vmem:[#allocation14 + $0x168] sm:$0xff]  }
 0x487   :  { %6419 = vmatpush3.bf16.msra.mxu1 %v6678_v50  ;;  %v6726_v50 = vld [vmem:[#allocation14 + $0x128] sm:$0xff]  }
 0x488   :  { %6441 = vmatpush3.bf16.msra.mxu0 %v6679_v52  ;;  %6420 = vmatprep.subr.bf16.mxu1 %v6680_v53  ;;  %v6727_v52 = vld [vmem:[#allocation14 + $0x1a8] sm:$0xff]   ;;  %v6728_v53 = vld [vmem:[#allocation14 + $0x170] sm:$0xff]  }
 0x489   :  { %6442 = vmatprep.subr.bf16.mxu0 %v6681_v54  ;;  %v6729_v54 = vld [vmem:[#allocation14 + $0x1f0] sm:$0xff]  }
 0x48b   :  { %6421 = vmatpush3.bf16.msra.mxu1 %v6682_v56  ;;  %v6730_v56 = vld [vmem:[#allocation14 + $0x130] sm:$0xff]  }
 0x48c   :  { %6443 = vmatpush3.bf16.msra.mxu0 %v6683_v57  ;;  %6422 = vmatprep.subr.bf16.mxu1 %v6684_v58  ;;  %v6731_v57 = vld [vmem:[#allocation14 + $0x1b0] sm:$0xff]   ;;  %v6732_v58 = vld [vmem:[#allocation14 + $0x178] sm:$0xff]  }
 0x48d   :  { %6444 = vmatprep.subr.bf16.mxu0 %v6685_v37  ;;  %v6733_v37 = vld [vmem:[#allocation14 + $0x1f8] sm:$0xff]  }
 0x48f   :  { %6423 = vmatpush3.bf16.msra.mxu1 %v6686_v7  ;;  %v6734_v7 = vld [vmem:[#allocation14 + $0x138] sm:$0xff]  }
 0x490   :  { %6445 = vmatpush3.bf16.msra.mxu0 %v6687_v9  ;;  %6424 = vmatprep.subr.bf16.mxu1 %v6688_v59  ;;  %v6735_v9 = vld [vmem:[#allocation14 + $0x1b8] sm:$0xff]   ;;  %v1480_v59 = vunpack.c.h.bf16 %v7513_v44 }
 0x491   :  { %6446 = vmatprep.subr.bf16.mxu0 %v6689_v60 }
 0x492   :  { %v1502_v60 = vrot.slane %v1480_v59, %v7394_v25  ;;  %v1506_v61 = vrot.slane %v1480_v59, %v7409_v46 }
 0x493   :  { %6425 = vmatpush3.bf16.msra.mxu1 %v6690_v55  ;;  %v1510_v55 = vrot.slane %v1480_v59, %v7441_v51 }
 0x494   :  { %6447 = vmatpush3.bf16.msra.mxu0 %v6691_v62  ;;  %6426 = vmatprep.subr.bf16.mxu1 %v6692_v2  ;;  %v1514_v62 = vrot.slane %v1480_v59, %v7412_v47  ;;  %v1542_v2 = vrot.slane %v1502_v60, %v7394_v25 }
 0x495   :  { %6448 = vmatprep.subr.bf16.mxu0 %v6693_v6  ;;  %v1550_v4 = vrot.slane %v1510_v55, %v7394_v25  ;;  %v1546_v6 = vrot.slane %v1506_v61, %v7394_v25 }
 0x497   :  { %6427 = vmatpush3.bf16.msra.mxu1 %v6694_v10  ;;  %v1554_v10 = vrot.slane %v1514_v62, %v7394_v25  ;;  %v5482_v62 = vld [vmem:[#allocation19] sm:$0x1] }
 0x498   :  { %6449 = vmatpush3.bf16.msra.mxu0 %v6695_v21  ;;  %6428 = vmatprep.subr.bf16.mxu1 %v6696_v12 }
 0x499   :  { %6450 = vmatprep.subr.bf16.mxu0 %v6697_v14 }
 0x49b   :  { %6429 = vmatpush3.bf16.msra.mxu1 %v6698_v1 }
 0x49c   :  { %6451 = vmatpush3.bf16.msra.mxu0 %v6699_v16  ;;  %6430 = vmatprep.subr.bf16.mxu1 %v6700_v17 }
 0x49d   :  { %6452 = vmatprep.subr.bf16.mxu0 %v6701_v19 }
 0x49f   :  { %6431 = vmatpush3.bf16.msra.mxu1 %v6702_v24 }
 0x4a0   :  { %6453 = vmatpush3.bf16.msra.mxu0 %v6703_v3  ;;  %6460 = vmatprep.subr.bf16.mxu1 %v6704_v28  ;;  %v6736_v3 = vld [vmem:[#allocation17] sm:$0xff]  }
 0x4a1   :  { %6482 = vmatprep.subr.bf16.mxu0 %v6705_v30 }
 0x4a2   :  { %5338 = vmatmul.mubr.bf16.vlgmr.msra.gmra.mrb[16].mxu1 %v4908_v31  ;;  %v6738_v31 = vld [vmem:[#allocation17 + $0x10] sm:$0xff]  }
 0x4a3   :  { %5378 = vmatmul.mubr.bf16.vlgmr.msra.gmra.mrb[20].mxu0 %v4910_v63  ;;  %6461 = vmatpush3.bf16.msra.mxu1 %v6706_v22  ;;  %v6737_v22 = vld [vmem:[#allocation17 + $0x8] sm:$0xff]   ;;  %v4907_v63 = vld [vmem:[#allocation16] sm:$0x1] }
 0x4a4   :  { %6483 = vmatpush3.bf16.msra.mxu0 %v6707_v32  ;;  %6462 = vmatprep.subr.bf16.mxu1 %v6708_v33  ;;  %v6739_v32 = vld [vmem:[#allocation17 + $0x18] sm:$0xff]   ;;  %v6740_v33 = vld [vmem:[#allocation17 + $0x20] sm:$0xff]  }
 0x4a5   :  { %6484 = vmatprep.subr.bf16.mxu0 %v6709_v34  ;;  %v4916_v34 = vunpack.c.l.bf16 %v4907_v63 }
 0x4a7   :  { %6463 = vmatpush3.bf16.msra.mxu1 %v6710_v45 }
 0x4a8   :  { %6485 = vmatpush3.bf16.msra.mxu0 %v6711_v40  ;;  %6464 = vmatprep.subr.bf16.mxu1 %v6712_v35  ;;  %v4920_v40 = vrot.slane %v4916_v34, %v7394_v25 }
 0x4a9   :  { %6486 = vmatprep.subr.bf16.mxu0 %v6713_v36 }
 0x4ab   :  { %6465 = vmatpush3.bf16.msra.mxu1 %v6714_v38 }
 0x4ac   :  { %6487 = vmatpush3.bf16.msra.mxu0 %v6715_v8  ;;  %6466 = vmatprep.subr.bf16.mxu1 %v6716_v39 }
 0x4ad   :  { %6488 = vmatprep.subr.bf16.mxu0 %v6717_v41 }
 0x4af   :  { %6467 = vmatpush3.bf16.msra.mxu1 %v6718_v43 }
 0x4b0   :  { %6489 = vmatpush3.bf16.msra.mxu0 %v6719_v20  ;;  %6468 = vmatprep.subr.bf16.mxu1 %v6720_v48 }
 0x4b1   :  { %6490 = vmatprep.subr.bf16.mxu0 %v6721_v42 }
 0x4b3   :  { %6469 = vmatpush3.bf16.msra.mxu1 %v6722_v26 }
 0x4b4   :  { %6491 = vmatpush3.bf16.msra.mxu0 %v6723_v23  ;;  %6470 = vmatprep.subr.bf16.mxu1 %v6724_v5  ;;  %v6741_v23 = vld [vmem:[#allocation17 + $0x28] sm:$0xff]   ;;  %v6742_v5 = vld [vmem:[#allocation17 + $0x30] sm:$0xff]  }
 0x4b5   :  { %6492 = vmatprep.subr.bf16.mxu0 %v6725_v49  ;;  %v6743_v49 = vld [vmem:[#allocation17 + $0x38] sm:$0xff]  }
 0x4b7   :  { %6471 = vmatpush3.bf16.msra.mxu1 %v6726_v50 }
 0x4b8   :  { %6493 = vmatpush3.bf16.msra.mxu0 %v6727_v52  ;;  %6472 = vmatprep.subr.bf16.mxu1 %v6728_v53 }
 0x4b9   :  { %6494 = vmatprep.subr.bf16.mxu0 %v6729_v54 }
 0x4bb   :  { %6473 = vmatpush3.bf16.msra.mxu1 %v6730_v56 }
 0x4bc   :  { %6495 = vmatpush3.bf16.msra.mxu0 %v6731_v57  ;;  %6474 = vmatprep.subr.bf16.mxu1 %v6732_v58 }
 0x4bd   :  { %6496 = vmatprep.subr.bf16.mxu0 %v6733_v37 }
 0x4bf   :  { %6475 = vmatpush3.bf16.msra.mxu1 %v6734_v7 }
 0x4c0   :  { %6497 = vmatpush3.bf16.msra.mxu0 %v6735_v9  ;;  %6542 = vmatprep.subr.bf16.mxu1 %v7119_v0 }
 0x4c1   :  { %6562 = vmatprep.subr.bf16.mxu0 %v7119_v0 }
 0x555   :  { %v4600_v11 = vpop.f32.mrb[12].mxu1 }
 0x556   :  { %v6586_v21 = vadd.f32 %v4600_v11, %v1542_v2  ;;  %v4764_v12 = vpop.f32.mrb[16].mxu0  ;;  %v4602_v44 = vpop.f32.mrb[13].mxu1  ;;  %v5484_v2 = vunpack.c.l.bf16 %v5482_v62 }
 0x557   :  { %v6588_v13 = vadd.f32 %v4764_v12, %v1550_v4  ;;  %v6587_v14 = vadd.f32 %v4602_v44, %v1546_v6  ;;  %v4766_v1 = vpop.f32.mrb[17].mxu0  ;;  %v4604_v51 = vpop.f32.mrb[14].mxu1 }
 0x558   :  { %v4775_v15 = vmax.f32 %v6586_v21, 0.0  ;;  %v6589_v46 = vadd.f32 %v4766_v1, %v1554_v10  ;;  %v4768_v16 = vpop.f32.mrb[18].mxu0  ;;  %v4605_v47 = vpop.f32.mrb[15].mxu1  ;;  %v5488_v4 = vrot.slane %v5484_v2, %v7394_v25  ;;  %v6745_v1 = vld [vmem:[#allocation20 + $0x8] sm:$0xff]   ;;  %v6746_v51 = vld [vmem:[#allocation20 + $0x10] sm:$0xff]  }
 0x559   :  { %v4777_v17 = vmax.f32 %v6588_v13, 0.0  ;;  %v4776_v18 = vmax.f32 %v6587_v14, 0.0  ;;  %v4769_v19 = vpop.f32.mrb[19].mxu0  ;;  %v6744_v14 = vld [vmem:[#allocation20] sm:$0xff]   ;;  %v6749_v16 = vld [vmem:[#allocation20 + $0x28] sm:$0xff]   ;;  %v6750_v47 = vld [vmem:[#allocation20 + $0x30] sm:$0xff]  }
 0x55a   :  { %v4778_v24 = vmax.f32 %v6589_v46, 0.0  ;;  %v4912_v28 = vpack.c.bf16 %v4775_v15, %v4775_v15  ;;  %v6747_v15 = vld [vmem:[#allocation20 + $0x18] sm:$0xff]   ;;  %v6748_v46 = vld [vmem:[#allocation20 + $0x20] sm:$0xff]  }
 0x55b   :  { %v4913_v27 = vpack.c.bf16 %v4776_v18, %v4776_v18  ;;  %v4914_v30 = vpack.c.bf16 %v4777_v17, %v4777_v17 }
 0x55c   :  { %v4915_v29 = vpack.c.bf16 %v4778_v24, %v4778_v24  ;;  %v6751_v24 = vld [vmem:[#allocation20 + $0x38] sm:$0xff]  }
 0x55d   :  { %5417 = vmatprep.mubr.bf16.mxu1 %v4913_v27 }
 0x55e   :  { %5457 = vmatprep.mubr.bf16.mxu0 %v4915_v29  ;;  %5418 = vmatmul.mubr.bf16.vlgmr.msra.gmra.mrb[20].mxu1 %v4912_v28 }
 0x55f   :  { %5458 = vmatmul.mubr.bf16.vlgmr.msra.gmra.mrb[24].mxu0 %v4914_v30  ;;  %6543 = vmatpush3.bf16.msra.mxu1 %v6736_v3 }
 0x560   :  { %6544 = vmatprep.subr.bf16.mxu1 %v7119_v0  ;;  %6558 = vmatprep.mubr.msk.bf16.mxu1 %vm7120_vm0, %v7119_v0 }
 0x561   :  { %6578 = vmatprep.mubr.msk.bf16.mxu0 %vm7120_vm0, %v7119_v0  ;;  %6563 = vmatpush3.bf16.msra.mxu0 %v6744_v14 }
 0x562   :  { %6564 = vmatprep.subr.bf16.mxu0 %v7119_v0 }
 0x563   :  { %6545 = vmatpush3.bf16.msra.mxu1 %v6737_v22 }
 0x564   :  { %6546 = vmatprep.subr.bf16.mxu1 %v7119_v0 }
 0x565   :  { %6565 = vmatpush3.bf16.msra.mxu0 %v6745_v1 }
 0x566   :  { %6566 = vmatprep.subr.bf16.mxu0 %v7119_v0 }
 0x567   :  { %6547 = vmatpush3.bf16.msra.mxu1 %v6738_v31 }
 0x568   :  { %6548 = vmatprep.subr.bf16.mxu1 %v7119_v0 }
 0x569   :  { %6567 = vmatpush3.bf16.msra.mxu0 %v6746_v51 }
 0x56a   :  { %6568 = vmatprep.subr.bf16.mxu0 %v7119_v0 }
 0x56b   :  { %6549 = vmatpush3.bf16.msra.mxu1 %v6739_v32 }
 0x56c   :  { %6550 = vmatprep.subr.bf16.mxu1 %v7119_v0 }
 0x56d   :  { %6569 = vmatpush3.bf16.msra.mxu0 %v6747_v15 }
 0x56e   :  { %6570 = vmatprep.subr.bf16.mxu0 %v7119_v0 }
 0x56f   :  { %6551 = vmatpush3.bf16.msra.mxu1 %v6740_v33 }
 0x570   :  { %6552 = vmatprep.subr.bf16.mxu1 %v7119_v0 }
 0x571   :  { %6571 = vmatpush3.bf16.msra.mxu0 %v6748_v46 }
 0x572   :  { %6572 = vmatprep.subr.bf16.mxu0 %v7119_v0 }
 0x573   :  { %6553 = vmatpush3.bf16.msra.mxu1 %v6741_v23 }
 0x574   :  { %6554 = vmatprep.subr.bf16.mxu1 %v7119_v0 }
 0x575   :  { %v6432_v45 = vpop.f32.mrb[16].mxu1  ;;  %6573 = vmatpush3.bf16.msra.mxu0 %v6749_v16 }
 0x576   :  { %v6454_v35 = vpop.f32.mrb[20].mxu0  ;;  %v6433_v36 = vpop.f32.mrb[17].mxu1  ;;  %6574 = vmatprep.subr.bf16.mxu0 %v7119_v0 }
 0x577   :  { %v6434_v38 = vadd.f32 %v6433_v36, %v6432_v45  ;;  %v6455_v8 = vpop.f32.mrb[21].mxu0  ;;  %v6435_v39 = vpop.f32.mrb[18].mxu1  ;;  %6555 = vmatpush3.bf16.msra.mxu1 %v6742_v5 }
 0x578   :  { %v6456_v41 = vadd.f32 %v6455_v8, %v6454_v35  ;;  %v6457_v43 = vpop.f32.mrb[22].mxu0  ;;  %v6436_v20 = vpop.f32.mrb[19].mxu1  ;;  %6556 = vmatprep.subr.bf16.mxu1 %v7119_v0 }
 0x579   :  { %v5340_v48 = vadd.f32 %v6434_v38, %v4920_v40  ;;  %v6458_v42 = vpop.f32.mrb[23].mxu0  ;;  %6575 = vmatpush3.bf16.msra.mxu0 %v6750_v47 }
 0x57a   :  { %6576 = vmatprep.subr.bf16.mxu0 %v7119_v0 }
 0x57b   :  { %v5380_v26 = vadd.f32 %v6456_v41, %v5340_v48  ;;  %6557 = vmatpush3.bf16.msra.mxu1 %v6743_v49 }
 0x57d   :  { %6577 = vmatpush3.bf16.msra.mxu0 %v6751_v24 }
 0x631   :  { %v6476_v50 = vpop.f32.mrb[20].mxu1 }
 0x632   :  { %v6498_v52 = vpop.f32.mrb[24].mxu0  ;;  %v6477_v53 = vpop.f32.mrb[21].mxu1 }
 0x633   :  { %v6478_v54 = vadd.f32 %v6477_v53, %v6476_v50  ;;  %v6499_v56 = vpop.f32.mrb[25].mxu0  ;;  %v6479_v57 = vpop.f32.mrb[22].mxu1 }
 0x634   :  { %v6500_v58 = vadd.f32 %v6499_v56, %v6498_v52  ;;  %v6501_v37 = vpop.f32.mrb[26].mxu0  ;;  %v6480_v7 = vpop.f32.mrb[23].mxu1 }
 0x635   :  { %v5420_v9 = vadd.f32 %v6478_v54, %v5380_v26  ;;  %v6502_v59 = vpop.f32.mrb[27].mxu0 }
 0x637   :  { %v5460_v60 = vadd.f32 %v6500_v58, %v5420_v9 }
 0x639   :  { %v5465_v55 = vmax.f32 %v5460_v60, 0.0 }
 0x63b   :  { %v5483_v61 = vpack.c.bf16 %v5465_v55, %v5465_v55 }
 0x63d   :  { %6559 = vmatmul.mubr.bf16.vlgmr.msra.gmra.mrb[24].mxu1 %v5483_v61 }
 0x710   :  { %v5571_v6 = vpop.f32.mrb[24].mxu1 }
 0x711   :  { %v5572_v10 = vadd.f32 %v5571_v6, %v5488_v4  ;;  %v6560_v11 = vpop.f32.mrb[25].mxu1 }
 0x712   :  { %v5574_v21 = vpop.f32.mrb[26].mxu1 }
 0x713   :  { %v5577_v12 = vmax.f32 %v5572_v10, 0.0  ;;  %v6561_v44 = vpop.f32.mrb[27].mxu1 }
 0x715   :  { %v5578_v13 = vmul.f32 %v5577_v12, %v5577_v12 }
 0x717   :  { %5579 = vadd.xlane.f32.xlu0 %v5578_v13 }
 0x7a4   :  { %v5580_v17 = vpop.xlane.xlu0 %5579 }
 0x7a5   :  { %v5581_v18 = vrot.slane %v5580_v17, 4 }
 0x7a7   :  { %v5582_v19 = vadd.f32 %v5581_v18, %v5580_v17 }
 0x7a9   :  { %v5583_v27 = vrot.slane %v5582_v19, 2 }
 0x7ab   :  { %v5584_v3 = vadd.f32 %v5583_v27, %v5582_v19 }
 0x7ad   :  { %v5585_v28 = vrot.slane %v5584_v3, 1 }
 0x7af   :  { %v5586_v29 = vadd.f32 %v5585_v28, %v5584_v3 }
 0x7b1   :  { %6638 = vpush %v5586_v29 }
 0x7e2   :  { %s6639_s12 = spop %6638 }
 0x7e3   :  { %s5588_s6 = sadd.f32 1e-12, %s6639_s12 }
 0x7e5   :  { %v5589_v30 = vstv %s5588_s6 }
 0x7e6   :  { %6752 = vrsqrt.f32 %v5589_v30 }
 0x7f0   :  { %v6753_v22 = vpop.eup %6752 }
 0x7f1   :  { %6640 = vpush %v6753_v22 }
 0x822   :  { %s6641_s15 = spop %6640 }
 0x823   :  { %s5592_s2 = smul.f32 16.0, %s6641_s15 }
 0x825   :  { %v5593_v31 = vstv %s5592_s2 }
 0x826   :  { %v5594_v32 = vmul.f32 %v5593_v31, %v5577_v12 }
 0x828   :  { %v5613_v33 = vpack.c.bf16 %v5594_v32, %v5594_v32  ;;  %5595 = vst [vmem:[#allocation24] sm:$0xff] %v5594_v32 }
 0x82a   :  { %6579 = vmatmul.mubr.bf16.vlgmr.msra.gmra.mrb[28].mxu0 %v5613_v33 }
 0x82b   :  { %7051 = shalt.err (!%p7048_p10)
}
 0x82c   :  { %s7052_s28 = scalar_lea.hbm %s7606_s14, 128 }
 0x82d   :  { %p7053_p11 = scmp.ne.s32.totalorder %s7606_s14, %s7052_s28  ;;  %p7056_p12 = scmp.lt.u32.totalorder %s7052_s28, %s7606_s14 }
 0x82f   :  { %p7058_p13 = pnand %p7056_p12, %p7053_p11 }
 0x831   :  { %7061 = shalt.err (!%p7058_p13)
}
 0x832   :  { %5727 = dma.vmem_to_hbm [thread:$0]  %s5725_s3, 128, %s7606_s14, [#allocation25]   ;;  %v5612_v0 = vld [vmem:[#allocation22] sm:$0x1] }
 0x833   :  { %v5614_v63 = vunpack.c.l.bf16 %v5612_v0  ;;  %s7123_s0 = smov [#allocation23]  }
 0x834   :  { %s5714_s26 = sshll.u32 %s7123_s0, 4  ;;  %s5715_s26 = int_to_ptr.vmem [resolvable:$true] %s5714_s26 }
 0x835   :  { %v5618_v34 = vrot.slane %v5614_v63, %v7394_v25  ;;  %s7062_s29 = scalar_lea.vmem %s5715_s26, 128  ;;  %p7067_p1 = scmp.lt.s32.totalorder %s5715_s26, %s5715_s26 }
 0x836   :  { %p7063_p0 = scmp.ne.s32.totalorder %s5715_s26, %s7062_s29  ;;  %p7068_p2 = scmp.lt.s32.totalorder %s7062_s29, %s7062_s29 }
 0x838   :  { %p7069_p3 = por %p7068_p2, %p7067_p1 }
 0x83a   :  { %p7070_p4 = pnand %p7069_p3, %p7063_p0 }
 0x8fd   :  { %v5701_v45 = vpop.f32.mrb[28].mxu0 }
 0x8fe   :  { %v5702_v40 = vadd.f32 %v5701_v45, %v5618_v34  ;;  %v6580_v35 = vpop.f32.mrb[29].mxu0 }
 0x8ff   :  { %v5704_v36 = vpop.f32.mrb[30].mxu0 }
 0x900   :  { %5707 = vst [vmem:[#allocation23] sm:$0xff] %v5702_v40  ;;  %v6581_v38 = vpop.f32.mrb[31].mxu0 }
 0x901   :  { %7073 = shalt.err (!%p7070_p4)
}
 0x902   :  { %s7074_s17 = scalar_lea.hbm %s7605_s13, 128 }
 0x903   :  { %p7075_p5 = scmp.ne.s32.totalorder %s7605_s13, %s7074_s17  ;;  %p7078_p6 = scmp.lt.u32.totalorder %s7074_s17, %s7605_s13 }
 0x905   :  { %p7080_p7 = pnand %p7078_p6, %p7075_p5 }
 0x907   :  { %7083 = shalt.err (!%p7080_p7)
}
 0x908   :  { %5717 = dma.vmem_to_hbm [thread:$0]  %s5715_s26, 128, %s7605_s13, [#allocation4]  }
 0x909   :  { %7098 = dma.done.wait [#allocation4], 128  }
 0x90a   :  { %7099 = vsyncadd [#allocation4], 4294967168 }
 0x90b   :  { %7100 = dma.done.wait [#allocation25], 128  }
 0x90c   :  { %7101 = vsyncadd [#allocation25], 4294967168 }
 0x90d   :  { %5734 = vsyncpa [#allocation3], 1 }
 0x90e   :  { %5735 = vsyncpa [#allocation6], 1 }
 0x90f   :  { %5736 = vsyncpa [#allocation9], 1 }
 0x910   :  { %5737 = vsyncpa [#allocation12], 1 }
 0x911   :  { %5738 = vsyncpa [#allocation15], 1 }
 0x912   :  { %5739 = vsyncpa [#allocation18], 1 }
 0x913   :  { %5740 = vsyncpa [#allocation21], 1 }
 0x914   :  { %5741 = vsyncpa [#allocation4], 1 }
 0x915   :  { %5742 = vsyncpa [#allocation25], 1 }

</bundles_post_ra>
